<compile_context>
chip_gen: v6e
topology: v6e:2x2x1
jax: 0.10.0
libtpu: 0.0.40
codegen_flags: <defaults>
</compile_context>

<pallas_src>
import functools

import numpy as np
import jax
import jax.numpy as jnp
from jax.experimental import pallas as pl
from jax.experimental.pallas import tpu as pltpu


# --------------------------------------------------------------------------------------
# Kernel 1: all three modalities (encoder + project + private/shared + recon)
# --------------------------------------------------------------------------------------
def _modality_kernel(x_ref, e1w_ref, e1b_ref, e2w_ref, e2b_ref,
                     pw_ref, pb_ref, lg_ref, lb_ref,
                     psw_ref, psb_ref, rw_ref, rb_ref,
                     ps_out, ro_out, *, H, eps=1e-5):
    # modality order m: 0=text, 1=video, 2=audio
    for m in range(3):
        x = x_ref[m]                                                          # (B, Kpad)
        h = jnp.maximum(jnp.dot(x, e1w_ref[m], preferred_element_type=jnp.float32)
                        + e1b_ref[m], 0.0)
        h = jnp.maximum(jnp.dot(h, e2w_ref[m], preferred_element_type=jnp.float32)
                        + e2b_ref[m], 0.0)
        # project_*: Linear -> ReLU -> LayerNorm
        p = jnp.maximum(jnp.dot(h, pw_ref[m], preferred_element_type=jnp.float32)
                        + pb_ref[m], 0.0)
        mu = jnp.mean(p, axis=-1, keepdims=True)
        var = jnp.mean((p - mu) ** 2, axis=-1, keepdims=True)
        orig = (p - mu) * jax.lax.rsqrt(var + eps) * lg_ref[m] + lb_ref[m]    # (B, H)
        # private_m and shared applied as one lane-dense (H -> 2H) matmul
        ps = jax.nn.sigmoid(jnp.dot(orig, psw_ref[m], preferred_element_type=jnp.float32)
                            + psb_ref[m])                                     # (B, 2H)
        priv = ps[:, :H]
        shared = ps[:, H:]
        recon = jnp.dot(priv + shared, rw_ref[m],
                        preferred_element_type=jnp.float32) + rb_ref[m]       # (B, H)
        # lane-dense packed outputs
        ps_out[:, m * H:(m + 1) * H] = priv            # [priv_t | priv_v | priv_a | ...]
        ps_out[:, (3 + m) * H:(4 + m) * H] = shared    # [... | sh_t | sh_v | sh_a]
        ro_out[:, m * H:(m + 1) * H] = recon           # [rec_t | rec_v | rec_a | ...]
        ro_out[:, (3 + m) * H:(4 + m) * H] = orig      # [... | orig_t | orig_v | orig_a]


# --------------------------------------------------------------------------------------
# Kernel 2: full transformer encoder layer + fusion MLP + both heads (grid over batch)
# --------------------------------------------------------------------------------------
def _transformer_fusion_kernel(src_ref, wqkv_ref, bqkv_ref, wo_ref, bo_ref,
                               n1g_ref, n1b_ref, w1_ref, b1_ref, w2_ref, b2_ref,
                               n2g_ref, n2b_ref, wf1_ref, bf1_ref, wf2_ref, bf2_ref,
                               wh_ref, bh_ref,
                               feat_ref, emo_ref, val_ref,
                               *, H, nhead, od1, eps=1e-5):
    S = src_ref.shape[1]                               # 6 stacked views (sequence length)
    dh = H // nhead
    scale = 1.0 / float(np.sqrt(dh))

    def ln(x, g, b):
        mu = jnp.mean(x, axis=-1, keepdims=True)
        var = jnp.mean((x - mu) ** 2, axis=-1, keepdims=True)
        return (x - mu) * jax.lax.rsqrt(var + eps) * g + b

    x = src_ref[0]                                                            # (S, H)

    # --- multi-head self-attention (post-LN, torch defaults, eval dropout) ---
    qkv = jnp.dot(x, wqkv_ref[...], preferred_element_type=jnp.float32) + bqkv_ref[...]
    heads = []
    for hh in range(nhead):
        q = qkv[:, hh * dh:(hh + 1) * dh] * scale
        k = qkv[:, H + hh * dh:H + (hh + 1) * dh]
        v = qkv[:, 2 * H + hh * dh:2 * H + (hh + 1) * dh]
        s = jax.lax.dot_general(q, k, (((1,), (1,)), ((), ())),
                                preferred_element_type=jnp.float32)           # (S, S)
        s = s - jnp.max(s, axis=-1, keepdims=True)
        p = jnp.exp(s)
        p = p * pl.reciprocal(jnp.sum(p, axis=-1, keepdims=True), approx=True)
        heads.append(jnp.dot(p, v, preferred_element_type=jnp.float32))       # (S, dh)
    attn = jnp.concatenate(heads, axis=1)                                     # (S, H)
    attn = jnp.dot(attn, wo_ref[...], preferred_element_type=jnp.float32) + bo_ref[...]
    x = ln(x + attn, n1g_ref[...], n1b_ref[...])

    # --- feed-forward (bf16 operands, f32 accumulation) ---
    ff = jnp.dot(x.astype(jnp.bfloat16), w1_ref[...],
                 preferred_element_type=jnp.float32) + b1_ref[...]
    ff = jnp.maximum(ff, 0.0)
    ff = jnp.dot(ff.astype(jnp.bfloat16), w2_ref[...],
                 preferred_element_type=jnp.float32) + b2_ref[...]
    x = ln(x + ff, n2g_ref[...], n2b_ref[...])                                # (S, H)

    # --- fusion MLP + heads for this batch element (hcat is lane-dense 6H) ---
    hcat = jnp.concatenate([x[s_:s_ + 1, :] for s_ in range(S)], axis=1)      # (1, 6H)
    f1 = jnp.maximum(jnp.dot(hcat, wf1_ref[...], preferred_element_type=jnp.float32)
                     + bf1_ref[...], 0.0)                                     # (1, 3H)
    feat = jnp.dot(f1, wf2_ref[...], preferred_element_type=jnp.float32) + bf2_ref[...]
    out = jnp.dot(feat, wh_ref[...], preferred_element_type=jnp.float32) + bh_ref[...]
    feat_ref[0] = feat
    emo_ref[0] = out[:, :od1]
    val_ref[0] = out[:, od1:]


# --------------------------------------------------------------------------------------
# Kernel 3: all inter-modality losses (6x DiffLoss + 3x CMD + 3x MSE) -> weighted scalar
# --------------------------------------------------------------------------------------
def _loss_kernel(ps_ref, ro_ref, o_ref, *, H, dw, sw, rw, n_moments):
    pt, pv, pa, st, sv, sa = [ps_ref[:, i * H:(i + 1) * H] for i in range(6)]
    rt, rv, ra, ot, ov, oa = [ro_ref[:, i * H:(i + 1) * H] for i in range(6)]

    def red11(x):  # sum over all elements -> (1, 1)
        s = jnp.sum(x, axis=1, keepdims=True)
        return jnp.sum(s, axis=0, keepdims=True)

    def diff(a, b):
        a = a - jnp.mean(a, axis=0, keepdims=True)
        b = b - jnp.mean(b, axis=0, keepdims=True)
        a = a / (jnp.sqrt(jnp.sum(a * a, axis=1, keepdims=True)) + 1e-6)
        b = b / (jnp.sqrt(jnp.sum(b * b, axis=1, keepdims=True)) + 1e-6)
        # contract over the batch dim of both operands (no explicit transpose)
        m = jax.lax.dot_general(a, b, (((0,), (0,)), ((), ())),
                                preferred_element_type=jnp.float32)           # (H, H)
        return red11(m * m) / float(m.shape[0] * m.shape[1])

    def matchnorm(u, v):                                                      # (1, D) each
        d = u - v
        return jnp.sqrt(jnp.sum(d * d, axis=1, keepdims=True))                # (1, 1)

    def cmd(a, b):
        ma = jnp.mean(a, axis=0, keepdims=True)
        mb = jnp.mean(b, axis=0, keepdims=True)
        ca = a - ma
        cb = b - mb
        total = matchnorm(ma, mb)
        for k in range(2, n_moments + 1):
            total = total + matchnorm(jnp.mean(ca ** k, axis=0, keepdims=True),
                                      jnp.mean(cb ** k, axis=0, keepdims=True))
        return total

    def mse(pred, real):
        d = real - pred
        return red11(d * d) / float(d.shape[0] * d.shape[1])

    diff_total = (diff(pt, st) + diff(pv, sv) + diff(pa, sa)
                  + diff(pa, pt) + diff(pa, pv) + diff(pt, pv))
    cmd_total = (cmd(st, sv) + cmd(st, sa) + cmd(sa, sv)) / 3.0
    recon_total = (mse(rt, ot) + mse(rv, ov) + mse(ra, oa)) / 3.0
    o_ref[...] = dw * diff_total + sw * cmd_total + rw * recon_total


# --------------------------------------------------------------------------------------
# Parameter initialization (deterministic, synthetic)
# --------------------------------------------------------------------------------------
def init_linear(key, in_dim, out_dim):
    k1, k2 = jax.random.split(key)
    bound = 1.0 / np.sqrt(in_dim)
    w = jax.random.uniform(k1, (in_dim, out_dim), jnp.float32, -bound, bound)  # (K, N)
    b = jax.random.uniform(k2, (out_dim,), jnp.float32, -bound, bound)
    return {"w": w, "b": b}


def init_params(key, cfg):
    H = cfg["hidden_dim"]
    out_dim = H // 2
    ffn = cfg["ffn_dim"]
    keys = jax.random.split(key, 32)
    ki = iter(keys)
    p = {}
    # TODO(synk): MLPEncoder definition not included in the reference file; assumed
    #             Linear->ReLU->Dropout->Linear->ReLU->Dropout (dropout = identity at eval).
    for name, d in (("audio_enc", cfg["audio_dim"]),
                    ("text_enc", cfg["text_dim"]),
                    ("video_enc", cfg["video_dim"])):
        p[name] = {"fc1": init_linear(next(ki), d, H),
                   "fc2": init_linear(next(ki), H, H)}
    for name in ("project_t", "project_v", "project_a"):
        p[name] = {**init_linear(next(ki), H, H),
                   "ln_g": jnp.ones((H,), jnp.float32),
                   "ln_b": jnp.zeros((H,), jnp.float32)}
    for name in ("private_t", "private_v", "private_a", "shared",
                 "recon_t", "recon_v", "recon_a"):
        p[name] = init_linear(next(ki), H, H)
    p["fusion1"] = init_linear(next(ki), 6 * H, 3 * H)
    p["fusion2"] = init_linear(next(ki), 3 * H, out_dim)
    p["fc_out_1"] = init_linear(next(ki), out_dim, cfg["output_dim1"])
    p["fc_out_2"] = init_linear(next(ki), out_dim, cfg["output_dim2"])
    p["transformer"] = {
        "in_proj": init_linear(next(ki), H, 3 * H),
        "out_proj": init_linear(next(ki), H, H),
        "linear1": init_linear(next(ki), H, ffn),
        "linear2": init_linear(next(ki), ffn, H),
        "norm1_g": jnp.ones((H,), jnp.float32), "norm1_b": jnp.zeros((H,), jnp.float32),
        "norm2_g": jnp.ones((H,), jnp.float32), "norm2_b": jnp.zeros((H,), jnp.float32),
    }
    return p


# --------------------------------------------------------------------------------------
# Forward pass: 3 fused pallas_calls + tiny JAX glue (packing / reshapes)
# --------------------------------------------------------------------------------------
def misa_forward(params, audios, texts, videos, cfg):
    H = cfg["hidden_dim"]
    B = audios.shape[0]
    nhead = 2

    # ---------------- pack modality inputs/weights (cheap trace-time concats) --------
    # modality order everywhere: 0=text, 1=video, 2=audio
    enc_names = ("text_enc", "video_enc", "audio_enc")
    xs = (texts, videos, audios)
    Kpad = max(x.shape[1] for x in xs)

    def pad_cols(x):
        return jnp.pad(x, ((0, 0), (0, Kpad - x.shape[1])))

    def pad_rows(w):
        return jnp.pad(w, ((0, Kpad - w.shape[0]), (0, 0)))

    x_pack = jnp.stack([pad_cols(x) for x in xs], axis=0)                       # (3,B,Kpad)
    e1w = jnp.stack([pad_rows(params[n]["fc1"]["w"]) for n in enc_names], 0)    # (3,Kpad,H)
    e1b = jnp.stack([params[n]["fc1"]["b"].reshape(1, H) for n in enc_names], 0)
    e2w = jnp.stack([params[n]["fc2"]["w"] for n in enc_names], 0)
    e2b = jnp.stack([params[n]["fc2"]["b"].reshape(1, H) for n in enc_names], 0)

    proj_names = ("project_t", "project_v", "project_a")
    pw = jnp.stack([params[n]["w"] for n in proj_names], 0)
    pb = jnp.stack([params[n]["b"].reshape(1, H) for n in proj_names], 0)
    lg = jnp.stack([params[n]["ln_g"].reshape(1, H) for n in proj_names], 0)
    lb = jnp.stack([params[n]["ln_b"].reshape(1, H) for n in proj_names], 0)

    priv_names = ("private_t", "private_v", "private_a")
    psw = jnp.stack([jnp.concatenate([params[n]["w"], params["shared"]["w"]], axis=1)
                     for n in priv_names], 0)                                   # (3,H,2H)
    psb = jnp.stack([jnp.concatenate([params[n]["b"], params["shared"]["b"]]).reshape(1, 2 * H)
                     for n in priv_names], 0)

    rec_names = ("recon_t", "recon_v", "recon_a")
    rw_ = jnp.stack([params[n]["w"] for n in rec_names], 0)
    rb_ = jnp.stack([params[n]["b"].reshape(1, H) for n in rec_names], 0)

    # ---------------- kernel 1: all modality chains in one launch --------------------
    ps_pack, ro_pack = pl.pallas_call(
        functools.partial(_modality_kernel, H=H),
        out_shape=(jax.ShapeDtypeStruct((B, 6 * H), jnp.float32),   # [priv_t|priv_v|priv_a|sh_t|sh_v|sh_a]
                   jax.ShapeDtypeStruct((B, 6 * H), jnp.float32)),  # [rec_t|rec_v|rec_a|orig_t|orig_v|orig_a]
    )(x_pack, e1w, e1b, e2w, e2b, pw, pb, lg, lb, psw, psb, rw_, rb_)

    # ---------------- kernel 2: transformer layer + fusion + heads -------------------
    tp = params["transformer"]
    ffn = tp["linear1"]["w"].shape[1]
    out_dim = params["fusion2"]["w"].shape[1]
    od1 = params["fc_out_1"]["w"].shape[1]
    od2 = params["fc_out_2"]["w"].shape[1]

    src = ps_pack.reshape(B, 6, H)                      # (B, seq=6, H); free row-major reshape
    w1_bf = tp["linear1"]["w"].astype(jnp.bfloat16)     # halve DMA for the only big weights
    w2_bf = tp["linear2"]["w"].astype(jnp.bfloat16)
    whead = jnp.concatenate([params["fc_out_1"]["w"], params["fc_out_2"]["w"]], axis=1)
    bhead = jnp.concatenate([params["fc_out_1"]["b"], params["fc_out_2"]["b"]]).reshape(1, od1 + od2)

    const2 = lambda b: (0, 0)  # noqa: E731  (grid-invariant weight blocks stay VMEM-resident)
    feats3, emos3, vals3 = pl.pallas_call(
        functools.partial(_transformer_fusion_kernel, H=H, nhead=nhead, od1=od1),
        grid=(B,),
        in_specs=[
            pl.BlockSpec((1, 6, H), lambda b: (b, 0, 0)),       # src (per batch element)
            pl.BlockSpec((H, 3 * H), const2),                   # in_proj w
            pl.BlockSpec((1, 3 * H), const2),                   # in_proj b
            pl.BlockSpec((H, H), const2),                       # out_proj w
            pl.BlockSpec((1, H), const2),                       # out_proj b
            pl.BlockSpec((1, H), const2),                       # norm1 g
            pl.BlockSpec((1, H), const2),                       # norm1 b
            pl.BlockSpec((H, ffn), const2),                     # linear1 w (bf16)
            pl.BlockSpec((1, ffn), const2),                     # linear1 b
            pl.BlockSpec((ffn, H), const2),                     # linear2 w (bf16)
            pl.BlockSpec((1, H), const2),                       # linear2 b
            pl.BlockSpec((1, H), const2),                       # norm2 g
            pl.BlockSpec((1, H), const2),                       # norm2 b
            pl.BlockSpec((6 * H, 3 * H), const2),               # fusion1 w
            pl.BlockSpec((1, 3 * H), const2),                   # fusion1 b
            pl.BlockSpec((3 * H, out_dim), const2),             # fusion2 w
            pl.BlockSpec((1, out_dim), const2),                 # fusion2 b
            pl.BlockSpec((out_dim, od1 + od2), const2),         # heads w (fc_out_1|fc_out_2)
            pl.BlockSpec((1, od1 + od2), const2),               # heads b
        ],
        out_specs=(
            pl.BlockSpec((1, 1, out_dim), lambda b: (b, 0, 0)),
            pl.BlockSpec((1, 1, od1), lambda b: (b, 0, 0)),
            pl.BlockSpec((1, 1, od2), lambda b: (b, 0, 0)),
        ),
        out_shape=(jax.ShapeDtypeStruct((B, 1, out_dim), jnp.float32),
                   jax.ShapeDtypeStruct((B, 1, od1), jnp.float32),
                   jax.ShapeDtypeStruct((B, 1, od2), jnp.float32)),
        compiler_params=pltpu.CompilerParams(dimension_semantics=("parallel",)),
    )(src,
      tp["in_proj"]["w"], tp["in_proj"]["b"].reshape(1, 3 * H),
      tp["out_proj"]["w"], tp["out_proj"]["b"].reshape(1, H),
      tp["norm1_g"].reshape(1, H), tp["norm1_b"].reshape(1, H),
      w1_bf, tp["linear1"]["b"].reshape(1, ffn),
      w2_bf, tp["linear2"]["b"].reshape(1, H),
      tp["norm2_g"].reshape(1, H), tp["norm2_b"].reshape(1, H),
      params["fusion1"]["w"], params["fusion1"]["b"].reshape(1, 3 * H),
      params["fusion2"]["w"], params["fusion2"]["b"].reshape(1, out_dim),
      whead, bhead)

    features = feats3[:, 0, :]
    emos_out = emos3[:, 0, :]
    vals_out = vals3[:, 0, :]

    # ---------------- kernel 3: all losses in one launch ------------------------------
    interloss = pl.pallas_call(
        functools.partial(_loss_kernel, H=H,
                          dw=float(cfg["diff_weight"]),
                          sw=float(cfg["sim_weight"]),
                          rw=float(cfg["recon_weight"]),
                          n_moments=5),
        out_shape=jax.ShapeDtypeStruct((1, 1), jnp.float32),
    )(ps_pack, ro_pack)[0, 0]

    return features, emos_out, vals_out, interloss


# --------------------------------------------------------------------------------------
# Main
# --------------------------------------------------------------------------------------
if __name__ == "__main__":
    cfg = {
        "audio_dim": 10,
        "text_dim": 12,
        "video_dim": 14,
        "hidden_dim": 32,
        "output_dim1": 4,
        "output_dim2": 1,
        "ffn_dim": 2048,       # PyTorch TransformerEncoderLayer default dim_feedforward
        "sim_weight": 1.0,
        "diff_weight": 0.3,
        "recon_weight": 1.0,
    }
    batch = 4

    key = jax.random.PRNGKey(0)
    k_par, k_a, k_t, k_v = jax.random.split(key, 4)
    params = init_params(k_par, cfg)

    audios = jax.random.normal(k_a, (batch, cfg["audio_dim"]), jnp.float32)
    texts = jax.random.normal(k_t, (batch, cfg["text_dim"]), jnp.float32)
    videos = jax.random.normal(k_v, (batch, cfg["video_dim"]), jnp.float32)

    fwd = jax.jit(functools.partial(misa_forward, cfg=cfg))
    features, emos_out, vals_out, interloss = fwd(params, audios, texts, videos)
    jax.block_until_ready((features, emos_out, vals_out, interloss))

    assert features.shape == (batch, cfg["hidden_dim"] // 2)
    assert emos_out.shape == (batch, cfg["output_dim1"])
    assert vals_out.shape == (batch, cfg["output_dim2"])
    assert interloss.shape == ()
    print("KERNEL_OK")
</pallas_src>

<mosaic_0001>
module attributes {stable_mosaic.version = 11 : i64} {
  func.func @_modality_kernel(%arg0: memref<3x4x14xf32, #tpu.memory_space<vmem>>, %arg1: memref<3x14x32xf32, #tpu.memory_space<vmem>>, %arg2: memref<3x1x32xf32, #tpu.memory_space<vmem>>, %arg3: memref<3x32x32xf32, #tpu.memory_space<vmem>>, %arg4: memref<3x1x32xf32, #tpu.memory_space<vmem>>, %arg5: memref<3x32x32xf32, #tpu.memory_space<vmem>>, %arg6: memref<3x1x32xf32, #tpu.memory_space<vmem>>, %arg7: memref<3x1x32xf32, #tpu.memory_space<vmem>>, %arg8: memref<3x1x32xf32, #tpu.memory_space<vmem>>, %arg9: memref<3x32x64xf32, #tpu.memory_space<vmem>>, %arg10: memref<3x1x64xf32, #tpu.memory_space<vmem>>, %arg11: memref<3x32x32xf32, #tpu.memory_space<vmem>>, %arg12: memref<3x1x32xf32, #tpu.memory_space<vmem>>, %arg13: memref<4x192xf32, #tpu.memory_space<vmem>>, %arg14: memref<4x192xf32, #tpu.memory_space<vmem>>) attributes {dimension_semantics = [], scalar_prefetch = 0 : i64, scratch_operands = 0 : i64, tpu.core_type = #tpu.core_type<tc>} {
    %c0 = arith.constant 0 : index
    %c0_0 = arith.constant 0 : index
    %c0_1 = arith.constant 0 : index
    %0 = vector.load %arg0[%c0, %c0_0, %c0_1] : memref<3x4x14xf32, #tpu.memory_space<vmem>>, vector<1x4x14xf32>
    %1 = vector.shape_cast %0 : vector<1x4x14xf32> to vector<4x14xf32>
    %c0_2 = arith.constant 0 : index
    %c0_3 = arith.constant 0 : index
    %c0_4 = arith.constant 0 : index
    %2 = vector.load %arg1[%c0_2, %c0_3, %c0_4] : memref<3x14x32xf32, #tpu.memory_space<vmem>>, vector<1x14x32xf32>
    %3 = vector.shape_cast %2 : vector<1x14x32xf32> to vector<14x32xf32>
    %cst = arith.constant dense<0.000000e+00> : vector<4x32xf32>
    %4 = tpu.matmul %1, %3, %cst {dimension_numbers = #tpu.dot_dimension_numbers<[1], [0], [0], [1], [0, 0, 1, 1], [], []>} : vector<4x14xf32>, vector<14x32xf32>, vector<4x32xf32> -> vector<4x32xf32>
    %c0_5 = arith.constant 0 : index
    %c0_6 = arith.constant 0 : index
    %c0_7 = arith.constant 0 : index
    %5 = vector.load %arg2[%c0_5, %c0_6, %c0_7] : memref<3x1x32xf32, #tpu.memory_space<vmem>>, vector<1x1x32xf32>
    %6 = vector.shape_cast %5 : vector<1x1x32xf32> to vector<1x32xf32>
    %7 = vector.broadcast %6 : vector<1x32xf32> to vector<4x32xf32>
    %8 = arith.addf %4, %7 : vector<4x32xf32>
    %cst_8 = arith.constant 0.000000e+00 : f32
    %9 = vector.broadcast %cst_8 : f32 to vector<4x32xf32>
    %10 = arith.maximumf %8, %9 : vector<4x32xf32>
    %c0_9 = arith.constant 0 : index
    %c0_10 = arith.constant 0 : index
    %c0_11 = arith.constant 0 : index
    %11 = vector.load %arg3[%c0_9, %c0_10, %c0_11] : memref<3x32x32xf32, #tpu.memory_space<vmem>>, vector<1x32x32xf32>
    %12 = vector.shape_cast %11 : vector<1x32x32xf32> to vector<32x32xf32>
    %cst_12 = arith.constant dense<0.000000e+00> : vector<4x32xf32>
    %13 = tpu.matmul %10, %12, %cst_12 {dimension_numbers = #tpu.dot_dimension_numbers<[1], [0], [0], [1], [0, 0, 1, 1], [], []>} : vector<4x32xf32>, vector<32x32xf32>, vector<4x32xf32> -> vector<4x32xf32>
    %c0_13 = arith.constant 0 : index
    %c0_14 = arith.constant 0 : index
    %c0_15 = arith.constant 0 : index
    %14 = vector.load %arg4[%c0_13, %c0_14, %c0_15] : memref<3x1x32xf32, #tpu.memory_space<vmem>>, vector<1x1x32xf32>
    %15 = vector.shape_cast %14 : vector<1x1x32xf32> to vector<1x32xf32>
    %16 = vector.broadcast %15 : vector<1x32xf32> to vector<4x32xf32>
    %17 = arith.addf %13, %16 : vector<4x32xf32>
    %cst_16 = arith.constant 0.000000e+00 : f32
    %18 = vector.broadcast %cst_16 : f32 to vector<4x32xf32>
    %19 = arith.maximumf %17, %18 : vector<4x32xf32>
    %c0_17 = arith.constant 0 : index
    %c0_18 = arith.constant 0 : index
    %c0_19 = arith.constant 0 : index
    %20 = vector.load %arg5[%c0_17, %c0_18, %c0_19] : memref<3x32x32xf32, #tpu.memory_space<vmem>>, vector<1x32x32xf32>
    %21 = vector.shape_cast %20 : vector<1x32x32xf32> to vector<32x32xf32>
    %cst_20 = arith.constant dense<0.000000e+00> : vector<4x32xf32>
    %22 = tpu.matmul %19, %21, %cst_20 {dimension_numbers = #tpu.dot_dimension_numbers<[1], [0], [0], [1], [0, 0, 1, 1], [], []>} : vector<4x32xf32>, vector<32x32xf32>, vector<4x32xf32> -> vector<4x32xf32>
    %c0_21 = arith.constant 0 : index
    %c0_22 = arith.constant 0 : index
    %c0_23 = arith.constant 0 : index
    %23 = vector.load %arg6[%c0_21, %c0_22, %c0_23] : memref<3x1x32xf32, #tpu.memory_space<vmem>>, vector<1x1x32xf32>
    %24 = vector.shape_cast %23 : vector<1x1x32xf32> to vector<1x32xf32>
    %25 = vector.broadcast %24 : vector<1x32xf32> to vector<4x32xf32>
    %26 = arith.addf %22, %25 : vector<4x32xf32>
    %cst_24 = arith.constant 0.000000e+00 : f32
    %27 = vector.broadcast %cst_24 : f32 to vector<4x32xf32>
    %28 = arith.maximumf %26, %27 : vector<4x32xf32>
    %cst_25 = arith.constant dense<0.000000e+00> : vector<4xf32>
    %29 = vector.multi_reduction <add>, %28, %cst_25 [1] : vector<4x32xf32> to vector<4xf32>
    %30 = vector.shape_cast %29 : vector<4xf32> to vector<4x1xf32>
    %cst_26 = arith.constant 3.200000e+01 : f32
    %31 = vector.broadcast %cst_26 : f32 to vector<4x1xf32>
    %32 = arith.divf %30, %31 : vector<4x1xf32>
    %33 = vector.broadcast %32 : vector<4x1xf32> to vector<4x32xf32>
    %34 = arith.subf %28, %33 : vector<4x32xf32>
    %35 = arith.mulf %34, %34 : vector<4x32xf32>
    %cst_27 = arith.constant dense<0.000000e+00> : vector<4xf32>
    %36 = vector.multi_reduction <add>, %35, %cst_27 [1] : vector<4x32xf32> to vector<4xf32>
    %37 = vector.shape_cast %36 : vector<4xf32> to vector<4x1xf32>
    %cst_28 = arith.constant 3.200000e+01 : f32
    %38 = vector.broadcast %cst_28 : f32 to vector<4x1xf32>
    %39 = arith.divf %37, %38 : vector<4x1xf32>
    %40 = vector.broadcast %32 : vector<4x1xf32> to vector<4x32xf32>
    %41 = arith.subf %28, %40 : vector<4x32xf32>
    %cst_29 = arith.constant 9.99999974E-6 : f32
    %42 = vector.broadcast %cst_29 : f32 to vector<4x1xf32>
    %43 = arith.addf %39, %42 : vector<4x1xf32>
    %44 = math.rsqrt %43 : vector<4x1xf32>
    %45 = vector.broadcast %44 : vector<4x1xf32> to vector<4x32xf32>
    %46 = arith.mulf %41, %45 : vector<4x32xf32>
    %c0_30 = arith.constant 0 : index
    %c0_31 = arith.constant 0 : index
    %c0_32 = arith.constant 0 : index
    %47 = vector.load %arg7[%c0_30, %c0_31, %c0_32] : memref<3x1x32xf32, #tpu.memory_space<vmem>>, vector<1x1x32xf32>
    %48 = vector.shape_cast %47 : vector<1x1x32xf32> to vector<1x32xf32>
    %49 = vector.broadcast %48 : vector<1x32xf32> to vector<4x32xf32>
    %50 = arith.mulf %46, %49 : vector<4x32xf32>
    %c0_33 = arith.constant 0 : index
    %c0_34 = arith.constant 0 : index
    %c0_35 = arith.constant 0 : index
    %51 = vector.load %arg8[%c0_33, %c0_34, %c0_35] : memref<3x1x32xf32, #tpu.memory_space<vmem>>, vector<1x1x32xf32>
    %52 = vector.shape_cast %51 : vector<1x1x32xf32> to vector<1x32xf32>
    %53 = vector.broadcast %52 : vector<1x32xf32> to vector<4x32xf32>
    %54 = arith.addf %50, %53 : vector<4x32xf32>
    %c0_36 = arith.constant 0 : index
    %c0_37 = arith.constant 0 : index
    %c0_38 = arith.constant 0 : index
    %55 = vector.load %arg9[%c0_36, %c0_37, %c0_38] : memref<3x32x64xf32, #tpu.memory_space<vmem>>, vector<1x32x64xf32>
    %56 = vector.shape_cast %55 : vector<1x32x64xf32> to vector<32x64xf32>
    %cst_39 = arith.constant dense<0.000000e+00> : vector<4x64xf32>
    %57 = tpu.matmul %54, %56, %cst_39 {dimension_numbers = #tpu.dot_dimension_numbers<[1], [0], [0], [1], [0, 0, 1, 1], [], []>} : vector<4x32xf32>, vector<32x64xf32>, vector<4x64xf32> -> vector<4x64xf32>
    %c0_40 = arith.constant 0 : index
    %c0_41 = arith.constant 0 : index
    %c0_42 = arith.constant 0 : index
    %58 = vector.load %arg10[%c0_40, %c0_41, %c0_42] : memref<3x1x64xf32, #tpu.memory_space<vmem>>, vector<1x1x64xf32>
    %59 = vector.shape_cast %58 : vector<1x1x64xf32> to vector<1x64xf32>
    %60 = vector.broadcast %59 : vector<1x64xf32> to vector<4x64xf32>
    %61 = arith.addf %57, %60 : vector<4x64xf32>
    %62 = arith.negf %61 : vector<4x64xf32>
    %63 = math.exp %62 : vector<4x64xf32>
    %cst_43 = arith.constant 1.000000e+00 : f32
    %64 = vector.broadcast %cst_43 : f32 to vector<4x64xf32>
    %65 = arith.addf %64, %63 : vector<4x64xf32>
    %66 = arith.divf %64, %65 : vector<4x64xf32>
    %67 = vector.extract_strided_slice %66 {offsets = [0, 0], sizes = [4, 32], strides = [1, 1]} : vector<4x64xf32> to vector<4x32xf32>
    %68 = vector.extract_strided_slice %66 {offsets = [0, 32], sizes = [4, 32], strides = [1, 1]} : vector<4x64xf32> to vector<4x32xf32>
    %69 = arith.addf %67, %68 : vector<4x32xf32>
    %c0_44 = arith.constant 0 : index
    %c0_45 = arith.constant 0 : index
    %c0_46 = arith.constant 0 : index
    %70 = vector.load %arg11[%c0_44, %c0_45, %c0_46] : memref<3x32x32xf32, #tpu.memory_space<vmem>>, vector<1x32x32xf32>
    %71 = vector.shape_cast %70 : vector<1x32x32xf32> to vector<32x32xf32>
    %cst_47 = arith.constant dense<0.000000e+00> : vector<4x32xf32>
    %72 = tpu.matmul %69, %71, %cst_47 {dimension_numbers = #tpu.dot_dimension_numbers<[1], [0], [0], [1], [0, 0, 1, 1], [], []>} : vector<4x32xf32>, vector<32x32xf32>, vector<4x32xf32> -> vector<4x32xf32>
    %c0_48 = arith.constant 0 : index
    %c0_49 = arith.constant 0 : index
    %c0_50 = arith.constant 0 : index
    %73 = vector.load %arg12[%c0_48, %c0_49, %c0_50] : memref<3x1x32xf32, #tpu.memory_space<vmem>>, vector<1x1x32xf32>
    %74 = vector.shape_cast %73 : vector<1x1x32xf32> to vector<1x32xf32>
    %75 = vector.broadcast %74 : vector<1x32xf32> to vector<4x32xf32>
    %76 = arith.addf %72, %75 : vector<4x32xf32>
    %c0_51 = arith.constant 0 : index
    %c0_52 = arith.constant 0 : index
    %77 = vector.load %arg13[%c0_51, %c0_52] : memref<4x192xf32, #tpu.memory_space<vmem>>, vector<4x32xf32>
    tpu.vector_store %arg13[%c0_51, %c0_52], %67 {strides = array<i32>} : memref<4x192xf32, #tpu.memory_space<vmem>>, vector<4x32xf32>,
    %c0_53 = arith.constant 0 : index
    %c96 = arith.constant 96 : index
    %78 = vector.load %arg13[%c0_53, %c96] : memref<4x192xf32, #tpu.memory_space<vmem>>, vector<4x32xf32>
    tpu.vector_store %arg13[%c0_53, %c96], %68 {strides = array<i32>} : memref<4x192xf32, #tpu.memory_space<vmem>>, vector<4x32xf32>,
    %c0_54 = arith.constant 0 : index
    %c0_55 = arith.constant 0 : index
    %79 = vector.load %arg14[%c0_54, %c0_55] : memref<4x192xf32, #tpu.memory_space<vmem>>, vector<4x32xf32>
    tpu.vector_store %arg14[%c0_54, %c0_55], %76 {strides = array<i32>} : memref<4x192xf32, #tpu.memory_space<vmem>>, vector<4x32xf32>,
    %c0_56 = arith.constant 0 : index
    %c96_57 = arith.constant 96 : index
    %80 = vector.load %arg14[%c0_56, %c96_57] : memref<4x192xf32, #tpu.memory_space<vmem>>, vector<4x32xf32>
    tpu.vector_store %arg14[%c0_56, %c96_57], %54 {strides = array<i32>} : memref<4x192xf32, #tpu.memory_space<vmem>>, vector<4x32xf32>,
    %c1 = arith.constant 1 : index
    %c0_58 = arith.constant 0 : index
    %c0_59 = arith.constant 0 : index
    %81 = vector.load %arg0[%c1, %c0_58, %c0_59] : memref<3x4x14xf32, #tpu.memory_space<vmem>>, vector<1x4x14xf32>
    %82 = vector.shape_cast %81 : vector<1x4x14xf32> to vector<4x14xf32>
    %c1_60 = arith.constant 1 : index
    %c0_61 = arith.constant 0 : index
    %c0_62 = arith.constant 0 : index
    %83 = vector.load %arg1[%c1_60, %c0_61, %c0_62] : memref<3x14x32xf32, #tpu.memory_space<vmem>>, vector<1x14x32xf32>
    %84 = vector.shape_cast %83 : vector<1x14x32xf32> to vector<14x32xf32>
    %cst_63 = arith.constant dense<0.000000e+00> : vector<4x32xf32>
    %85 = tpu.matmul %82, %84, %cst_63 {dimension_numbers = #tpu.dot_dimension_numbers<[1], [0], [0], [1], [0, 0, 1, 1], [], []>} : vector<4x14xf32>, vector<14x32xf32>, vector<4x32xf32> -> vector<4x32xf32>
    %c1_64 = arith.constant 1 : index
    %c0_65 = arith.constant 0 : index
    %c0_66 = arith.constant 0 : index
    %86 = vector.load %arg2[%c1_64, %c0_65, %c0_66] : memref<3x1x32xf32, #tpu.memory_space<vmem>>, vector<1x1x32xf32>
    %87 = vector.shape_cast %86 : vector<1x1x32xf32> to vector<1x32xf32>
    %88 = vector.broadcast %87 : vector<1x32xf32> to vector<4x32xf32>
    %89 = arith.addf %85, %88 : vector<4x32xf32>
    %cst_67 = arith.constant 0.000000e+00 : f32
    %90 = vector.broadcast %cst_67 : f32 to vector<4x32xf32>
    %91 = arith.maximumf %89, %90 : vector<4x32xf32>
    %c1_68 = arith.constant 1 : index
    %c0_69 = arith.constant 0 : index
    %c0_70 = arith.constant 0 : index
    %92 = vector.load %arg3[%c1_68, %c0_69, %c0_70] : memref<3x32x32xf32, #tpu.memory_space<vmem>>, vector<1x32x32xf32>
    %93 = vector.shape_cast %92 : vector<1x32x32xf32> to vector<32x32xf32>
    %cst_71 = arith.constant dense<0.000000e+00> : vector<4x32xf32>
    %94 = tpu.matmul %91, %93, %cst_71 {dimension_numbers = #tpu.dot_dimension_numbers<[1], [0], [0], [1], [0, 0, 1, 1], [], []>} : vector<4x32xf32>, vector<32x32xf32>, vector<4x32xf32> -> vector<4x32xf32>
    %c1_72 = arith.constant 1 : index
    %c0_73 = arith.constant 0 : index
    %c0_74 = arith.constant 0 : index
    %95 = vector.load %arg4[%c1_72, %c0_73, %c0_74] : memref<3x1x32xf32, #tpu.memory_space<vmem>>, vector<1x1x32xf32>
    %96 = vector.shape_cast %95 : vector<1x1x32xf32> to vector<1x32xf32>
    %97 = vector.broadcast %96 : vector<1x32xf32> to vector<4x32xf32>
    %98 = arith.addf %94, %97 : vector<4x32xf32>
    %cst_75 = arith.constant 0.000000e+00 : f32
    %99 = vector.broadcast %cst_75 : f32 to vector<4x32xf32>
    %100 = arith.maximumf %98, %99 : vector<4x32xf32>
    %c1_76 = arith.constant 1 : index
    %c0_77 = arith.constant 0 : index
    %c0_78 = arith.constant 0 : index
    %101 = vector.load %arg5[%c1_76, %c0_77, %c0_78] : memref<3x32x32xf32, #tpu.memory_space<vmem>>, vector<1x32x32xf32>
    %102 = vector.shape_cast %101 : vector<1x32x32xf32> to vector<32x32xf32>
    %cst_79 = arith.constant dense<0.000000e+00> : vector<4x32xf32>
    %103 = tpu.matmul %100, %102, %cst_79 {dimension_numbers = #tpu.dot_dimension_numbers<[1], [0], [0], [1], [0, 0, 1, 1], [], []>} : vector<4x32xf32>, vector<32x32xf32>, vector<4x32xf32> -> vector<4x32xf32>
    %c1_80 = arith.constant 1 : index
    %c0_81 = arith.constant 0 : index
    %c0_82 = arith.constant 0 : index
    %104 = vector.load %arg6[%c1_80, %c0_81, %c0_82] : memref<3x1x32xf32, #tpu.memory_space<vmem>>, vector<1x1x32xf32>
    %105 = vector.shape_cast %104 : vector<1x1x32xf32> to vector<1x32xf32>
    %106 = vector.broadcast %105 : vector<1x32xf32> to vector<4x32xf32>
    %107 = arith.addf %103, %106 : vector<4x32xf32>
    %cst_83 = arith.constant 0.000000e+00 : f32
    %108 = vector.broadcast %cst_83 : f32 to vector<4x32xf32>
    %109 = arith.maximumf %107, %108 : vector<4x32xf32>
    %cst_84 = arith.constant dense<0.000000e+00> : vector<4xf32>
    %110 = vector.multi_reduction <add>, %109, %cst_84 [1] : vector<4x32xf32> to vector<4xf32>
    %111 = vector.shape_cast %110 : vector<4xf32> to vector<4x1xf32>
    %cst_85 = arith.constant 3.200000e+01 : f32
    %112 = vector.broadcast %cst_85 : f32 to vector<4x1xf32>
    %113 = arith.divf %111, %112 : vector<4x1xf32>
    %114 = vector.broadcast %113 : vector<4x1xf32> to vector<4x32xf32>
    %115 = arith.subf %109, %114 : vector<4x32xf32>
    %116 = arith.mulf %115, %115 : vector<4x32xf32>
    %cst_86 = arith.constant dense<0.000000e+00> : vector<4xf32>
    %117 = vector.multi_reduction <add>, %116, %cst_86 [1] : vector<4x32xf32> to vector<4xf32>
    %118 = vector.shape_cast %117 : vector<4xf32> to vector<4x1xf32>
    %cst_87 = arith.constant 3.200000e+01 : f32
    %119 = vector.broadcast %cst_87 : f32 to vector<4x1xf32>
    %120 = arith.divf %118, %119 : vector<4x1xf32>
    %121 = vector.broadcast %113 : vector<4x1xf32> to vector<4x32xf32>
    %122 = arith.subf %109, %121 : vector<4x32xf32>
    %cst_88 = arith.constant 9.99999974E-6 : f32
    %123 = vector.broadcast %cst_88 : f32 to vector<4x1xf32>
    %124 = arith.addf %120, %123 : vector<4x1xf32>
    %125 = math.rsqrt %124 : vector<4x1xf32>
    %126 = vector.broadcast %125 : vector<4x1xf32> to vector<4x32xf32>
    %127 = arith.mulf %122, %126 : vector<4x32xf32>
    %c1_89 = arith.constant 1 : index
    %c0_90 = arith.constant 0 : index
    %c0_91 = arith.constant 0 : index
    %128 = vector.load %arg7[%c1_89, %c0_90, %c0_91] : memref<3x1x32xf32, #tpu.memory_space<vmem>>, vector<1x1x32xf32>
    %129 = vector.shape_cast %128 : vector<1x1x32xf32> to vector<1x32xf32>
    %130 = vector.broadcast %129 : vector<1x32xf32> to vector<4x32xf32>
    %131 = arith.mulf %127, %130 : vector<4x32xf32>
    %c1_92 = arith.constant 1 : index
    %c0_93 = arith.constant 0 : index
    %c0_94 = arith.constant 0 : index
    %132 = vector.load %arg8[%c1_92, %c0_93, %c0_94] : memref<3x1x32xf32, #tpu.memory_space<vmem>>, vector<1x1x32xf32>
    %133 = vector.shape_cast %132 : vector<1x1x32xf32> to vector<1x32xf32>
    %134 = vector.broadcast %133 : vector<1x32xf32> to vector<4x32xf32>
    %135 = arith.addf %131, %134 : vector<4x32xf32>
    %c1_95 = arith.constant 1 : index
    %c0_96 = arith.constant 0 : index
    %c0_97 = arith.constant 0 : index
    %136 = vector.load %arg9[%c1_95, %c0_96, %c0_97] : memref<3x32x64xf32, #tpu.memory_space<vmem>>, vector<1x32x64xf32>
    %137 = vector.shape_cast %136 : vector<1x32x64xf32> to vector<32x64xf32>
    %cst_98 = arith.constant dense<0.000000e+00> : vector<4x64xf32>
    %138 = tpu.matmul %135, %137, %cst_98 {dimension_numbers = #tpu.dot_dimension_numbers<[1], [0], [0], [1], [0, 0, 1, 1], [], []>} : vector<4x32xf32>, vector<32x64xf32>, vector<4x64xf32> -> vector<4x64xf32>
    %c1_99 = arith.constant 1 : index
    %c0_100 = arith.constant 0 : index
    %c0_101 = arith.constant 0 : index
    %139 = vector.load %arg10[%c1_99, %c0_100, %c0_101] : memref<3x1x64xf32, #tpu.memory_space<vmem>>, vector<1x1x64xf32>
    %140 = vector.shape_cast %139 : vector<1x1x64xf32> to vector<1x64xf32>
    %141 = vector.broadcast %140 : vector<1x64xf32> to vector<4x64xf32>
    %142 = arith.addf %138, %141 : vector<4x64xf32>
    %143 = arith.negf %142 : vector<4x64xf32>
    %144 = math.exp %143 : vector<4x64xf32>
    %cst_102 = arith.constant 1.000000e+00 : f32
    %145 = vector.broadcast %cst_102 : f32 to vector<4x64xf32>
    %146 = arith.addf %145, %144 : vector<4x64xf32>
    %147 = arith.divf %145, %146 : vector<4x64xf32>
    %148 = vector.extract_strided_slice %147 {offsets = [0, 0], sizes = [4, 32], strides = [1, 1]} : vector<4x64xf32> to vector<4x32xf32>
    %149 = vector.extract_strided_slice %147 {offsets = [0, 32], sizes = [4, 32], strides = [1, 1]} : vector<4x64xf32> to vector<4x32xf32>
    %150 = arith.addf %148, %149 : vector<4x32xf32>
    %c1_103 = arith.constant 1 : index
    %c0_104 = arith.constant 0 : index
    %c0_105 = arith.constant 0 : index
    %151 = vector.load %arg11[%c1_103, %c0_104, %c0_105] : memref<3x32x32xf32, #tpu.memory_space<vmem>>, vector<1x32x32xf32>
    %152 = vector.shape_cast %151 : vector<1x32x32xf32> to vector<32x32xf32>
    %cst_106 = arith.constant dense<0.000000e+00> : vector<4x32xf32>
    %153 = tpu.matmul %150, %152, %cst_106 {dimension_numbers = #tpu.dot_dimension_numbers<[1], [0], [0], [1], [0, 0, 1, 1], [], []>} : vector<4x32xf32>, vector<32x32xf32>, vector<4x32xf32> -> vector<4x32xf32>
    %c1_107 = arith.constant 1 : index
    %c0_108 = arith.constant 0 : index
    %c0_109 = arith.constant 0 : index
    %154 = vector.load %arg12[%c1_107, %c0_108, %c0_109] : memref<3x1x32xf32, #tpu.memory_space<vmem>>, vector<1x1x32xf32>
    %155 = vector.shape_cast %154 : vector<1x1x32xf32> to vector<1x32xf32>
    %156 = vector.broadcast %155 : vector<1x32xf32> to vector<4x32xf32>
    %157 = arith.addf %153, %156 : vector<4x32xf32>
    %c0_110 = arith.constant 0 : index
    %c32 = arith.constant 32 : index
    %158 = vector.load %arg13[%c0_110, %c32] : memref<4x192xf32, #tpu.memory_space<vmem>>, vector<4x32xf32>
    tpu.vector_store %arg13[%c0_110, %c32], %148 {strides = array<i32>} : memref<4x192xf32, #tpu.memory_space<vmem>>, vector<4x32xf32>,
    %c0_111 = arith.constant 0 : index
    %c128 = arith.constant 128 : index
    %159 = vector.load %arg13[%c0_111, %c128] : memref<4x192xf32, #tpu.memory_space<vmem>>, vector<4x32xf32>
    tpu.vector_store %arg13[%c0_111, %c128], %149 {strides = array<i32>} : memref<4x192xf32, #tpu.memory_space<vmem>>, vector<4x32xf32>,
    %c0_112 = arith.constant 0 : index
    %c32_113 = arith.constant 32 : index
    %160 = vector.load %arg14[%c0_112, %c32_113] : memref<4x192xf32, #tpu.memory_space<vmem>>, vector<4x32xf32>
    tpu.vector_store %arg14[%c0_112, %c32_113], %157 {strides = array<i32>} : memref<4x192xf32, #tpu.memory_space<vmem>>, vector<4x32xf32>,
    %c0_114 = arith.constant 0 : index
    %c128_115 = arith.constant 128 : index
    %161 = vector.load %arg14[%c0_114, %c128_115] : memref<4x192xf32, #tpu.memory_space<vmem>>, vector<4x32xf32>
    tpu.vector_store %arg14[%c0_114, %c128_115], %135 {strides = array<i32>} : memref<4x192xf32, #tpu.memory_space<vmem>>, vector<4x32xf32>,
    %c2 = arith.constant 2 : index
    %c0_116 = arith.constant 0 : index
    %c0_117 = arith.constant 0 : index
    %162 = vector.load %arg0[%c2, %c0_116, %c0_117] : memref<3x4x14xf32, #tpu.memory_space<vmem>>, vector<1x4x14xf32>
    %163 = vector.shape_cast %162 : vector<1x4x14xf32> to vector<4x14xf32>
    %c2_118 = arith.constant 2 : index
    %c0_119 = arith.constant 0 : index
    %c0_120 = arith.constant 0 : index
    %164 = vector.load %arg1[%c2_118, %c0_119, %c0_120] : memref<3x14x32xf32, #tpu.memory_space<vmem>>, vector<1x14x32xf32>
    %165 = vector.shape_cast %164 : vector<1x14x32xf32> to vector<14x32xf32>
    %cst_121 = arith.constant dense<0.000000e+00> : vector<4x32xf32>
    %166 = tpu.matmul %163, %165, %cst_121 {dimension_numbers = #tpu.dot_dimension_numbers<[1], [0], [0], [1], [0, 0, 1, 1], [], []>} : vector<4x14xf32>, vector<14x32xf32>, vector<4x32xf32> -> vector<4x32xf32>
    %c2_122 = arith.constant 2 : index
    %c0_123 = arith.constant 0 : index
    %c0_124 = arith.constant 0 : index
    %167 = vector.load %arg2[%c2_122, %c0_123, %c0_124] : memref<3x1x32xf32, #tpu.memory_space<vmem>>, vector<1x1x32xf32>
    %168 = vector.shape_cast %167 : vector<1x1x32xf32> to vector<1x32xf32>
    %169 = vector.broadcast %168 : vector<1x32xf32> to vector<4x32xf32>
    %170 = arith.addf %166, %169 : vector<4x32xf32>
    %cst_125 = arith.constant 0.000000e+00 : f32
    %171 = vector.broadcast %cst_125 : f32 to vector<4x32xf32>
    %172 = arith.maximumf %170, %171 : vector<4x32xf32>
    %c2_126 = arith.constant 2 : index
    %c0_127 = arith.constant 0 : index
    %c0_128 = arith.constant 0 : index
    %173 = vector.load %arg3[%c2_126, %c0_127, %c0_128] : memref<3x32x32xf32, #tpu.memory_space<vmem>>, vector<1x32x32xf32>
    %174 = vector.shape_cast %173 : vector<1x32x32xf32> to vector<32x32xf32>
    %cst_129 = arith.constant dense<0.000000e+00> : vector<4x32xf32>
    %175 = tpu.matmul %172, %174, %cst_129 {dimension_numbers = #tpu.dot_dimension_numbers<[1], [0], [0], [1], [0, 0, 1, 1], [], []>} : vector<4x32xf32>, vector<32x32xf32>, vector<4x32xf32> -> vector<4x32xf32>
    %c2_130 = arith.constant 2 : index
    %c0_131 = arith.constant 0 : index
    %c0_132 = arith.constant 0 : index
    %176 = vector.load %arg4[%c2_130, %c0_131, %c0_132] : memref<3x1x32xf32, #tpu.memory_space<vmem>>, vector<1x1x32xf32>
    %177 = vector.shape_cast %176 : vector<1x1x32xf32> to vector<1x32xf32>
    %178 = vector.broadcast %177 : vector<1x32xf32> to vector<4x32xf32>
    %179 = arith.addf %175, %178 : vector<4x32xf32>
    %cst_133 = arith.constant 0.000000e+00 : f32
    %180 = vector.broadcast %cst_133 : f32 to vector<4x32xf32>
    %181 = arith.maximumf %179, %180 : vector<4x32xf32>
    %c2_134 = arith.constant 2 : index
    %c0_135 = arith.constant 0 : index
    %c0_136 = arith.constant 0 : index
    %182 = vector.load %arg5[%c2_134, %c0_135, %c0_136] : memref<3x32x32xf32, #tpu.memory_space<vmem>>, vector<1x32x32xf32>
    %183 = vector.shape_cast %182 : vector<1x32x32xf32> to vector<32x32xf32>
    %cst_137 = arith.constant dense<0.000000e+00> : vector<4x32xf32>
    %184 = tpu.matmul %181, %183, %cst_137 {dimension_numbers = #tpu.dot_dimension_numbers<[1], [0], [0], [1], [0, 0, 1, 1], [], []>} : vector<4x32xf32>, vector<32x32xf32>, vector<4x32xf32> -> vector<4x32xf32>
    %c2_138 = arith.constant 2 : index
    %c0_139 = arith.constant 0 : index
    %c0_140 = arith.constant 0 : index
    %185 = vector.load %arg6[%c2_138, %c0_139, %c0_140] : memref<3x1x32xf32, #tpu.memory_space<vmem>>, vector<1x1x32xf32>
    %186 = vector.shape_cast %185 : vector<1x1x32xf32> to vector<1x32xf32>
    %187 = vector.broadcast %186 : vector<1x32xf32> to vector<4x32xf32>
    %188 = arith.addf %184, %187 : vector<4x32xf32>
    %cst_141 = arith.constant 0.000000e+00 : f32
    %189 = vector.broadcast %cst_141 : f32 to vector<4x32xf32>
    %190 = arith.maximumf %188, %189 : vector<4x32xf32>
    %cst_142 = arith.constant dense<0.000000e+00> : vector<4xf32>
    %191 = vector.multi_reduction <add>, %190, %cst_142 [1] : vector<4x32xf32> to vector<4xf32>
    %192 = vector.shape_cast %191 : vector<4xf32> to vector<4x1xf32>
    %cst_143 = arith.constant 3.200000e+01 : f32
    %193 = vector.broadcast %cst_143 : f32 to vector<4x1xf32>
    %194 = arith.divf %192, %193 : vector<4x1xf32>
    %195 = vector.broadcast %194 : vector<4x1xf32> to vector<4x32xf32>
    %196 = arith.subf %190, %195 : vector<4x32xf32>
    %197 = arith.mulf %196, %196 : vector<4x32xf32>
    %cst_144 = arith.constant dense<0.000000e+00> : vector<4xf32>
    %198 = vector.multi_reduction <add>, %197, %cst_144 [1] : vector<4x32xf32> to vector<4xf32>
    %199 = vector.shape_cast %198 : vector<4xf32> to vector<4x1xf32>
    %cst_145 = arith.constant 3.200000e+01 : f32
    %200 = vector.broadcast %cst_145 : f32 to vector<4x1xf32>
    %201 = arith.divf %199, %200 : vector<4x1xf32>
    %202 = vector.broadcast %194 : vector<4x1xf32> to vector<4x32xf32>
    %203 = arith.subf %190, %202 : vector<4x32xf32>
    %cst_146 = arith.constant 9.99999974E-6 : f32
    %204 = vector.broadcast %cst_146 : f32 to vector<4x1xf32>
    %205 = arith.addf %201, %204 : vector<4x1xf32>
    %206 = math.rsqrt %205 : vector<4x1xf32>
    %207 = vector.broadcast %206 : vector<4x1xf32> to vector<4x32xf32>
    %208 = arith.mulf %203, %207 : vector<4x32xf32>
    %c2_147 = arith.constant 2 : index
    %c0_148 = arith.constant 0 : index
    %c0_149 = arith.constant 0 : index
    %209 = vector.load %arg7[%c2_147, %c0_148, %c0_149] : memref<3x1x32xf32, #tpu.memory_space<vmem>>, vector<1x1x32xf32>
    %210 = vector.shape_cast %209 : vector<1x1x32xf32> to vector<1x32xf32>
    %211 = vector.broadcast %210 : vector<1x32xf32> to vector<4x32xf32>
    %212 = arith.mulf %208, %211 : vector<4x32xf32>
    %c2_150 = arith.constant 2 : index
    %c0_151 = arith.constant 0 : index
    %c0_152 = arith.constant 0 : index
    %213 = vector.load %arg8[%c2_150, %c0_151, %c0_152] : memref<3x1x32xf32, #tpu.memory_space<vmem>>, vector<1x1x32xf32>
    %214 = vector.shape_cast %213 : vector<1x1x32xf32> to vector<1x32xf32>
    %215 = vector.broadcast %214 : vector<1x32xf32> to vector<4x32xf32>
    %216 = arith.addf %212, %215 : vector<4x32xf32>
    %c2_153 = arith.constant 2 : index
    %c0_154 = arith.constant 0 : index
    %c0_155 = arith.constant 0 : index
    %217 = vector.load %arg9[%c2_153, %c0_154, %c0_155] : memref<3x32x64xf32, #tpu.memory_space<vmem>>, vector<1x32x64xf32>
    %218 = vector.shape_cast %217 : vector<1x32x64xf32> to vector<32x64xf32>
    %cst_156 = arith.constant dense<0.000000e+00> : vector<4x64xf32>
    %219 = tpu.matmul %216, %218, %cst_156 {dimension_numbers = #tpu.dot_dimension_numbers<[1], [0], [0], [1], [0, 0, 1, 1], [], []>} : vector<4x32xf32>, vector<32x64xf32>, vector<4x64xf32> -> vector<4x64xf32>
    %c2_157 = arith.constant 2 : index
    %c0_158 = arith.constant 0 : index
    %c0_159 = arith.constant 0 : index
    %220 = vector.load %arg10[%c2_157, %c0_158, %c0_159] : memref<3x1x64xf32, #tpu.memory_space<vmem>>, vector<1x1x64xf32>
    %221 = vector.shape_cast %220 : vector<1x1x64xf32> to vector<1x64xf32>
    %222 = vector.broadcast %221 : vector<1x64xf32> to vector<4x64xf32>
    %223 = arith.addf %219, %222 : vector<4x64xf32>
    %224 = arith.negf %223 : vector<4x64xf32>
    %225 = math.exp %224 : vector<4x64xf32>
    %cst_160 = arith.constant 1.000000e+00 : f32
    %226 = vector.broadcast %cst_160 : f32 to vector<4x64xf32>
    %227 = arith.addf %226, %225 : vector<4x64xf32>
    %228 = arith.divf %226, %227 : vector<4x64xf32>
    %229 = vector.extract_strided_slice %228 {offsets = [0, 0], sizes = [4, 32], strides = [1, 1]} : vector<4x64xf32> to vector<4x32xf32>
    %230 = vector.extract_strided_slice %228 {offsets = [0, 32], sizes = [4, 32], strides = [1, 1]} : vector<4x64xf32> to vector<4x32xf32>
    %231 = arith.addf %229, %230 : vector<4x32xf32>
    %c2_161 = arith.constant 2 : index
    %c0_162 = arith.constant 0 : index
    %c0_163 = arith.constant 0 : index
    %232 = vector.load %arg11[%c2_161, %c0_162, %c0_163] : memref<3x32x32xf32, #tpu.memory_space<vmem>>, vector<1x32x32xf32>
    %233 = vector.shape_cast %232 : vector<1x32x32xf32> to vector<32x32xf32>
    %cst_164 = arith.constant dense<0.000000e+00> : vector<4x32xf32>
    %234 = tpu.matmul %231, %233, %cst_164 {dimension_numbers = #tpu.dot_dimension_numbers<[1], [0], [0], [1], [0, 0, 1, 1], [], []>} : vector<4x32xf32>, vector<32x32xf32>, vector<4x32xf32> -> vector<4x32xf32>
    %c2_165 = arith.constant 2 : index
    %c0_166 = arith.constant 0 : index
    %c0_167 = arith.constant 0 : index
    %235 = vector.load %arg12[%c2_165, %c0_166, %c0_167] : memref<3x1x32xf32, #tpu.memory_space<vmem>>, vector<1x1x32xf32>
    %236 = vector.shape_cast %235 : vector<1x1x32xf32> to vector<1x32xf32>
    %237 = vector.broadcast %236 : vector<1x32xf32> to vector<4x32xf32>
    %238 = arith.addf %234, %237 : vector<4x32xf32>
    %c0_168 = arith.constant 0 : index
    %c64 = arith.constant 64 : index
    %239 = vector.load %arg13[%c0_168, %c64] : memref<4x192xf32, #tpu.memory_space<vmem>>, vector<4x32xf32>
    tpu.vector_store %arg13[%c0_168, %c64], %229 {strides = array<i32>} : memref<4x192xf32, #tpu.memory_space<vmem>>, vector<4x32xf32>,
    %c0_169 = arith.constant 0 : index
    %c160 = arith.constant 160 : index
    %240 = vector.load %arg13[%c0_169, %c160] : memref<4x192xf32, #tpu.memory_space<vmem>>, vector<4x32xf32>
    tpu.vector_store %arg13[%c0_169, %c160], %230 {strides = array<i32>} : memref<4x192xf32, #tpu.memory_space<vmem>>, vector<4x32xf32>,
    %c0_170 = arith.constant 0 : index
    %c64_171 = arith.constant 64 : index
    %241 = vector.load %arg14[%c0_170, %c64_171] : memref<4x192xf32, #tpu.memory_space<vmem>>, vector<4x32xf32>
    tpu.vector_store %arg14[%c0_170, %c64_171], %238 {strides = array<i32>} : memref<4x192xf32, #tpu.memory_space<vmem>>, vector<4x32xf32>,
    %c0_172 = arith.constant 0 : index
    %c160_173 = arith.constant 160 : index
    %242 = vector.load %arg14[%c0_172, %c160_173] : memref<4x192xf32, #tpu.memory_space<vmem>>, vector<4x32xf32>
    tpu.vector_store %arg14[%c0_172, %c160_173], %216 {strides = array<i32>} : memref<4x192xf32, #tpu.memory_space<vmem>>, vector<4x32xf32>,
    return
  }
}

module attributes {stable_mosaic.version = 11 : i64} {
  func.func @_loss_kernel(%arg0: memref<4x192xf32, #tpu.memory_space<vmem>>, %arg1: memref<4x192xf32, #tpu.memory_space<vmem>>, %arg2: memref<1x1xf32, #tpu.memory_space<vmem>>) attributes {dimension_semantics = [], scalar_prefetch = 0 : i64, scratch_operands = 0 : i64, tpu.core_type = #tpu.core_type<tc>} {
    %c0 = arith.constant 0 : index
    %c0_0 = arith.constant 0 : index
    %0 = vector.load %arg0[%c0, %c0_0] : memref<4x192xf32, #tpu.memory_space<vmem>>, vector<4x32xf32>
    %c0_1 = arith.constant 0 : index
    %c32 = arith.constant 32 : index
    %1 = vector.load %arg0[%c0_1, %c32] : memref<4x192xf32, #tpu.memory_space<vmem>>, vector<4x32xf32>
    %c0_2 = arith.constant 0 : index
    %c64 = arith.constant 64 : index
    %2 = vector.load %arg0[%c0_2, %c64] : memref<4x192xf32, #tpu.memory_space<vmem>>, vector<4x32xf32>
    %c0_3 = arith.constant 0 : index
    %c96 = arith.constant 96 : index
    %3 = vector.load %arg0[%c0_3, %c96] : memref<4x192xf32, #tpu.memory_space<vmem>>, vector<4x32xf32>
    %c0_4 = arith.constant 0 : index
    %c128 = arith.constant 128 : index
    %4 = vector.load %arg0[%c0_4, %c128] : memref<4x192xf32, #tpu.memory_space<vmem>>, vector<4x32xf32>
    %c0_5 = arith.constant 0 : index
    %c160 = arith.constant 160 : index
    %5 = vector.load %arg0[%c0_5, %c160] : memref<4x192xf32, #tpu.memory_space<vmem>>, vector<4x32xf32>
    %c0_6 = arith.constant 0 : index
    %c0_7 = arith.constant 0 : index
    %6 = vector.load %arg1[%c0_6, %c0_7] : memref<4x192xf32, #tpu.memory_space<vmem>>, vector<4x32xf32>
    %c0_8 = arith.constant 0 : index
    %c32_9 = arith.constant 32 : index
    %7 = vector.load %arg1[%c0_8, %c32_9] : memref<4x192xf32, #tpu.memory_space<vmem>>, vector<4x32xf32>
    %c0_10 = arith.constant 0 : index
    %c64_11 = arith.constant 64 : index
    %8 = vector.load %arg1[%c0_10, %c64_11] : memref<4x192xf32, #tpu.memory_space<vmem>>, vector<4x32xf32>
    %c0_12 = arith.constant 0 : index
    %c96_13 = arith.constant 96 : index
    %9 = vector.load %arg1[%c0_12, %c96_13] : memref<4x192xf32, #tpu.memory_space<vmem>>, vector<4x32xf32>
    %c0_14 = arith.constant 0 : index
    %c128_15 = arith.constant 128 : index
    %10 = vector.load %arg1[%c0_14, %c128_15] : memref<4x192xf32, #tpu.memory_space<vmem>>, vector<4x32xf32>
    %c0_16 = arith.constant 0 : index
    %c160_17 = arith.constant 160 : index
    %11 = vector.load %arg1[%c0_16, %c160_17] : memref<4x192xf32, #tpu.memory_space<vmem>>, vector<4x32xf32>
    %cst = arith.constant dense<0.000000e+00> : vector<32xf32>
    %12 = vector.multi_reduction <add>, %0, %cst [0] : vector<4x32xf32> to vector<32xf32>
    %13 = vector.shape_cast %12 : vector<32xf32> to vector<1x32xf32>
    %cst_18 = arith.constant 4.000000e+00 : f32
    %14 = vector.broadcast %cst_18 : f32 to vector<1x32xf32>
    %15 = arith.divf %13, %14 : vector<1x32xf32>
    %16 = vector.broadcast %15 : vector<1x32xf32> to vector<4x32xf32>
    %17 = arith.subf %0, %16 : vector<4x32xf32>
    %cst_19 = arith.constant dense<0.000000e+00> : vector<32xf32>
    %18 = vector.multi_reduction <add>, %3, %cst_19 [0] : vector<4x32xf32> to vector<32xf32>
    %19 = vector.shape_cast %18 : vector<32xf32> to vector<1x32xf32>
    %cst_20 = arith.constant 4.000000e+00 : f32
    %20 = vector.broadcast %cst_20 : f32 to vector<1x32xf32>
    %21 = arith.divf %19, %20 : vector<1x32xf32>
    %22 = vector.broadcast %21 : vector<1x32xf32> to vector<4x32xf32>
    %23 = arith.subf %3, %22 : vector<4x32xf32>
    %24 = arith.mulf %17, %17 : vector<4x32xf32>
    %cst_21 = arith.constant dense<0.000000e+00> : vector<4xf32>
    %25 = vector.multi_reduction <add>, %24, %cst_21 [1] : vector<4x32xf32> to vector<4xf32>
    %26 = vector.shape_cast %25 : vector<4xf32> to vector<4x1xf32>
    %27 = math.sqrt %26 : vector<4x1xf32>
    %cst_22 = arith.constant 9.99999997E-7 : f32
    %28 = vector.broadcast %cst_22 : f32 to vector<4x1xf32>
    %29 = arith.addf %27, %28 : vector<4x1xf32>
    %30 = vector.broadcast %29 : vector<4x1xf32> to vector<4x32xf32>
    %31 = arith.divf %17, %30 : vector<4x32xf32>
    %32 = arith.mulf %23, %23 : vector<4x32xf32>
    %cst_23 = arith.constant dense<0.000000e+00> : vector<4xf32>
    %33 = vector.multi_reduction <add>, %32, %cst_23 [1] : vector<4x32xf32> to vector<4xf32>
    %34 = vector.shape_cast %33 : vector<4xf32> to vector<4x1xf32>
    %35 = math.sqrt %34 : vector<4x1xf32>
    %cst_24 = arith.constant 9.99999997E-7 : f32
    %36 = vector.broadcast %cst_24 : f32 to vector<4x1xf32>
    %37 = arith.addf %35, %36 : vector<4x1xf32>
    %38 = vector.broadcast %37 : vector<4x1xf32> to vector<4x32xf32>
    %39 = arith.divf %23, %38 : vector<4x32xf32>
    %cst_25 = arith.constant dense<0.000000e+00> : vector<32x32xf32>
    %40 = tpu.matmul %31, %39, %cst_25 {dimension_numbers = #tpu.dot_dimension_numbers<[0], [0], [1], [1], [0, 1, 1, 1], [], []>} : vector<4x32xf32>, vector<4x32xf32>, vector<32x32xf32> -> vector<32x32xf32>
    %41 = arith.mulf %40, %40 : vector<32x32xf32>
    %cst_26 = arith.constant dense<0.000000e+00> : vector<32xf32>
    %42 = vector.multi_reduction <add>, %41, %cst_26 [1] : vector<32x32xf32> to vector<32xf32>
    %43 = vector.shape_cast %42 : vector<32xf32> to vector<32x1xf32>
    %cst_27 = arith.constant dense<0.000000e+00> : vector<1xf32>
    %44 = vector.multi_reduction <add>, %43, %cst_27 [0] : vector<32x1xf32> to vector<1xf32>
    %45 = vector.shape_cast %44 : vector<1xf32> to vector<1x1xf32>
    %cst_28 = arith.constant 1.024000e+03 : f32
    %46 = vector.broadcast %cst_28 : f32 to vector<1x1xf32>
    %47 = arith.divf %45, %46 : vector<1x1xf32>
    %cst_29 = arith.constant dense<0.000000e+00> : vector<32xf32>
    %48 = vector.multi_reduction <add>, %1, %cst_29 [0] : vector<4x32xf32> to vector<32xf32>
    %49 = vector.shape_cast %48 : vector<32xf32> to vector<1x32xf32>
    %cst_30 = arith.constant 4.000000e+00 : f32
    %50 = vector.broadcast %cst_30 : f32 to vector<1x32xf32>
    %51 = arith.divf %49, %50 : vector<1x32xf32>
    %52 = vector.broadcast %51 : vector<1x32xf32> to vector<4x32xf32>
    %53 = arith.subf %1, %52 : vector<4x32xf32>
    %cst_31 = arith.constant dense<0.000000e+00> : vector<32xf32>
    %54 = vector.multi_reduction <add>, %4, %cst_31 [0] : vector<4x32xf32> to vector<32xf32>
    %55 = vector.shape_cast %54 : vector<32xf32> to vector<1x32xf32>
    %cst_32 = arith.constant 4.000000e+00 : f32
    %56 = vector.broadcast %cst_32 : f32 to vector<1x32xf32>
    %57 = arith.divf %55, %56 : vector<1x32xf32>
    %58 = vector.broadcast %57 : vector<1x32xf32> to vector<4x32xf32>
    %59 = arith.subf %4, %58 : vector<4x32xf32>
    %60 = arith.mulf %53, %53 : vector<4x32xf32>
    %cst_33 = arith.constant dense<0.000000e+00> : vector<4xf32>
    %61 = vector.multi_reduction <add>, %60, %cst_33 [1] : vector<4x32xf32> to vector<4xf32>
    %62 = vector.shape_cast %61 : vector<4xf32> to vector<4x1xf32>
    %63 = math.sqrt %62 : vector<4x1xf32>
    %cst_34 = arith.constant 9.99999997E-7 : f32
    %64 = vector.broadcast %cst_34 : f32 to vector<4x1xf32>
    %65 = arith.addf %63, %64 : vector<4x1xf32>
    %66 = vector.broadcast %65 : vector<4x1xf32> to vector<4x32xf32>
    %67 = arith.divf %53, %66 : vector<4x32xf32>
    %68 = arith.mulf %59, %59 : vector<4x32xf32>
    %cst_35 = arith.constant dense<0.000000e+00> : vector<4xf32>
    %69 = vector.multi_reduction <add>, %68, %cst_35 [1] : vector<4x32xf32> to vector<4xf32>
    %70 = vector.shape_cast %69 : vector<4xf32> to vector<4x1xf32>
    %71 = math.sqrt %70 : vector<4x1xf32>
    %cst_36 = arith.constant 9.99999997E-7 : f32
    %72 = vector.broadcast %cst_36 : f32 to vector<4x1xf32>
    %73 = arith.addf %71, %72 : vector<4x1xf32>
    %74 = vector.broadcast %73 : vector<4x1xf32> to vector<4x32xf32>
    %75 = arith.divf %59, %74 : vector<4x32xf32>
    %cst_37 = arith.constant dense<0.000000e+00> : vector<32x32xf32>
    %76 = tpu.matmul %67, %75, %cst_37 {dimension_numbers = #tpu.dot_dimension_numbers<[0], [0], [1], [1], [0, 1, 1, 1], [], []>} : vector<4x32xf32>, vector<4x32xf32>, vector<32x32xf32> -> vector<32x32xf32>
    %77 = arith.mulf %76, %76 : vector<32x32xf32>
    %cst_38 = arith.constant dense<0.000000e+00> : vector<32xf32>
    %78 = vector.multi_reduction <add>, %77, %cst_38 [1] : vector<32x32xf32> to vector<32xf32>
    %79 = vector.shape_cast %78 : vector<32xf32> to vector<32x1xf32>
    %cst_39 = arith.constant dense<0.000000e+00> : vector<1xf32>
    %80 = vector.multi_reduction <add>, %79, %cst_39 [0] : vector<32x1xf32> to vector<1xf32>
    %81 = vector.shape_cast %80 : vector<1xf32> to vector<1x1xf32>
    %cst_40 = arith.constant 1.024000e+03 : f32
    %82 = vector.broadcast %cst_40 : f32 to vector<1x1xf32>
    %83 = arith.divf %81, %82 : vector<1x1xf32>
    %84 = arith.addf %47, %83 : vector<1x1xf32>
    %cst_41 = arith.constant dense<0.000000e+00> : vector<32xf32>
    %85 = vector.multi_reduction <add>, %2, %cst_41 [0] : vector<4x32xf32> to vector<32xf32>
    %86 = vector.shape_cast %85 : vector<32xf32> to vector<1x32xf32>
    %cst_42 = arith.constant 4.000000e+00 : f32
    %87 = vector.broadcast %cst_42 : f32 to vector<1x32xf32>
    %88 = arith.divf %86, %87 : vector<1x32xf32>
    %89 = vector.broadcast %88 : vector<1x32xf32> to vector<4x32xf32>
    %90 = arith.subf %2, %89 : vector<4x32xf32>
    %cst_43 = arith.constant dense<0.000000e+00> : vector<32xf32>
    %91 = vector.multi_reduction <add>, %5, %cst_43 [0] : vector<4x32xf32> to vector<32xf32>
    %92 = vector.shape_cast %91 : vector<32xf32> to vector<1x32xf32>
    %cst_44 = arith.constant 4.000000e+00 : f32
    %93 = vector.broadcast %cst_44 : f32 to vector<1x32xf32>
    %94 = arith.divf %92, %93 : vector<1x32xf32>
    %95 = vector.broadcast %94 : vector<1x32xf32> to vector<4x32xf32>
    %96 = arith.subf %5, %95 : vector<4x32xf32>
    %97 = arith.mulf %90, %90 : vector<4x32xf32>
    %cst_45 = arith.constant dense<0.000000e+00> : vector<4xf32>
    %98 = vector.multi_reduction <add>, %97, %cst_45 [1] : vector<4x32xf32> to vector<4xf32>
    %99 = vector.shape_cast %98 : vector<4xf32> to vector<4x1xf32>
    %100 = math.sqrt %99 : vector<4x1xf32>
    %cst_46 = arith.constant 9.99999997E-7 : f32
    %101 = vector.broadcast %cst_46 : f32 to vector<4x1xf32>
    %102 = arith.addf %100, %101 : vector<4x1xf32>
    %103 = vector.broadcast %102 : vector<4x1xf32> to vector<4x32xf32>
    %104 = arith.divf %90, %103 : vector<4x32xf32>
    %105 = arith.mulf %96, %96 : vector<4x32xf32>
    %cst_47 = arith.constant dense<0.000000e+00> : vector<4xf32>
    %106 = vector.multi_reduction <add>, %105, %cst_47 [1] : vector<4x32xf32> to vector<4xf32>
    %107 = vector.shape_cast %106 : vector<4xf32> to vector<4x1xf32>
    %108 = math.sqrt %107 : vector<4x1xf32>
    %cst_48 = arith.constant 9.99999997E-7 : f32
    %109 = vector.broadcast %cst_48 : f32 to vector<4x1xf32>
    %110 = arith.addf %108, %109 : vector<4x1xf32>
    %111 = vector.broadcast %110 : vector<4x1xf32> to vector<4x32xf32>
    %112 = arith.divf %96, %111 : vector<4x32xf32>
    %cst_49 = arith.constant dense<0.000000e+00> : vector<32x32xf32>
    %113 = tpu.matmul %104, %112, %cst_49 {dimension_numbers = #tpu.dot_dimension_numbers<[0], [0], [1], [1], [0, 1, 1, 1], [], []>} : vector<4x32xf32>, vector<4x32xf32>, vector<32x32xf32> -> vector<32x32xf32>
    %114 = arith.mulf %113, %113 : vector<32x32xf32>
    %cst_50 = arith.constant dense<0.000000e+00> : vector<32xf32>
    %115 = vector.multi_reduction <add>, %114, %cst_50 [1] : vector<32x32xf32> to vector<32xf32>
    %116 = vector.shape_cast %115 : vector<32xf32> to vector<32x1xf32>
    %cst_51 = arith.constant dense<0.000000e+00> : vector<1xf32>
    %117 = vector.multi_reduction <add>, %116, %cst_51 [0] : vector<32x1xf32> to vector<1xf32>
    %118 = vector.shape_cast %117 : vector<1xf32> to vector<1x1xf32>
    %cst_52 = arith.constant 1.024000e+03 : f32
    %119 = vector.broadcast %cst_52 : f32 to vector<1x1xf32>
    %120 = arith.divf %118, %119 : vector<1x1xf32>
    %121 = arith.addf %84, %120 : vector<1x1xf32>
    %cst_53 = arith.constant dense<0.000000e+00> : vector<32xf32>
    %122 = vector.multi_reduction <add>, %2, %cst_53 [0] : vector<4x32xf32> to vector<32xf32>
    %123 = vector.shape_cast %122 : vector<32xf32> to vector<1x32xf32>
    %cst_54 = arith.constant 4.000000e+00 : f32
    %124 = vector.broadcast %cst_54 : f32 to vector<1x32xf32>
    %125 = arith.divf %123, %124 : vector<1x32xf32>
    %126 = vector.broadcast %125 : vector<1x32xf32> to vector<4x32xf32>
    %127 = arith.subf %2, %126 : vector<4x32xf32>
    %cst_55 = arith.constant dense<0.000000e+00> : vector<32xf32>
    %128 = vector.multi_reduction <add>, %0, %cst_55 [0] : vector<4x32xf32> to vector<32xf32>
    %129 = vector.shape_cast %128 : vector<32xf32> to vector<1x32xf32>
    %cst_56 = arith.constant 4.000000e+00 : f32
    %130 = vector.broadcast %cst_56 : f32 to vector<1x32xf32>
    %131 = arith.divf %129, %130 : vector<1x32xf32>
    %132 = vector.broadcast %131 : vector<1x32xf32> to vector<4x32xf32>
    %133 = arith.subf %0, %132 : vector<4x32xf32>
    %134 = arith.mulf %127, %127 : vector<4x32xf32>
    %cst_57 = arith.constant dense<0.000000e+00> : vector<4xf32>
    %135 = vector.multi_reduction <add>, %134, %cst_57 [1] : vector<4x32xf32> to vector<4xf32>
    %136 = vector.shape_cast %135 : vector<4xf32> to vector<4x1xf32>
    %137 = math.sqrt %136 : vector<4x1xf32>
    %cst_58 = arith.constant 9.99999997E-7 : f32
    %138 = vector.broadcast %cst_58 : f32 to vector<4x1xf32>
    %139 = arith.addf %137, %138 : vector<4x1xf32>
    %140 = vector.broadcast %139 : vector<4x1xf32> to vector<4x32xf32>
    %141 = arith.divf %127, %140 : vector<4x32xf32>
    %142 = arith.mulf %133, %133 : vector<4x32xf32>
    %cst_59 = arith.constant dense<0.000000e+00> : vector<4xf32>
    %143 = vector.multi_reduction <add>, %142, %cst_59 [1] : vector<4x32xf32> to vector<4xf32>
    %144 = vector.shape_cast %143 : vector<4xf32> to vector<4x1xf32>
    %145 = math.sqrt %144 : vector<4x1xf32>
    %cst_60 = arith.constant 9.99999997E-7 : f32
    %146 = vector.broadcast %cst_60 : f32 to vector<4x1xf32>
    %147 = arith.addf %145, %146 : vector<4x1xf32>
    %148 = vector.broadcast %147 : vector<4x1xf32> to vector<4x32xf32>
    %149 = arith.divf %133, %148 : vector<4x32xf32>
    %cst_61 = arith.constant dense<0.000000e+00> : vector<32x32xf32>
    %150 = tpu.matmul %141, %149, %cst_61 {dimension_numbers = #tpu.dot_dimension_numbers<[0], [0], [1], [1], [0, 1, 1, 1], [], []>} : vector<4x32xf32>, vector<4x32xf32>, vector<32x32xf32> -> vector<32x32xf32>
    %151 = arith.mulf %150, %150 : vector<32x32xf32>
    %cst_62 = arith.constant dense<0.000000e+00> : vector<32xf32>
    %152 = vector.multi_reduction <add>, %151, %cst_62 [1] : vector<32x32xf32> to vector<32xf32>
    %153 = vector.shape_cast %152 : vector<32xf32> to vector<32x1xf32>
    %cst_63 = arith.constant dense<0.000000e+00> : vector<1xf32>
    %154 = vector.multi_reduction <add>, %153, %cst_63 [0] : vector<32x1xf32> to vector<1xf32>
    %155 = vector.shape_cast %154 : vector<1xf32> to vector<1x1xf32>
    %cst_64 = arith.constant 1.024000e+03 : f32
    %156 = vector.broadcast %cst_64 : f32 to vector<1x1xf32>
    %157 = arith.divf %155, %156 : vector<1x1xf32>
    %158 = arith.addf %121, %157 : vector<1x1xf32>
    %cst_65 = arith.constant dense<0.000000e+00> : vector<32xf32>
    %159 = vector.multi_reduction <add>, %2, %cst_65 [0] : vector<4x32xf32> to vector<32xf32>
    %160 = vector.shape_cast %159 : vector<32xf32> to vector<1x32xf32>
    %cst_66 = arith.constant 4.000000e+00 : f32
    %161 = vector.broadcast %cst_66 : f32 to vector<1x32xf32>
    %162 = arith.divf %160, %161 : vector<1x32xf32>
    %163 = vector.broadcast %162 : vector<1x32xf32> to vector<4x32xf32>
    %164 = arith.subf %2, %163 : vector<4x32xf32>
    %cst_67 = arith.constant dense<0.000000e+00> : vector<32xf32>
    %165 = vector.multi_reduction <add>, %1, %cst_67 [0] : vector<4x32xf32> to vector<32xf32>
    %166 = vector.shape_cast %165 : vector<32xf32> to vector<1x32xf32>
    %cst_68 = arith.constant 4.000000e+00 : f32
    %167 = vector.broadcast %cst_68 : f32 to vector<1x32xf32>
    %168 = arith.divf %166, %167 : vector<1x32xf32>
    %169 = vector.broadcast %168 : vector<1x32xf32> to vector<4x32xf32>
    %170 = arith.subf %1, %169 : vector<4x32xf32>
    %171 = arith.mulf %164, %164 : vector<4x32xf32>
    %cst_69 = arith.constant dense<0.000000e+00> : vector<4xf32>
    %172 = vector.multi_reduction <add>, %171, %cst_69 [1] : vector<4x32xf32> to vector<4xf32>
    %173 = vector.shape_cast %172 : vector<4xf32> to vector<4x1xf32>
    %174 = math.sqrt %173 : vector<4x1xf32>
    %cst_70 = arith.constant 9.99999997E-7 : f32
    %175 = vector.broadcast %cst_70 : f32 to vector<4x1xf32>
    %176 = arith.addf %174, %175 : vector<4x1xf32>
    %177 = vector.broadcast %176 : vector<4x1xf32> to vector<4x32xf32>
    %178 = arith.divf %164, %177 : vector<4x32xf32>
    %179 = arith.mulf %170, %170 : vector<4x32xf32>
    %cst_71 = arith.constant dense<0.000000e+00> : vector<4xf32>
    %180 = vector.multi_reduction <add>, %179, %cst_71 [1] : vector<4x32xf32> to vector<4xf32>
    %181 = vector.shape_cast %180 : vector<4xf32> to vector<4x1xf32>
    %182 = math.sqrt %181 : vector<4x1xf32>
    %cst_72 = arith.constant 9.99999997E-7 : f32
    %183 = vector.broadcast %cst_72 : f32 to vector<4x1xf32>
    %184 = arith.addf %182, %183 : vector<4x1xf32>
    %185 = vector.broadcast %184 : vector<4x1xf32> to vector<4x32xf32>
    %186 = arith.divf %170, %185 : vector<4x32xf32>
    %cst_73 = arith.constant dense<0.000000e+00> : vector<32x32xf32>
    %187 = tpu.matmul %178, %186, %cst_73 {dimension_numbers = #tpu.dot_dimension_numbers<[0], [0], [1], [1], [0, 1, 1, 1], [], []>} : vector<4x32xf32>, vector<4x32xf32>, vector<32x32xf32> -> vector<32x32xf32>
    %188 = arith.mulf %187, %187 : vector<32x32xf32>
    %cst_74 = arith.constant dense<0.000000e+00> : vector<32xf32>
    %189 = vector.multi_reduction <add>, %188, %cst_74 [1] : vector<32x32xf32> to vector<32xf32>
    %190 = vector.shape_cast %189 : vector<32xf32> to vector<32x1xf32>
    %cst_75 = arith.constant dense<0.000000e+00> : vector<1xf32>
    %191 = vector.multi_reduction <add>, %190, %cst_75 [0] : vector<32x1xf32> to vector<1xf32>
    %192 = vector.shape_cast %191 : vector<1xf32> to vector<1x1xf32>
    %cst_76 = arith.constant 1.024000e+03 : f32
    %193 = vector.broadcast %cst_76 : f32 to vector<1x1xf32>
    %194 = arith.divf %192, %193 : vector<1x1xf32>
    %195 = arith.addf %158, %194 : vector<1x1xf32>
    %cst_77 = arith.constant dense<0.000000e+00> : vector<32xf32>
    %196 = vector.multi_reduction <add>, %0, %cst_77 [0] : vector<4x32xf32> to vector<32xf32>
    %197 = vector.shape_cast %196 : vector<32xf32> to vector<1x32xf32>
    %cst_78 = arith.constant 4.000000e+00 : f32
    %198 = vector.broadcast %cst_78 : f32 to vector<1x32xf32>
    %199 = arith.divf %197, %198 : vector<1x32xf32>
    %200 = vector.broadcast %199 : vector<1x32xf32> to vector<4x32xf32>
    %201 = arith.subf %0, %200 : vector<4x32xf32>
    %cst_79 = arith.constant dense<0.000000e+00> : vector<32xf32>
    %202 = vector.multi_reduction <add>, %1, %cst_79 [0] : vector<4x32xf32> to vector<32xf32>
    %203 = vector.shape_cast %202 : vector<32xf32> to vector<1x32xf32>
    %cst_80 = arith.constant 4.000000e+00 : f32
    %204 = vector.broadcast %cst_80 : f32 to vector<1x32xf32>
    %205 = arith.divf %203, %204 : vector<1x32xf32>
    %206 = vector.broadcast %205 : vector<1x32xf32> to vector<4x32xf32>
    %207 = arith.subf %1, %206 : vector<4x32xf32>
    %208 = arith.mulf %201, %201 : vector<4x32xf32>
    %cst_81 = arith.constant dense<0.000000e+00> : vector<4xf32>
    %209 = vector.multi_reduction <add>, %208, %cst_81 [1] : vector<4x32xf32> to vector<4xf32>
    %210 = vector.shape_cast %209 : vector<4xf32> to vector<4x1xf32>
    %211 = math.sqrt %210 : vector<4x1xf32>
    %cst_82 = arith.constant 9.99999997E-7 : f32
    %212 = vector.broadcast %cst_82 : f32 to vector<4x1xf32>
    %213 = arith.addf %211, %212 : vector<4x1xf32>
    %214 = vector.broadcast %213 : vector<4x1xf32> to vector<4x32xf32>
    %215 = arith.divf %201, %214 : vector<4x32xf32>
    %216 = arith.mulf %207, %207 : vector<4x32xf32>
    %cst_83 = arith.constant dense<0.000000e+00> : vector<4xf32>
    %217 = vector.multi_reduction <add>, %216, %cst_83 [1] : vector<4x32xf32> to vector<4xf32>
    %218 = vector.shape_cast %217 : vector<4xf32> to vector<4x1xf32>
    %219 = math.sqrt %218 : vector<4x1xf32>
    %cst_84 = arith.constant 9.99999997E-7 : f32
    %220 = vector.broadcast %cst_84 : f32 to vector<4x1xf32>
    %221 = arith.addf %219, %220 : vector<4x1xf32>
    %222 = vector.broadcast %221 : vector<4x1xf32> to vector<4x32xf32>
    %223 = arith.divf %207, %222 : vector<4x32xf32>
    %cst_85 = arith.constant dense<0.000000e+00> : vector<32x32xf32>
    %224 = tpu.matmul %215, %223, %cst_85 {dimension_numbers = #tpu.dot_dimension_numbers<[0], [0], [1], [1], [0, 1, 1, 1], [], []>} : vector<4x32xf32>, vector<4x32xf32>, vector<32x32xf32> -> vector<32x32xf32>
    %225 = arith.mulf %224, %224 : vector<32x32xf32>
    %cst_86 = arith.constant dense<0.000000e+00> : vector<32xf32>
    %226 = vector.multi_reduction <add>, %225, %cst_86 [1] : vector<32x32xf32> to vector<32xf32>
    %227 = vector.shape_cast %226 : vector<32xf32> to vector<32x1xf32>
    %cst_87 = arith.constant dense<0.000000e+00> : vector<1xf32>
    %228 = vector.multi_reduction <add>, %227, %cst_87 [0] : vector<32x1xf32> to vector<1xf32>
    %229 = vector.shape_cast %228 : vector<1xf32> to vector<1x1xf32>
    %cst_88 = arith.constant 1.024000e+03 : f32
    %230 = vector.broadcast %cst_88 : f32 to vector<1x1xf32>
    %231 = arith.divf %229, %230 : vector<1x1xf32>
    %232 = arith.addf %195, %231 : vector<1x1xf32>
    %cst_89 = arith.constant dense<0.000000e+00> : vector<32xf32>
    %233 = vector.multi_reduction <add>, %3, %cst_89 [0] : vector<4x32xf32> to vector<32xf32>
    %234 = vector.shape_cast %233 : vector<32xf32> to vector<1x32xf32>
    %cst_90 = arith.constant 4.000000e+00 : f32
    %235 = vector.broadcast %cst_90 : f32 to vector<1x32xf32>
    %236 = arith.divf %234, %235 : vector<1x32xf32>
    %cst_91 = arith.constant dense<0.000000e+00> : vector<32xf32>
    %237 = vector.multi_reduction <add>, %4, %cst_91 [0] : vector<4x32xf32> to vector<32xf32>
    %238 = vector.shape_cast %237 : vector<32xf32> to vector<1x32xf32>
    %cst_92 = arith.constant 4.000000e+00 : f32
    %239 = vector.broadcast %cst_92 : f32 to vector<1x32xf32>
    %240 = arith.divf %238, %239 : vector<1x32xf32>
    %241 = vector.broadcast %236 : vector<1x32xf32> to vector<4x32xf32>
    %242 = arith.subf %3, %241 : vector<4x32xf32>
    %243 = vector.broadcast %240 : vector<1x32xf32> to vector<4x32xf32>
    %244 = arith.subf %4, %243 : vector<4x32xf32>
    %245 = arith.subf %236, %240 : vector<1x32xf32>
    %246 = arith.mulf %245, %245 : vector<1x32xf32>
    %cst_93 = arith.constant dense<0.000000e+00> : vector<1xf32>
    %247 = vector.multi_reduction <add>, %246, %cst_93 [1] : vector<1x32xf32> to vector<1xf32>
    %248 = vector.shape_cast %247 : vector<1xf32> to vector<1x1xf32>
    %249 = math.sqrt %248 : vector<1x1xf32>
    %250 = arith.mulf %242, %242 : vector<4x32xf32>
    %cst_94 = arith.constant dense<0.000000e+00> : vector<32xf32>
    %251 = vector.multi_reduction <add>, %250, %cst_94 [0] : vector<4x32xf32> to vector<32xf32>
    %252 = vector.shape_cast %251 : vector<32xf32> to vector<1x32xf32>
    %cst_95 = arith.constant 4.000000e+00 : f32
    %253 = vector.broadcast %cst_95 : f32 to vector<1x32xf32>
    %254 = arith.divf %252, %253 : vector<1x32xf32>
    %255 = arith.mulf %244, %244 : vector<4x32xf32>
    %cst_96 = arith.constant dense<0.000000e+00> : vector<32xf32>
    %256 = vector.multi_reduction <add>, %255, %cst_96 [0] : vector<4x32xf32> to vector<32xf32>
    %257 = vector.shape_cast %256 : vector<32xf32> to vector<1x32xf32>
    %cst_97 = arith.constant 4.000000e+00 : f32
    %258 = vector.broadcast %cst_97 : f32 to vector<1x32xf32>
    %259 = arith.divf %257, %258 : vector<1x32xf32>
    %260 = arith.subf %254, %259 : vector<1x32xf32>
    %261 = arith.mulf %260, %260 : vector<1x32xf32>
    %cst_98 = arith.constant dense<0.000000e+00> : vector<1xf32>
    %262 = vector.multi_reduction <add>, %261, %cst_98 [1] : vector<1x32xf32> to vector<1xf32>
    %263 = vector.shape_cast %262 : vector<1xf32> to vector<1x1xf32>
    %264 = math.sqrt %263 : vector<1x1xf32>
    %265 = arith.addf %249, %264 : vector<1x1xf32>
    %266 = arith.mulf %242, %242 : vector<4x32xf32>
    %267 = arith.mulf %242, %266 : vector<4x32xf32>
    %cst_99 = arith.constant dense<0.000000e+00> : vector<32xf32>
    %268 = vector.multi_reduction <add>, %267, %cst_99 [0] : vector<4x32xf32> to vector<32xf32>
    %269 = vector.shape_cast %268 : vector<32xf32> to vector<1x32xf32>
    %cst_100 = arith.constant 4.000000e+00 : f32
    %270 = vector.broadcast %cst_100 : f32 to vector<1x32xf32>
    %271 = arith.divf %269, %270 : vector<1x32xf32>
    %272 = arith.mulf %244, %244 : vector<4x32xf32>
    %273 = arith.mulf %244, %272 : vector<4x32xf32>
    %cst_101 = arith.constant dense<0.000000e+00> : vector<32xf32>
    %274 = vector.multi_reduction <add>, %273, %cst_101 [0] : vector<4x32xf32> to vector<32xf32>
    %275 = vector.shape_cast %274 : vector<32xf32> to vector<1x32xf32>
    %cst_102 = arith.constant 4.000000e+00 : f32
    %276 = vector.broadcast %cst_102 : f32 to vector<1x32xf32>
    %277 = arith.divf %275, %276 : vector<1x32xf32>
    %278 = arith.subf %271, %277 : vector<1x32xf32>
    %279 = arith.mulf %278, %278 : vector<1x32xf32>
    %cst_103 = arith.constant dense<0.000000e+00> : vector<1xf32>
    %280 = vector.multi_reduction <add>, %279, %cst_103 [1] : vector<1x32xf32> to vector<1xf32>
    %281 = vector.shape_cast %280 : vector<1xf32> to vector<1x1xf32>
    %282 = math.sqrt %281 : vector<1x1xf32>
    %283 = arith.addf %265, %282 : vector<1x1xf32>
    %284 = arith.mulf %242, %242 : vector<4x32xf32>
    %285 = arith.mulf %284, %284 : vector<4x32xf32>
    %cst_104 = arith.constant dense<0.000000e+00> : vector<32xf32>
    %286 = vector.multi_reduction <add>, %285, %cst_104 [0] : vector<4x32xf32> to vector<32xf32>
    %287 = vector.shape_cast %286 : vector<32xf32> to vector<1x32xf32>
    %cst_105 = arith.constant 4.000000e+00 : f32
    %288 = vector.broadcast %cst_105 : f32 to vector<1x32xf32>
    %289 = arith.divf %287, %288 : vector<1x32xf32>
    %290 = arith.mulf %244, %244 : vector<4x32xf32>
    %291 = arith.mulf %290, %290 : vector<4x32xf32>
    %cst_106 = arith.constant dense<0.000000e+00> : vector<32xf32>
    %292 = vector.multi_reduction <add>, %291, %cst_106 [0] : vector<4x32xf32> to vector<32xf32>
    %293 = vector.shape_cast %292 : vector<32xf32> to vector<1x32xf32>
    %cst_107 = arith.constant 4.000000e+00 : f32
    %294 = vector.broadcast %cst_107 : f32 to vector<1x32xf32>
    %295 = arith.divf %293, %294 : vector<1x32xf32>
    %296 = arith.subf %289, %295 : vector<1x32xf32>
    %297 = arith.mulf %296, %296 : vector<1x32xf32>
    %cst_108 = arith.constant dense<0.000000e+00> : vector<1xf32>
    %298 = vector.multi_reduction <add>, %297, %cst_108 [1] : vector<1x32xf32> to vector<1xf32>
    %299 = vector.shape_cast %298 : vector<1xf32> to vector<1x1xf32>
    %300 = math.sqrt %299 : vector<1x1xf32>
    %301 = arith.addf %283, %300 : vector<1x1xf32>
    %302 = arith.mulf %242, %242 : vector<4x32xf32>
    %303 = arith.mulf %302, %302 : vector<4x32xf32>
    %304 = arith.mulf %242, %303 : vector<4x32xf32>
    %cst_109 = arith.constant dense<0.000000e+00> : vector<32xf32>
    %305 = vector.multi_reduction <add>, %304, %cst_109 [0] : vector<4x32xf32> to vector<32xf32>
    %306 = vector.shape_cast %305 : vector<32xf32> to vector<1x32xf32>
    %cst_110 = arith.constant 4.000000e+00 : f32
    %307 = vector.broadcast %cst_110 : f32 to vector<1x32xf32>
    %308 = arith.divf %306, %307 : vector<1x32xf32>
    %309 = arith.mulf %244, %244 : vector<4x32xf32>
    %310 = arith.mulf %309, %309 : vector<4x32xf32>
    %311 = arith.mulf %244, %310 : vector<4x32xf32>
    %cst_111 = arith.constant dense<0.000000e+00> : vector<32xf32>
    %312 = vector.multi_reduction <add>, %311, %cst_111 [0] : vector<4x32xf32> to vector<32xf32>
    %313 = vector.shape_cast %312 : vector<32xf32> to vector<1x32xf32>
    %cst_112 = arith.constant 4.000000e+00 : f32
    %314 = vector.broadcast %cst_112 : f32 to vector<1x32xf32>
    %315 = arith.divf %313, %314 : vector<1x32xf32>
    %316 = arith.subf %308, %315 : vector<1x32xf32>
    %317 = arith.mulf %316, %316 : vector<1x32xf32>
    %cst_113 = arith.constant dense<0.000000e+00> : vector<1xf32>
    %318 = vector.multi_reduction <add>, %317, %cst_113 [1] : vector<1x32xf32> to vector<1xf32>
    %319 = vector.shape_cast %318 : vector<1xf32> to vector<1x1xf32>
    %320 = math.sqrt %319 : vector<1x1xf32>
    %321 = arith.addf %301, %320 : vector<1x1xf32>
    %cst_114 = arith.constant dense<0.000000e+00> : vector<32xf32>
    %322 = vector.multi_reduction <add>, %3, %cst_114 [0] : vector<4x32xf32> to vector<32xf32>
    %323 = vector.shape_cast %322 : vector<32xf32> to vector<1x32xf32>
    %cst_115 = arith.constant 4.000000e+00 : f32
    %324 = vector.broadcast %cst_115 : f32 to vector<1x32xf32>
    %325 = arith.divf %323, %324 : vector<1x32xf32>
    %cst_116 = arith.constant dense<0.000000e+00> : vector<32xf32>
    %326 = vector.multi_reduction <add>, %5, %cst_116 [0] : vector<4x32xf32> to vector<32xf32>
    %327 = vector.shape_cast %326 : vector<32xf32> to vector<1x32xf32>
    %cst_117 = arith.constant 4.000000e+00 : f32
    %328 = vector.broadcast %cst_117 : f32 to vector<1x32xf32>
    %329 = arith.divf %327, %328 : vector<1x32xf32>
    %330 = vector.broadcast %325 : vector<1x32xf32> to vector<4x32xf32>
    %331 = arith.subf %3, %330 : vector<4x32xf32>
    %332 = vector.broadcast %329 : vector<1x32xf32> to vector<4x32xf32>
    %333 = arith.subf %5, %332 : vector<4x32xf32>
    %334 = arith.subf %325, %329 : vector<1x32xf32>
    %335 = arith.mulf %334, %334 : vector<1x32xf32>
    %cst_118 = arith.constant dense<0.000000e+00> : vector<1xf32>
    %336 = vector.multi_reduction <add>, %335, %cst_118 [1] : vector<1x32xf32> to vector<1xf32>
    %337 = vector.shape_cast %336 : vector<1xf32> to vector<1x1xf32>
    %338 = math.sqrt %337 : vector<1x1xf32>
    %339 = arith.mulf %331, %331 : vector<4x32xf32>
    %cst_119 = arith.constant dense<0.000000e+00> : vector<32xf32>
    %340 = vector.multi_reduction <add>, %339, %cst_119 [0] : vector<4x32xf32> to vector<32xf32>
    %341 = vector.shape_cast %340 : vector<32xf32> to vector<1x32xf32>
    %cst_120 = arith.constant 4.000000e+00 : f32
    %342 = vector.broadcast %cst_120 : f32 to vector<1x32xf32>
    %343 = arith.divf %341, %342 : vector<1x32xf32>
    %344 = arith.mulf %333, %333 : vector<4x32xf32>
    %cst_121 = arith.constant dense<0.000000e+00> : vector<32xf32>
    %345 = vector.multi_reduction <add>, %344, %cst_121 [0] : vector<4x32xf32> to vector<32xf32>
    %346 = vector.shape_cast %345 : vector<32xf32> to vector<1x32xf32>
    %cst_122 = arith.constant 4.000000e+00 : f32
    %347 = vector.broadcast %cst_122 : f32 to vector<1x32xf32>
    %348 = arith.divf %346, %347 : vector<1x32xf32>
    %349 = arith.subf %343, %348 : vector<1x32xf32>
    %350 = arith.mulf %349, %349 : vector<1x32xf32>
    %cst_123 = arith.constant dense<0.000000e+00> : vector<1xf32>
    %351 = vector.multi_reduction <add>, %350, %cst_123 [1] : vector<1x32xf32> to vector<1xf32>
    %352 = vector.shape_cast %351 : vector<1xf32> to vector<1x1xf32>
    %353 = math.sqrt %352 : vector<1x1xf32>
    %354 = arith.addf %338, %353 : vector<1x1xf32>
    %355 = arith.mulf %331, %331 : vector<4x32xf32>
    %356 = arith.mulf %331, %355 : vector<4x32xf32>
    %cst_124 = arith.constant dense<0.000000e+00> : vector<32xf32>
    %357 = vector.multi_reduction <add>, %356, %cst_124 [0] : vector<4x32xf32> to vector<32xf32>
    %358 = vector.shape_cast %357 : vector<32xf32> to vector<1x32xf32>
    %cst_125 = arith.constant 4.000000e+00 : f32
    %359 = vector.broadcast %cst_125 : f32 to vector<1x32xf32>
    %360 = arith.divf %358, %359 : vector<1x32xf32>
    %361 = arith.mulf %333, %333 : vector<4x32xf32>
    %362 = arith.mulf %333, %361 : vector<4x32xf32>
    %cst_126 = arith.constant dense<0.000000e+00> : vector<32xf32>
    %363 = vector.multi_reduction <add>, %362, %cst_126 [0] : vector<4x32xf32> to vector<32xf32>
    %364 = vector.shape_cast %363 : vector<32xf32> to vector<1x32xf32>
    %cst_127 = arith.constant 4.000000e+00 : f32
    %365 = vector.broadcast %cst_127 : f32 to vector<1x32xf32>
    %366 = arith.divf %364, %365 : vector<1x32xf32>
    %367 = arith.subf %360, %366 : vector<1x32xf32>
    %368 = arith.mulf %367, %367 : vector<1x32xf32>
    %cst_128 = arith.constant dense<0.000000e+00> : vector<1xf32>
    %369 = vector.multi_reduction <add>, %368, %cst_128 [1] : vector<1x32xf32> to vector<1xf32>
    %370 = vector.shape_cast %369 : vector<1xf32> to vector<1x1xf32>
    %371 = math.sqrt %370 : vector<1x1xf32>
    %372 = arith.addf %354, %371 : vector<1x1xf32>
    %373 = arith.mulf %331, %331 : vector<4x32xf32>
    %374 = arith.mulf %373, %373 : vector<4x32xf32>
    %cst_129 = arith.constant dense<0.000000e+00> : vector<32xf32>
    %375 = vector.multi_reduction <add>, %374, %cst_129 [0] : vector<4x32xf32> to vector<32xf32>
    %376 = vector.shape_cast %375 : vector<32xf32> to vector<1x32xf32>
    %cst_130 = arith.constant 4.000000e+00 : f32
    %377 = vector.broadcast %cst_130 : f32 to vector<1x32xf32>
    %378 = arith.divf %376, %377 : vector<1x32xf32>
    %379 = arith.mulf %333, %333 : vector<4x32xf32>
    %380 = arith.mulf %379, %379 : vector<4x32xf32>
    %cst_131 = arith.constant dense<0.000000e+00> : vector<32xf32>
    %381 = vector.multi_reduction <add>, %380, %cst_131 [0] : vector<4x32xf32> to vector<32xf32>
    %382 = vector.shape_cast %381 : vector<32xf32> to vector<1x32xf32>
    %cst_132 = arith.constant 4.000000e+00 : f32
    %383 = vector.broadcast %cst_132 : f32 to vector<1x32xf32>
    %384 = arith.divf %382, %383 : vector<1x32xf32>
    %385 = arith.subf %378, %384 : vector<1x32xf32>
    %386 = arith.mulf %385, %385 : vector<1x32xf32>
    %cst_133 = arith.constant dense<0.000000e+00> : vector<1xf32>
    %387 = vector.multi_reduction <add>, %386, %cst_133 [1] : vector<1x32xf32> to vector<1xf32>
    %388 = vector.shape_cast %387 : vector<1xf32> to vector<1x1xf32>
    %389 = math.sqrt %388 : vector<1x1xf32>
    %390 = arith.addf %372, %389 : vector<1x1xf32>
    %391 = arith.mulf %331, %331 : vector<4x32xf32>
    %392 = arith.mulf %391, %391 : vector<4x32xf32>
    %393 = arith.mulf %331, %392 : vector<4x32xf32>
    %cst_134 = arith.constant dense<0.000000e+00> : vector<32xf32>
    %394 = vector.multi_reduction <add>, %393, %cst_134 [0] : vector<4x32xf32> to vector<32xf32>
    %395 = vector.shape_cast %394 : vector<32xf32> to vector<1x32xf32>
    %cst_135 = arith.constant 4.000000e+00 : f32
    %396 = vector.broadcast %cst_135 : f32 to vector<1x32xf32>
    %397 = arith.divf %395, %396 : vector<1x32xf32>
    %398 = arith.mulf %333, %333 : vector<4x32xf32>
    %399 = arith.mulf %398, %398 : vector<4x32xf32>
    %400 = arith.mulf %333, %399 : vector<4x32xf32>
    %cst_136 = arith.constant dense<0.000000e+00> : vector<32xf32>
    %401 = vector.multi_reduction <add>, %400, %cst_136 [0] : vector<4x32xf32> to vector<32xf32>
    %402 = vector.shape_cast %401 : vector<32xf32> to vector<1x32xf32>
    %cst_137 = arith.constant 4.000000e+00 : f32
    %403 = vector.broadcast %cst_137 : f32 to vector<1x32xf32>
    %404 = arith.divf %402, %403 : vector<1x32xf32>
    %405 = arith.subf %397, %404 : vector<1x32xf32>
    %406 = arith.mulf %405, %405 : vector<1x32xf32>
    %cst_138 = arith.constant dense<0.000000e+00> : vector<1xf32>
    %407 = vector.multi_reduction <add>, %406, %cst_138 [1] : vector<1x32xf32> to vector<1xf32>
    %408 = vector.shape_cast %407 : vector<1xf32> to vector<1x1xf32>
    %409 = math.sqrt %408 : vector<1x1xf32>
    %410 = arith.addf %390, %409 : vector<1x1xf32>
    %411 = arith.addf %321, %410 : vector<1x1xf32>
    %cst_139 = arith.constant dense<0.000000e+00> : vector<32xf32>
    %412 = vector.multi_reduction <add>, %5, %cst_139 [0] : vector<4x32xf32> to vector<32xf32>
    %413 = vector.shape_cast %412 : vector<32xf32> to vector<1x32xf32>
    %cst_140 = arith.constant 4.000000e+00 : f32
    %414 = vector.broadcast %cst_140 : f32 to vector<1x32xf32>
    %415 = arith.divf %413, %414 : vector<1x32xf32>
    %cst_141 = arith.constant dense<0.000000e+00> : vector<32xf32>
    %416 = vector.multi_reduction <add>, %4, %cst_141 [0] : vector<4x32xf32> to vector<32xf32>
    %417 = vector.shape_cast %416 : vector<32xf32> to vector<1x32xf32>
    %cst_142 = arith.constant 4.000000e+00 : f32
    %418 = vector.broadcast %cst_142 : f32 to vector<1x32xf32>
    %419 = arith.divf %417, %418 : vector<1x32xf32>
    %420 = vector.broadcast %415 : vector<1x32xf32> to vector<4x32xf32>
    %421 = arith.subf %5, %420 : vector<4x32xf32>
    %422 = vector.broadcast %419 : vector<1x32xf32> to vector<4x32xf32>
    %423 = arith.subf %4, %422 : vector<4x32xf32>
    %424 = arith.subf %415, %419 : vector<1x32xf32>
    %425 = arith.mulf %424, %424 : vector<1x32xf32>
    %cst_143 = arith.constant dense<0.000000e+00> : vector<1xf32>
    %426 = vector.multi_reduction <add>, %425, %cst_143 [1] : vector<1x32xf32> to vector<1xf32>
    %427 = vector.shape_cast %426 : vector<1xf32> to vector<1x1xf32>
    %428 = math.sqrt %427 : vector<1x1xf32>
    %429 = arith.mulf %421, %421 : vector<4x32xf32>
    %cst_144 = arith.constant dense<0.000000e+00> : vector<32xf32>
    %430 = vector.multi_reduction <add>, %429, %cst_144 [0] : vector<4x32xf32> to vector<32xf32>
    %431 = vector.shape_cast %430 : vector<32xf32> to vector<1x32xf32>
    %cst_145 = arith.constant 4.000000e+00 : f32
    %432 = vector.broadcast %cst_145 : f32 to vector<1x32xf32>
    %433 = arith.divf %431, %432 : vector<1x32xf32>
    %434 = arith.mulf %423, %423 : vector<4x32xf32>
    %cst_146 = arith.constant dense<0.000000e+00> : vector<32xf32>
    %435 = vector.multi_reduction <add>, %434, %cst_146 [0] : vector<4x32xf32> to vector<32xf32>
    %436 = vector.shape_cast %435 : vector<32xf32> to vector<1x32xf32>
    %cst_147 = arith.constant 4.000000e+00 : f32
    %437 = vector.broadcast %cst_147 : f32 to vector<1x32xf32>
    %438 = arith.divf %436, %437 : vector<1x32xf32>
    %439 = arith.subf %433, %438 : vector<1x32xf32>
    %440 = arith.mulf %439, %439 : vector<1x32xf32>
    %cst_148 = arith.constant dense<0.000000e+00> : vector<1xf32>
    %441 = vector.multi_reduction <add>, %440, %cst_148 [1] : vector<1x32xf32> to vector<1xf32>
    %442 = vector.shape_cast %441 : vector<1xf32> to vector<1x1xf32>
    %443 = math.sqrt %442 : vector<1x1xf32>
    %444 = arith.addf %428, %443 : vector<1x1xf32>
    %445 = arith.mulf %421, %421 : vector<4x32xf32>
    %446 = arith.mulf %421, %445 : vector<4x32xf32>
    %cst_149 = arith.constant dense<0.000000e+00> : vector<32xf32>
    %447 = vector.multi_reduction <add>, %446, %cst_149 [0] : vector<4x32xf32> to vector<32xf32>
    %448 = vector.shape_cast %447 : vector<32xf32> to vector<1x32xf32>
    %cst_150 = arith.constant 4.000000e+00 : f32
    %449 = vector.broadcast %cst_150 : f32 to vector<1x32xf32>
    %450 = arith.divf %448, %449 : vector<1x32xf32>
    %451 = arith.mulf %423, %423 : vector<4x32xf32>
    %452 = arith.mulf %423, %451 : vector<4x32xf32>
    %cst_151 = arith.constant dense<0.000000e+00> : vector<32xf32>
    %453 = vector.multi_reduction <add>, %452, %cst_151 [0] : vector<4x32xf32> to vector<32xf32>
    %454 = vector.shape_cast %453 : vector<32xf32> to vector<1x32xf32>
    %cst_152 = arith.constant 4.000000e+00 : f32
    %455 = vector.broadcast %cst_152 : f32 to vector<1x32xf32>
    %456 = arith.divf %454, %455 : vector<1x32xf32>
    %457 = arith.subf %450, %456 : vector<1x32xf32>
    %458 = arith.mulf %457, %457 : vector<1x32xf32>
    %cst_153 = arith.constant dense<0.000000e+00> : vector<1xf32>
    %459 = vector.multi_reduction <add>, %458, %cst_153 [1] : vector<1x32xf32> to vector<1xf32>
    %460 = vector.shape_cast %459 : vector<1xf32> to vector<1x1xf32>
    %461 = math.sqrt %460 : vector<1x1xf32>
    %462 = arith.addf %444, %461 : vector<1x1xf32>
    %463 = arith.mulf %421, %421 : vector<4x32xf32>
    %464 = arith.mulf %463, %463 : vector<4x32xf32>
    %cst_154 = arith.constant dense<0.000000e+00> : vector<32xf32>
    %465 = vector.multi_reduction <add>, %464, %cst_154 [0] : vector<4x32xf32> to vector<32xf32>
    %466 = vector.shape_cast %465 : vector<32xf32> to vector<1x32xf32>
    %cst_155 = arith.constant 4.000000e+00 : f32
    %467 = vector.broadcast %cst_155 : f32 to vector<1x32xf32>
    %468 = arith.divf %466, %467 : vector<1x32xf32>
    %469 = arith.mulf %423, %423 : vector<4x32xf32>
    %470 = arith.mulf %469, %469 : vector<4x32xf32>
    %cst_156 = arith.constant dense<0.000000e+00> : vector<32xf32>
    %471 = vector.multi_reduction <add>, %470, %cst_156 [0] : vector<4x32xf32> to vector<32xf32>
    %472 = vector.shape_cast %471 : vector<32xf32> to vector<1x32xf32>
    %cst_157 = arith.constant 4.000000e+00 : f32
    %473 = vector.broadcast %cst_157 : f32 to vector<1x32xf32>
    %474 = arith.divf %472, %473 : vector<1x32xf32>
    %475 = arith.subf %468, %474 : vector<1x32xf32>
    %476 = arith.mulf %475, %475 : vector<1x32xf32>
    %cst_158 = arith.constant dense<0.000000e+00> : vector<1xf32>
    %477 = vector.multi_reduction <add>, %476, %cst_158 [1] : vector<1x32xf32> to vector<1xf32>
    %478 = vector.shape_cast %477 : vector<1xf32> to vector<1x1xf32>
    %479 = math.sqrt %478 : vector<1x1xf32>
    %480 = arith.addf %462, %479 : vector<1x1xf32>
    %481 = arith.mulf %421, %421 : vector<4x32xf32>
    %482 = arith.mulf %481, %481 : vector<4x32xf32>
    %483 = arith.mulf %421, %482 : vector<4x32xf32>
    %cst_159 = arith.constant dense<0.000000e+00> : vector<32xf32>
    %484 = vector.multi_reduction <add>, %483, %cst_159 [0] : vector<4x32xf32> to vector<32xf32>
    %485 = vector.shape_cast %484 : vector<32xf32> to vector<1x32xf32>
    %cst_160 = arith.constant 4.000000e+00 : f32
    %486 = vector.broadcast %cst_160 : f32 to vector<1x32xf32>
    %487 = arith.divf %485, %486 : vector<1x32xf32>
    %488 = arith.mulf %423, %423 : vector<4x32xf32>
    %489 = arith.mulf %488, %488 : vector<4x32xf32>
    %490 = arith.mulf %423, %489 : vector<4x32xf32>
    %cst_161 = arith.constant dense<0.000000e+00> : vector<32xf32>
    %491 = vector.multi_reduction <add>, %490, %cst_161 [0] : vector<4x32xf32> to vector<32xf32>
    %492 = vector.shape_cast %491 : vector<32xf32> to vector<1x32xf32>
    %cst_162 = arith.constant 4.000000e+00 : f32
    %493 = vector.broadcast %cst_162 : f32 to vector<1x32xf32>
    %494 = arith.divf %492, %493 : vector<1x32xf32>
    %495 = arith.subf %487, %494 : vector<1x32xf32>
    %496 = arith.mulf %495, %495 : vector<1x32xf32>
    %cst_163 = arith.constant dense<0.000000e+00> : vector<1xf32>
    %497 = vector.multi_reduction <add>, %496, %cst_163 [1] : vector<1x32xf32> to vector<1xf32>
    %498 = vector.shape_cast %497 : vector<1xf32> to vector<1x1xf32>
    %499 = math.sqrt %498 : vector<1x1xf32>
    %500 = arith.addf %480, %499 : vector<1x1xf32>
    %501 = arith.addf %411, %500 : vector<1x1xf32>
    %cst_164 = arith.constant 3.000000e+00 : f32
    %502 = vector.broadcast %cst_164 : f32 to vector<1x1xf32>
    %503 = arith.divf %501, %502 : vector<1x1xf32>
    %504 = arith.subf %9, %6 : vector<4x32xf32>
    %505 = arith.mulf %504, %504 : vector<4x32xf32>
    %cst_165 = arith.constant dense<0.000000e+00> : vector<4xf32>
    %506 = vector.multi_reduction <add>, %505, %cst_165 [1] : vector<4x32xf32> to vector<4xf32>
    %507 = vector.shape_cast %506 : vector<4xf32> to vector<4x1xf32>
    %cst_166 = arith.constant dense<0.000000e+00> : vector<1xf32>
    %508 = vector.multi_reduction <add>, %507, %cst_166 [0] : vector<4x1xf32> to vector<1xf32>
    %509 = vector.shape_cast %508 : vector<1xf32> to vector<1x1xf32>
    %cst_167 = arith.constant 1.280000e+02 : f32
    %510 = vector.broadcast %cst_167 : f32 to vector<1x1xf32>
    %511 = arith.divf %509, %510 : vector<1x1xf32>
    %512 = arith.subf %10, %7 : vector<4x32xf32>
    %513 = arith.mulf %512, %512 : vector<4x32xf32>
    %cst_168 = arith.constant dense<0.000000e+00> : vector<4xf32>
    %514 = vector.multi_reduction <add>, %513, %cst_168 [1] : vector<4x32xf32> to vector<4xf32>
    %515 = vector.shape_cast %514 : vector<4xf32> to vector<4x1xf32>
    %cst_169 = arith.constant dense<0.000000e+00> : vector<1xf32>
    %516 = vector.multi_reduction <add>, %515, %cst_169 [0] : vector<4x1xf32> to vector<1xf32>
    %517 = vector.shape_cast %516 : vector<1xf32> to vector<1x1xf32>
    %cst_170 = arith.constant 1.280000e+02 : f32
    %518 = vector.broadcast %cst_170 : f32 to vector<1x1xf32>
    %519 = arith.divf %517, %518 : vector<1x1xf32>
    %520 = arith.addf %511, %519 : vector<1x1xf32>
    %521 = arith.subf %11, %8 : vector<4x32xf32>
    %522 = arith.mulf %521, %521 : vector<4x32xf32>
    %cst_171 = arith.constant dense<0.000000e+00> : vector<4xf32>
    %523 = vector.multi_reduction <add>, %522, %cst_171 [1] : vector<4x32xf32> to vector<4xf32>
    %524 = vector.shape_cast %523 : vector<4xf32> to vector<4x1xf32>
    %cst_172 = arith.constant dense<0.000000e+00> : vector<1xf32>
    %525 = vector.multi_reduction <add>, %524, %cst_172 [0] : vector<4x1xf32> to vector<1xf32>
    %526 = vector.shape_cast %525 : vector<1xf32> to vector<1x1xf32>
    %cst_173 = arith.constant 1.280000e+02 : f32
    %527 = vector.broadcast %cst_173 : f32 to vector<1x1xf32>
    %528 = arith.divf %526, %527 : vector<1x1xf32>
    %529 = arith.addf %520, %528 : vector<1x1xf32>
    %cst_174 = arith.constant 3.000000e+00 : f32
    %530 = vector.broadcast %cst_174 : f32 to vector<1x1xf32>
    %531 = arith.divf %529, %530 : vector<1x1xf32>
    %cst_175 = arith.constant 3.000000e-01 : f32
    %532 = vector.broadcast %cst_175 : f32 to vector<1x1xf32>
    %533 = arith.mulf %532, %232 : vector<1x1xf32>
    %cst_176 = arith.constant 1.000000e+00 : f32
    %534 = vector.broadcast %cst_176 : f32 to vector<1x1xf32>
    %535 = arith.mulf %534, %503 : vector<1x1xf32>
    %536 = arith.addf %533, %535 : vector<1x1xf32>
    %cst_177 = arith.constant 1.000000e+00 : f32
    %537 = vector.broadcast %cst_177 : f32 to vector<1x1xf32>
    %538 = arith.mulf %537, %531 : vector<1x1xf32>
    %539 = arith.addf %536, %538 : vector<1x1xf32>
    %c0_178 = arith.constant 0 : index
    %c0_179 = arith.constant 0 : index
    %540 = vector.load %arg2[%c0_178, %c0_179] : memref<1x1xf32, #tpu.memory_space<vmem>>, vector<1x1xf32>
    tpu.vector_store %arg2[%c0_178, %c0_179], %539 {strides = array<i32>} : memref<1x1xf32, #tpu.memory_space<vmem>>, vector<1x1xf32>,
    return
  }
}

module attributes {stable_mosaic.version = 11 : i64} {
  func.func @_transformer_fusion_kernel(%arg0: i32, %arg1: memref<1x6x32xf32, #tpu.memory_space<vmem>>, %arg2: memref<32x96xf32, #tpu.memory_space<vmem>>, %arg3: memref<1x96xf32, #tpu.memory_space<vmem>>, %arg4: memref<32x32xf32, #tpu.memory_space<vmem>>, %arg5: memref<1x32xf32, #tpu.memory_space<vmem>>, %arg6: memref<1x32xf32, #tpu.memory_space<vmem>>, %arg7: memref<1x32xf32, #tpu.memory_space<vmem>>, %arg8: memref<32x2048xbf16, #tpu.memory_space<vmem>>, %arg9: memref<1x2048xf32, #tpu.memory_space<vmem>>, %arg10: memref<2048x32xbf16, #tpu.memory_space<vmem>>, %arg11: memref<1x32xf32, #tpu.memory_space<vmem>>, %arg12: memref<1x32xf32, #tpu.memory_space<vmem>>, %arg13: memref<1x32xf32, #tpu.memory_space<vmem>>, %arg14: memref<192x96xf32, #tpu.memory_space<vmem>>, %arg15: memref<1x96xf32, #tpu.memory_space<vmem>>, %arg16: memref<96x16xf32, #tpu.memory_space<vmem>>, %arg17: memref<1x16xf32, #tpu.memory_space<vmem>>, %arg18: memref<16x5xf32, #tpu.memory_space<vmem>>, %arg19: memref<1x5xf32, #tpu.memory_space<vmem>>, %arg20: memref<1x1x16xf32, #tpu.memory_space<vmem>>, %arg21: memref<1x1x4xf32, #tpu.memory_space<vmem>>, %arg22: memref<1x1x1xf32, #tpu.memory_space<vmem>>) attributes {dimension_semantics = [#tpu.dimension_semantics<parallel>], iteration_bounds = array<i64: 4>, scalar_prefetch = 0 : i64, scratch_operands = 0 : i64, tpu.core_type = #tpu.core_type<tc>, window_params = [{transform_indices = @transform_0, window_bounds = array<i64: 1, 6, 32>}, {pipeline_mode = #tpu.pipeline_mode<synchronous>, transform_indices = @transform_1, window_bounds = array<i64: 32, 96>}, {pipeline_mode = #tpu.pipeline_mode<synchronous>, transform_indices = @transform_2, window_bounds = array<i64: 1, 96>}, {pipeline_mode = #tpu.pipeline_mode<synchronous>, transform_indices = @transform_3, window_bounds = array<i64: 32, 32>}, {pipeline_mode = #tpu.pipeline_mode<synchronous>, transform_indices = @transform_4, window_bounds = array<i64: 1, 32>}, {pipeline_mode = #tpu.pipeline_mode<synchronous>, transform_indices = @transform_5, window_bounds = array<i64: 1, 32>}, {pipeline_mode = #tpu.pipeline_mode<synchronous>, transform_indices = @transform_6, window_bounds = array<i64: 1, 32>}, {pipeline_mode = #tpu.pipeline_mode<synchronous>, transform_indices = @transform_7, window_bounds = array<i64: 32, 2048>}, {pipeline_mode = #tpu.pipeline_mode<synchronous>, transform_indices = @transform_8, window_bounds = array<i64: 1, 2048>}, {pipeline_mode = #tpu.pipeline_mode<synchronous>, transform_indices = @transform_9, window_bounds = array<i64: 2048, 32>}, {pipeline_mode = #tpu.pipeline_mode<synchronous>, transform_indices = @transform_10, window_bounds = array<i64: 1, 32>}, {pipeline_mode = #tpu.pipeline_mode<synchronous>, transform_indices = @transform_11, window_bounds = array<i64: 1, 32>}, {pipeline_mode = #tpu.pipeline_mode<synchronous>, transform_indices = @transform_12, window_bounds = array<i64: 1, 32>}, {pipeline_mode = #tpu.pipeline_mode<synchronous>, transform_indices = @transform_13, window_bounds = array<i64: 192, 96>}, {pipeline_mode = #tpu.pipeline_mode<synchronous>, transform_indices = @transform_14, window_bounds = array<i64: 1, 96>}, {pipeline_mode = #tpu.pipeline_mode<synchronous>, transform_indices = @transform_15, window_bounds = array<i64: 96, 16>}, {pipeline_mode = #tpu.pipeline_mode<synchronous>, transform_indices = @transform_16, window_bounds = array<i64: 1, 16>}, {pipeline_mode = #tpu.pipeline_mode<synchronous>, transform_indices = @transform_17, window_bounds = array<i64: 16, 5>}, {pipeline_mode = #tpu.pipeline_mode<synchronous>, transform_indices = @transform_18, window_bounds = array<i64: 1, 5>}, {transform_indices = @transform_19, window_bounds = array<i64: 1, 1, 16>}, {transform_indices = @transform_20, window_bounds = array<i64: 1, 1, 4>}, {transform_indices = @transform_21, window_bounds = array<i64: 1, 1, 1>}]} {
    %c0 = arith.constant 0 : index
    %c0_0 = arith.constant 0 : index
    %c0_1 = arith.constant 0 : index
    %0 = vector.load %arg1[%c0, %c0_0, %c0_1] : memref<1x6x32xf32, #tpu.memory_space<vmem>>, vector<1x6x32xf32>
    %1 = vector.shape_cast %0 : vector<1x6x32xf32> to vector<6x32xf32>
    %c0_2 = arith.constant 0 : index
    %c0_3 = arith.constant 0 : index
    %2 = vector.load %arg2[%c0_2, %c0_3] : memref<32x96xf32, #tpu.memory_space<vmem>>, vector<32x96xf32>
    %cst = arith.constant dense<0.000000e+00> : vector<6x96xf32>
    %3 = tpu.matmul %1, %2, %cst {dimension_numbers = #tpu.dot_dimension_numbers<[1], [0], [0], [1], [0, 0, 1, 1], [], []>} : vector<6x32xf32>, vector<32x96xf32>, vector<6x96xf32> -> vector<6x96xf32>
    %c0_4 = arith.constant 0 : index
    %c0_5 = arith.constant 0 : index
    %4 = vector.load %arg3[%c0_4, %c0_5] : memref<1x96xf32, #tpu.memory_space<vmem>>, vector<1x96xf32>
    %5 = vector.broadcast %4 : vector<1x96xf32> to vector<6x96xf32>
    %6 = arith.addf %3, %5 : vector<6x96xf32>
    %7 = vector.extract_strided_slice %6 {offsets = [0, 0], sizes = [6, 16], strides = [1, 1]} : vector<6x96xf32> to vector<6x16xf32>
    %cst_6 = arith.constant 2.500000e-01 : f32
    %8 = vector.broadcast %cst_6 : f32 to vector<6x16xf32>
    %9 = arith.mulf %7, %8 : vector<6x16xf32>
    %10 = vector.extract_strided_slice %6 {offsets = [0, 32], sizes = [6, 16], strides = [1, 1]} : vector<6x96xf32> to vector<6x16xf32>
    %11 = vector.extract_strided_slice %6 {offsets = [0, 64], sizes = [6, 16], strides = [1, 1]} : vector<6x96xf32> to vector<6x16xf32>
    %cst_7 = arith.constant dense<0.000000e+00> : vector<6x6xf32>
    %12 = tpu.matmul %9, %10, %cst_7 {dimension_numbers = #tpu.dot_dimension_numbers<[1], [1], [0], [0], [0, 0, 1, 0], [], []>} : vector<6x16xf32>, vector<6x16xf32>, vector<6x6xf32> -> vector<6x6xf32>
    %cst_8 = arith.constant dense<0xFF800000> : vector<6xf32>
    %13 = vector.multi_reduction <maximumf>, %12, %cst_8 [1] : vector<6x6xf32> to vector<6xf32>
    %14 = vector.shape_cast %13 : vector<6xf32> to vector<6x1xf32>
    %15 = vector.broadcast %14 : vector<6x1xf32> to vector<6x6xf32>
    %16 = arith.subf %12, %15 : vector<6x6xf32>
    %17 = math.exp %16 : vector<6x6xf32>
    %cst_9 = arith.constant dense<0.000000e+00> : vector<6xf32>
    %18 = vector.multi_reduction <add>, %17, %cst_9 [1] : vector<6x6xf32> to vector<6xf32>
    %19 = vector.shape_cast %18 : vector<6xf32> to vector<6x1xf32>
    %20 = tpu.reciprocal %19 {approx = true} : vector<6x1xf32> -> vector<6x1xf32>
    %21 = vector.broadcast %20 : vector<6x1xf32> to vector<6x6xf32>
    %22 = arith.mulf %17, %21 : vector<6x6xf32>
    %cst_10 = arith.constant dense<0.000000e+00> : vector<6x16xf32>
    %23 = tpu.matmul %22, %11, %cst_10 {dimension_numbers = #tpu.dot_dimension_numbers<[1], [0], [0], [1], [0, 0, 1, 1], [], []>} : vector<6x6xf32>, vector<6x16xf32>, vector<6x16xf32> -> vector<6x16xf32>
    %24 = vector.extract_strided_slice %6 {offsets = [0, 16], sizes = [6, 16], strides = [1, 1]} : vector<6x96xf32> to vector<6x16xf32>
    %cst_11 = arith.constant 2.500000e-01 : f32
    %25 = vector.broadcast %cst_11 : f32 to vector<6x16xf32>
    %26 = arith.mulf %24, %25 : vector<6x16xf32>
    %27 = vector.extract_strided_slice %6 {offsets = [0, 48], sizes = [6, 16], strides = [1, 1]} : vector<6x96xf32> to vector<6x16xf32>
    %28 = vector.extract_strided_slice %6 {offsets = [0, 80], sizes = [6, 16], strides = [1, 1]} : vector<6x96xf32> to vector<6x16xf32>
    %cst_12 = arith.constant dense<0.000000e+00> : vector<6x6xf32>
    %29 = tpu.matmul %26, %27, %cst_12 {dimension_numbers = #tpu.dot_dimension_numbers<[1], [1], [0], [0], [0, 0, 1, 0], [], []>} : vector<6x16xf32>, vector<6x16xf32>, vector<6x6xf32> -> vector<6x6xf32>
    %cst_13 = arith.constant dense<0xFF800000> : vector<6xf32>
    %30 = vector.multi_reduction <maximumf>, %29, %cst_13 [1] : vector<6x6xf32> to vector<6xf32>
    %31 = vector.shape_cast %30 : vector<6xf32> to vector<6x1xf32>
    %32 = vector.broadcast %31 : vector<6x1xf32> to vector<6x6xf32>
    %33 = arith.subf %29, %32 : vector<6x6xf32>
    %34 = math.exp %33 : vector<6x6xf32>
    %cst_14 = arith.constant dense<0.000000e+00> : vector<6xf32>
    %35 = vector.multi_reduction <add>, %34, %cst_14 [1] : vector<6x6xf32> to vector<6xf32>
    %36 = vector.shape_cast %35 : vector<6xf32> to vector<6x1xf32>
    %37 = tpu.reciprocal %36 {approx = true} : vector<6x1xf32> -> vector<6x1xf32>
    %38 = vector.broadcast %37 : vector<6x1xf32> to vector<6x6xf32>
    %39 = arith.mulf %34, %38 : vector<6x6xf32>
    %cst_15 = arith.constant dense<0.000000e+00> : vector<6x16xf32>
    %40 = tpu.matmul %39, %28, %cst_15 {dimension_numbers = #tpu.dot_dimension_numbers<[1], [0], [0], [1], [0, 0, 1, 1], [], []>} : vector<6x6xf32>, vector<6x16xf32>, vector<6x16xf32> -> vector<6x16xf32>
    %41 = tpu.concatenate %23, %40 in 1 : vector<6x16xf32>, vector<6x16xf32> -> vector<6x32xf32>
    %c0_16 = arith.constant 0 : index
    %c0_17 = arith.constant 0 : index
    %42 = vector.load %arg4[%c0_16, %c0_17] : memref<32x32xf32, #tpu.memory_space<vmem>>, vector<32x32xf32>
    %cst_18 = arith.constant dense<0.000000e+00> : vector<6x32xf32>
    %43 = tpu.matmul %41, %42, %cst_18 {dimension_numbers = #tpu.dot_dimension_numbers<[1], [0], [0], [1], [0, 0, 1, 1], [], []>} : vector<6x32xf32>, vector<32x32xf32>, vector<6x32xf32> -> vector<6x32xf32>
    %c0_19 = arith.constant 0 : index
    %c0_20 = arith.constant 0 : index
    %44 = vector.load %arg5[%c0_19, %c0_20] : memref<1x32xf32, #tpu.memory_space<vmem>>, vector<1x32xf32>
    %45 = vector.broadcast %44 : vector<1x32xf32> to vector<6x32xf32>
    %46 = arith.addf %43, %45 : vector<6x32xf32>
    %47 = arith.addf %1, %46 : vector<6x32xf32>
    %c0_21 = arith.constant 0 : index
    %c0_22 = arith.constant 0 : index
    %48 = vector.load %arg6[%c0_21, %c0_22] : memref<1x32xf32, #tpu.memory_space<vmem>>, vector<1x32xf32>
    %c0_23 = arith.constant 0 : index
    %c0_24 = arith.constant 0 : index
    %49 = vector.load %arg7[%c0_23, %c0_24] : memref<1x32xf32, #tpu.memory_space<vmem>>, vector<1x32xf32>
    %cst_25 = arith.constant dense<0.000000e+00> : vector<6xf32>
    %50 = vector.multi_reduction <add>, %47, %cst_25 [1] : vector<6x32xf32> to vector<6xf32>
    %51 = vector.shape_cast %50 : vector<6xf32> to vector<6x1xf32>
    %cst_26 = arith.constant 3.200000e+01 : f32
    %52 = vector.broadcast %cst_26 : f32 to vector<6x1xf32>
    %53 = arith.divf %51, %52 : vector<6x1xf32>
    %54 = vector.broadcast %53 : vector<6x1xf32> to vector<6x32xf32>
    %55 = arith.subf %47, %54 : vector<6x32xf32>
    %56 = arith.mulf %55, %55 : vector<6x32xf32>
    %cst_27 = arith.constant dense<0.000000e+00> : vector<6xf32>
    %57 = vector.multi_reduction <add>, %56, %cst_27 [1] : vector<6x32xf32> to vector<6xf32>
    %58 = vector.shape_cast %57 : vector<6xf32> to vector<6x1xf32>
    %cst_28 = arith.constant 3.200000e+01 : f32
    %59 = vector.broadcast %cst_28 : f32 to vector<6x1xf32>
    %60 = arith.divf %58, %59 : vector<6x1xf32>
    %61 = vector.broadcast %53 : vector<6x1xf32> to vector<6x32xf32>
    %62 = arith.subf %47, %61 : vector<6x32xf32>
    %cst_29 = arith.constant 9.99999974E-6 : f32
    %63 = vector.broadcast %cst_29 : f32 to vector<6x1xf32>
    %64 = arith.addf %60, %63 : vector<6x1xf32>
    %65 = math.rsqrt %64 : vector<6x1xf32>
    %66 = vector.broadcast %65 : vector<6x1xf32> to vector<6x32xf32>
    %67 = arith.mulf %62, %66 : vector<6x32xf32>
    %68 = vector.broadcast %48 : vector<1x32xf32> to vector<6x32xf32>
    %69 = arith.mulf %67, %68 : vector<6x32xf32>
    %70 = vector.broadcast %49 : vector<1x32xf32> to vector<6x32xf32>
    %71 = arith.addf %69, %70 : vector<6x32xf32>
    %72 = arith.truncf %71 : vector<6x32xf32> to vector<6x32xbf16>
    %c0_30 = arith.constant 0 : index
    %c0_31 = arith.constant 0 : index
    %73 = vector.load %arg8[%c0_30, %c0_31] : memref<32x2048xbf16, #tpu.memory_space<vmem>>, vector<32x2048xbf16>
    %cst_32 = arith.constant dense<0.000000e+00> : vector<6x2048xf32>
    %74 = tpu.matmul %72, %73, %cst_32 {dimension_numbers = #tpu.dot_dimension_numbers<[1], [0], [0], [1], [0, 0, 1, 1], [], []>} : vector<6x32xbf16>, vector<32x2048xbf16>, vector<6x2048xf32> -> vector<6x2048xf32>
    %c0_33 = arith.constant 0 : index
    %c0_34 = arith.constant 0 : index
    %75 = vector.load %arg9[%c0_33, %c0_34] : memref<1x2048xf32, #tpu.memory_space<vmem>>, vector<1x2048xf32>
    %76 = vector.broadcast %75 : vector<1x2048xf32> to vector<6x2048xf32>
    %77 = arith.addf %74, %76 : vector<6x2048xf32>
    %cst_35 = arith.constant 0.000000e+00 : f32
    %78 = vector.broadcast %cst_35 : f32 to vector<6x2048xf32>
    %79 = arith.maximumf %77, %78 : vector<6x2048xf32>
    %80 = arith.truncf %79 : vector<6x2048xf32> to vector<6x2048xbf16>
    %c0_36 = arith.constant 0 : index
    %c0_37 = arith.constant 0 : index
    %81 = vector.load %arg10[%c0_36, %c0_37] : memref<2048x32xbf16, #tpu.memory_space<vmem>>, vector<2048x32xbf16>
    %cst_38 = arith.constant dense<0.000000e+00> : vector<6x32xf32>
    %82 = tpu.matmul %80, %81, %cst_38 {dimension_numbers = #tpu.dot_dimension_numbers<[1], [0], [0], [1], [0, 0, 1, 1], [], []>} : vector<6x2048xbf16>, vector<2048x32xbf16>, vector<6x32xf32> -> vector<6x32xf32>
    %c0_39 = arith.constant 0 : index
    %c0_40 = arith.constant 0 : index
    %83 = vector.load %arg11[%c0_39, %c0_40] : memref<1x32xf32, #tpu.memory_space<vmem>>, vector<1x32xf32>
    %84 = vector.broadcast %83 : vector<1x32xf32> to vector<6x32xf32>
    %85 = arith.addf %82, %84 : vector<6x32xf32>
    %86 = arith.addf %71, %85 : vector<6x32xf32>
    %c0_41 = arith.constant 0 : index
    %c0_42 = arith.constant 0 : index
    %87 = vector.load %arg12[%c0_41, %c0_42] : memref<1x32xf32, #tpu.memory_space<vmem>>, vector<1x32xf32>
    %c0_43 = arith.constant 0 : index
    %c0_44 = arith.constant 0 : index
    %88 = vector.load %arg13[%c0_43, %c0_44] : memref<1x32xf32, #tpu.memory_space<vmem>>, vector<1x32xf32>
    %cst_45 = arith.constant dense<0.000000e+00> : vector<6xf32>
    %89 = vector.multi_reduction <add>, %86, %cst_45 [1] : vector<6x32xf32> to vector<6xf32>
    %90 = vector.shape_cast %89 : vector<6xf32> to vector<6x1xf32>
    %cst_46 = arith.constant 3.200000e+01 : f32
    %91 = vector.broadcast %cst_46 : f32 to vector<6x1xf32>
    %92 = arith.divf %90, %91 : vector<6x1xf32>
    %93 = vector.broadcast %92 : vector<6x1xf32> to vector<6x32xf32>
    %94 = arith.subf %86, %93 : vector<6x32xf32>
    %95 = arith.mulf %94, %94 : vector<6x32xf32>
    %cst_47 = arith.constant dense<0.000000e+00> : vector<6xf32>
    %96 = vector.multi_reduction <add>, %95, %cst_47 [1] : vector<6x32xf32> to vector<6xf32>
    %97 = vector.shape_cast %96 : vector<6xf32> to vector<6x1xf32>
    %cst_48 = arith.constant 3.200000e+01 : f32
    %98 = vector.broadcast %cst_48 : f32 to vector<6x1xf32>
    %99 = arith.divf %97, %98 : vector<6x1xf32>
    %100 = vector.broadcast %92 : vector<6x1xf32> to vector<6x32xf32>
    %101 = arith.subf %86, %100 : vector<6x32xf32>
    %cst_49 = arith.constant 9.99999974E-6 : f32
    %102 = vector.broadcast %cst_49 : f32 to vector<6x1xf32>
    %103 = arith.addf %99, %102 : vector<6x1xf32>
    %104 = math.rsqrt %103 : vector<6x1xf32>
    %105 = vector.broadcast %104 : vector<6x1xf32> to vector<6x32xf32>
    %106 = arith.mulf %101, %105 : vector<6x32xf32>
    %107 = vector.broadcast %87 : vector<1x32xf32> to vector<6x32xf32>
    %108 = arith.mulf %106, %107 : vector<6x32xf32>
    %109 = vector.broadcast %88 : vector<1x32xf32> to vector<6x32xf32>
    %110 = arith.addf %108, %109 : vector<6x32xf32>
    %111 = vector.extract_strided_slice %110 {offsets = [0, 0], sizes = [1, 32], strides = [1, 1]} : vector<6x32xf32> to vector<1x32xf32>
    %112 = vector.extract_strided_slice %110 {offsets = [1, 0], sizes = [1, 32], strides = [1, 1]} : vector<6x32xf32> to vector<1x32xf32>
    %113 = vector.extract_strided_slice %110 {offsets = [2, 0], sizes = [1, 32], strides = [1, 1]} : vector<6x32xf32> to vector<1x32xf32>
    %114 = vector.extract_strided_slice %110 {offsets = [3, 0], sizes = [1, 32], strides = [1, 1]} : vector<6x32xf32> to vector<1x32xf32>
    %115 = vector.extract_strided_slice %110 {offsets = [4, 0], sizes = [1, 32], strides = [1, 1]} : vector<6x32xf32> to vector<1x32xf32>
    %116 = vector.extract_strided_slice %110 {offsets = [5, 0], sizes = [1, 32], strides = [1, 1]} : vector<6x32xf32> to vector<1x32xf32>
    %117 = tpu.concatenate %111, %112, %113, %114, %115, %116 in 1 : vector<1x32xf32>, vector<1x32xf32>, vector<1x32xf32>, vector<1x32xf32>, vector<1x32xf32>, vector<1x32xf32> -> vector<1x192xf32>
    %c0_50 = arith.constant 0 : index
    %c0_51 = arith.constant 0 : index
    %118 = vector.load %arg14[%c0_50, %c0_51] : memref<192x96xf32, #tpu.memory_space<vmem>>, vector<192x96xf32>
    %cst_52 = arith.constant dense<0.000000e+00> : vector<1x96xf32>
    %119 = tpu.matmul %117, %118, %cst_52 {dimension_numbers = #tpu.dot_dimension_numbers<[1], [0], [0], [1], [0, 0, 1, 1], [], []>} : vector<1x192xf32>, vector<192x96xf32>, vector<1x96xf32> -> vector<1x96xf32>
    %c0_53 = arith.constant 0 : index
    %c0_54 = arith.constant 0 : index
    %120 = vector.load %arg15[%c0_53, %c0_54] : memref<1x96xf32, #tpu.memory_space<vmem>>, vector<1x96xf32>
    %121 = arith.addf %119, %120 : vector<1x96xf32>
    %cst_55 = arith.constant 0.000000e+00 : f32
    %122 = vector.broadcast %cst_55 : f32 to vector<1x96xf32>
    %123 = arith.maximumf %121, %122 : vector<1x96xf32>
    %c0_56 = arith.constant 0 : index
    %c0_57 = arith.constant 0 : index
    %124 = vector.load %arg16[%c0_56, %c0_57] : memref<96x16xf32, #tpu.memory_space<vmem>>, vector<96x16xf32>
    %cst_58 = arith.constant dense<0.000000e+00> : vector<1x16xf32>
    %125 = tpu.matmul %123, %124, %cst_58 {dimension_numbers = #tpu.dot_dimension_numbers<[1], [0], [0], [1], [0, 0, 1, 1], [], []>} : vector<1x96xf32>, vector<96x16xf32>, vector<1x16xf32> -> vector<1x16xf32>
    %c0_59 = arith.constant 0 : index
    %c0_60 = arith.constant 0 : index
    %126 = vector.load %arg17[%c0_59, %c0_60] : memref<1x16xf32, #tpu.memory_space<vmem>>, vector<1x16xf32>
    %127 = arith.addf %125, %126 : vector<1x16xf32>
    %c0_61 = arith.constant 0 : index
    %c0_62 = arith.constant 0 : index
    %128 = vector.load %arg18[%c0_61, %c0_62] : memref<16x5xf32, #tpu.memory_space<vmem>>, vector<16x5xf32>
    %cst_63 = arith.constant dense<0.000000e+00> : vector<1x5xf32>
    %129 = tpu.matmul %127, %128, %cst_63 {dimension_numbers = #tpu.dot_dimension_numbers<[1], [0], [0], [1], [0, 0, 1, 1], [], []>} : vector<1x16xf32>, vector<16x5xf32>, vector<1x5xf32> -> vector<1x5xf32>
    %c0_64 = arith.constant 0 : index
    %c0_65 = arith.constant 0 : index
    %130 = vector.load %arg19[%c0_64, %c0_65] : memref<1x5xf32, #tpu.memory_space<vmem>>, vector<1x5xf32>
    %131 = arith.addf %129, %130 : vector<1x5xf32>
    %c0_66 = arith.constant 0 : index
    %c0_67 = arith.constant 0 : index
    %c0_68 = arith.constant 0 : index
    %132 = vector.load %arg20[%c0_66, %c0_67, %c0_68] : memref<1x1x16xf32, #tpu.memory_space<vmem>>, vector<1x1x16xf32>
    %133 = vector.shape_cast %132 : vector<1x1x16xf32> to vector<1x16xf32>
    %134 = vector.shape_cast %127 : vector<1x16xf32> to vector<1x1x16xf32>
    tpu.vector_store %arg20[%c0_66, %c0_67, %c0_68], %134 {strides = array<i32>} : memref<1x1x16xf32, #tpu.memory_space<vmem>>, vector<1x1x16xf32>,
    %135 = vector.extract_strided_slice %131 {offsets = [0, 0], sizes = [1, 4], strides = [1, 1]} : vector<1x5xf32> to vector<1x4xf32>
    %c0_69 = arith.constant 0 : index
    %c0_70 = arith.constant 0 : index
    %c0_71 = arith.constant 0 : index
    %136 = vector.load %arg21[%c0_69, %c0_70, %c0_71] : memref<1x1x4xf32, #tpu.memory_space<vmem>>, vector<1x1x4xf32>
    %137 = vector.shape_cast %136 : vector<1x1x4xf32> to vector<1x4xf32>
    %138 = vector.shape_cast %135 : vector<1x4xf32> to vector<1x1x4xf32>
    tpu.vector_store %arg21[%c0_69, %c0_70, %c0_71], %138 {strides = array<i32>} : memref<1x1x4xf32, #tpu.memory_space<vmem>>, vector<1x1x4xf32>,
    %139 = vector.extract_strided_slice %131 {offsets = [0, 4], sizes = [1, 1], strides = [1, 1]} : vector<1x5xf32> to vector<1x1xf32>
    %c0_72 = arith.constant 0 : index
    %c0_73 = arith.constant 0 : index
    %c0_74 = arith.constant 0 : index
    %140 = vector.load %arg22[%c0_72, %c0_73, %c0_74] : memref<1x1x1xf32, #tpu.memory_space<vmem>>, vector<1x1x1xf32>
    %141 = vector.shape_cast %140 : vector<1x1x1xf32> to vector<1x1xf32>
    %142 = vector.shape_cast %139 : vector<1x1xf32> to vector<1x1x1xf32>
    tpu.vector_store %arg22[%c0_72, %c0_73, %c0_74], %142 {strides = array<i32>} : memref<1x1x1xf32, #tpu.memory_space<vmem>>, vector<1x1x1xf32>,
    return
  }
  func.func @transform_0(%arg0: i32) -> (i32, i32, i32) {
    %c0_i32 = arith.constant 0 : i32
    %c0_i32_0 = arith.constant 0 : i32
    %c0_i32_1 = arith.constant 0 : i32
    return %arg0, %c0_i32, %c0_i32_0 : i32, i32, i32
  }
  func.func @transform_1(%arg0: i32) -> (i32, i32) {
    %c0_i32 = arith.constant 0 : i32
    %c0_i32_0 = arith.constant 0 : i32
    %c0_i32_1 = arith.constant 0 : i32
    return %c0_i32, %c0_i32_0 : i32, i32
  }
  func.func @transform_2(%arg0: i32) -> (i32, i32) {
    %c0_i32 = arith.constant 0 : i32
    %c0_i32_0 = arith.constant 0 : i32
    %c0_i32_1 = arith.constant 0 : i32
    return %c0_i32, %c0_i32_0 : i32, i32
  }
  func.func @transform_3(%arg0: i32) -> (i32, i32) {
    %c0_i32 = arith.constant 0 : i32
    %c0_i32_0 = arith.constant 0 : i32
    %c0_i32_1 = arith.constant 0 : i32
    return %c0_i32, %c0_i32_0 : i32, i32
  }
  func.func @transform_4(%arg0: i32) -> (i32, i32) {
    %c0_i32 = arith.constant 0 : i32
    %c0_i32_0 = arith.constant 0 : i32
    %c0_i32_1 = arith.constant 0 : i32
    return %c0_i32, %c0_i32_0 : i32, i32
  }
  func.func @transform_5(%arg0: i32) -> (i32, i32) {
    %c0_i32 = arith.constant 0 : i32
    %c0_i32_0 = arith.constant 0 : i32
    %c0_i32_1 = arith.constant 0 : i32
    return %c0_i32, %c0_i32_0 : i32, i32
  }
  func.func @transform_6(%arg0: i32) -> (i32, i32) {
    %c0_i32 = arith.constant 0 : i32
    %c0_i32_0 = arith.constant 0 : i32
    %c0_i32_1 = arith.constant 0 : i32
    return %c0_i32, %c0_i32_0 : i32, i32
  }
  func.func @transform_7(%arg0: i32) -> (i32, i32) {
    %c0_i32 = arith.constant 0 : i32
    %c0_i32_0 = arith.constant 0 : i32
    %c0_i32_1 = arith.constant 0 : i32
    return %c0_i32, %c0_i32_0 : i32, i32
  }
  func.func @transform_8(%arg0: i32) -> (i32, i32) {
    %c0_i32 = arith.constant 0 : i32
    %c0_i32_0 = arith.constant 0 : i32
    %c0_i32_1 = arith.constant 0 : i32
    return %c0_i32, %c0_i32_0 : i32, i32
  }
  func.func @transform_9(%arg0: i32) -> (i32, i32) {
    %c0_i32 = arith.constant 0 : i32
    %c0_i32_0 = arith.constant 0 : i32
    %c0_i32_1 = arith.constant 0 : i32
    return %c0_i32, %c0_i32_0 : i32, i32
  }
  func.func @transform_10(%arg0: i32) -> (i32, i32) {
    %c0_i32 = arith.constant 0 : i32
    %c0_i32_0 = arith.constant 0 : i32
    %c0_i32_1 = arith.constant 0 : i32
    return %c0_i32, %c0_i32_0 : i32, i32
  }
  func.func @transform_11(%arg0: i32) -> (i32, i32) {
    %c0_i32 = arith.constant 0 : i32
    %c0_i32_0 = arith.constant 0 : i32
    %c0_i32_1 = arith.constant 0 : i32
    return %c0_i32, %c0_i32_0 : i32, i32
  }
  func.func @transform_12(%arg0: i32) -> (i32, i32) {
    %c0_i32 = arith.constant 0 : i32
    %c0_i32_0 = arith.constant 0 : i32
    %c0_i32_1 = arith.constant 0 : i32
    return %c0_i32, %c0_i32_0 : i32, i32
  }
  func.func @transform_13(%arg0: i32) -> (i32, i32) {
    %c0_i32 = arith.constant 0 : i32
    %c0_i32_0 = arith.constant 0 : i32
    %c0_i32_1 = arith.constant 0 : i32
    return %c0_i32, %c0_i32_0 : i32, i32
  }
  func.func @transform_14(%arg0: i32) -> (i32, i32) {
    %c0_i32 = arith.constant 0 : i32
    %c0_i32_0 = arith.constant 0 : i32
    %c0_i32_1 = arith.constant 0 : i32
    return %c0_i32, %c0_i32_0 : i32, i32
  }
  func.func @transform_15(%arg0: i32) -> (i32, i32) {
    %c0_i32 = arith.constant 0 : i32
    %c0_i32_0 = arith.constant 0 : i32
    %c0_i32_1 = arith.constant 0 : i32
    return %c0_i32, %c0_i32_0 : i32, i32
  }
  func.func @transform_16(%arg0: i32) -> (i32, i32) {
    %c0_i32 = arith.constant 0 : i32
    %c0_i32_0 = arith.constant 0 : i32
    %c0_i32_1 = arith.constant 0 : i32
    return %c0_i32, %c0_i32_0 : i32, i32
  }
  func.func @transform_17(%arg0: i32) -> (i32, i32) {
    %c0_i32 = arith.constant 0 : i32
    %c0_i32_0 = arith.constant 0 : i32
    %c0_i32_1 = arith.constant 0 : i32
    return %c0_i32, %c0_i32_0 : i32, i32
  }
  func.func @transform_18(%arg0: i32) -> (i32, i32) {
    %c0_i32 = arith.constant 0 : i32
    %c0_i32_0 = arith.constant 0 : i32
    %c0_i32_1 = arith.constant 0 : i32
    return %c0_i32, %c0_i32_0 : i32, i32
  }
  func.func @transform_19(%arg0: i32) -> (i32, i32, i32) {
    %c0_i32 = arith.constant 0 : i32
    %c0_i32_0 = arith.constant 0 : i32
    %c0_i32_1 = arith.constant 0 : i32
    return %arg0, %c0_i32, %c0_i32_0 : i32, i32, i32
  }
  func.func @transform_20(%arg0: i32) -> (i32, i32, i32) {
    %c0_i32 = arith.constant 0 : i32
    %c0_i32_0 = arith.constant 0 : i32
    %c0_i32_1 = arith.constant 0 : i32
    return %arg0, %c0_i32, %c0_i32_0 : i32, i32, i32
  }
  func.func @transform_21(%arg0: i32) -> (i32, i32, i32) {
    %c0_i32 = arith.constant 0 : i32
    %c0_i32_0 = arith.constant 0 : i32
    %c0_i32_1 = arith.constant 0 : i32
    return %arg0, %c0_i32, %c0_i32_0 : i32, i32, i32
  }
}

</mosaic_0001>

<bundles_post_ra>
// kernel: misa_forward.5
= control target key start
LH: loop header
LB: loop body
LE: loop exit
PB: predicated region body
PF: predicated region fallthrough
CT: control target
= control target key end

     0   :  { %vm447_vm0 = vcmask 781824   ;;  %vm16_vm1 = vcmask 257024   ;;  %vm27_vm2 = vcmask 1044224   ;;  %s2111_s0 = inlined_call_operand.vmem [shape: f32[4,192], index: 0, kind: input, shape index: {}]   ;;  %s2112_s1 = inlined_call_operand.vmem [shape: f32[4,192], index: 1, kind: input, shape index: {}]   ;;  %s2113_s2 = inlined_call_operand.hbm [shape: f32[1,1], index: 2, kind: output, shape index: {}]  }
   0x1   :  { %v1707_v0 = vld [vmem:[%s2111_s0] sm:$0xf]  ;;  %v1715_v5 = vld [vmem:[%s2111_s0 + $0x4] sm:$0xf] }
   0x2   :  { %v448_v1 = vsel %vm447_vm0, %v1707_v0, 0.0  ;;  %v17_v2 = vsel %vm16_vm1, %v1707_v0, 0.0  ;;  %v28_v6 = vsel %vm27_vm2, %v1707_v0, 0.0  ;;  %v243_v7 = vsel %vm16_vm1, %v1715_v5, 0.0 }
   0x3   :  { %v449_v3 = vrot.slane %v448_v1, 4  ;;  %v18_v4 = vrot.slane %v17_v2, 4 }
   0x4   :  { %7 = vsyncpa [#allocation3], 0  ;;  %vm233_vm3 = vcmask 519424   ;;  %v244_v10 = vrot.slane %v243_v7, 4  ;;  %v29_v14 = vrot.slane %v28_v6, 4  ;;  %s1685_s0 = smov 64  }
   0x5   :  { %v450_v8 = vadd.f32 %v449_v3, %v448_v1  ;;  %v19_v9 = vadd.f32 %v18_v4, %v17_v2  ;;  %v234_v15 = vsel %vm233_vm3, %v1707_v0, 0.0  ;;  %v457_v27 = vsel %vm233_vm3, %v1715_v5, 0.0  ;;  %s1686_s13 = smov 32   ;;  %s1687_s14 = smov 96  }
   0x6   :  { %v245_v13 = vadd.f32 %v244_v10, %v243_v7  ;;  %v235_v21 = vrot.slane %v234_v15, 4  ;;  %v30_v23 = vadd.f32 %v29_v14, %v28_v6  ;;  %v458_v33 = vrot.slane %v457_v27, 4 }
   0x7   :  { %v451_v11 = vrot.slane %v450_v8, 2  ;;  %v20_v12 = vrot.slane %v19_v9, 2  ;;  %vm117_vm8 = vcmask 1043456   ;;  %vm1018_vm9 = vcmask 253952  }
   0x8   :  { %v246_v18 = vrot.slane %v245_v13, 2  ;;  %v236_v30 = vadd.f32 %v235_v21, %v234_v15  ;;  %v31_v32 = vrot.slane %v30_v23, 2  ;;  %v459_v41 = vadd.f32 %v458_v33, %v457_v27 }
   0x9   :  { %v452_v16 = vadd.f32 %v451_v11, %v450_v8  ;;  %v21_v17 = vadd.f32 %v20_v12, %v19_v9 }
   0xa   :  { %v247_v22 = vadd.f32 %v246_v18, %v245_v13  ;;  %v237_v38 = vrot.slane %v236_v30, 2  ;;  %v32_v40 = vadd.f32 %v31_v32, %v30_v23  ;;  %v460_v46 = vrot.slane %v459_v41, 2 }
   0xb   :  { %v453_v19 = vrot.slane %v452_v16, 1  ;;  %v22_v20 = vrot.slane %v21_v17, 1 }
   0xc   :  { %v248_v26 = vrot.slane %v247_v22, 1  ;;  %v238_v43 = vadd.f32 %v237_v38, %v236_v30  ;;  %v33_v45 = vrot.slane %v32_v40, 1  ;;  %v461_v50 = vadd.f32 %v460_v46, %v459_v41 }
   0xd   :  { %v454_v24 = vadd.f32 %v453_v19, %v452_v16  ;;  %v23_v25 = vadd.f32 %v22_v20, %v21_v17 }
   0xe   :  { %v249_v31 = vadd.f32 %v248_v26, %v247_v22  ;;  %v239_v47 = vrot.slane %v238_v43, 1  ;;  %v34_v49 = vadd.f32 %v33_v45, %v32_v40  ;;  %v462_v56 = vrot.slane %v461_v50, 1 }
   0xf   :  { %v455_v28 = vmul.f32 0.25, %v454_v24  ;;  %v25_v29 = vmul.f32 0.25, %v23_v25 }
  0x10   :  { %v1735_v39 = vmul.f32 0.25, %v249_v31  ;;  %v240_v52 = vadd.f32 %v239_v47, %v238_v43  ;;  %v1748_v54 = vmul.f32 0.25, %v34_v49  ;;  %v463_v61 = vadd.f32 %v462_v56, %v461_v50 }
  0x11   :  { %v1726_v34 = vsub.f32 %v1707_v0, %v455_v28  ;;  %v1729_v35 = vsub.f32 %v1707_v0, %v25_v29 }
  0x12   :  { %v1741_v44 = vsub.f32 %v1715_v5, %v1735_v39  ;;  %v241_v58 = vmul.f32 0.25, %v240_v52  ;;  %v1754_v59 = vsub.f32 %v1707_v0, %v1748_v54  ;;  %v1762_v4 = vmul.f32 0.25, %v463_v61 }
  0x13   :  { %v466_v36 = vmul.f32 %v1726_v34, %v1726_v34  ;;  %v37_v37 = vmul.f32 %v1729_v35, %v1729_v35 }
  0x14   :  { %v270_v48 = vmul.f32 %v1741_v44, %v1741_v44  ;;  %v1757_v63 = vsub.f32 %v1707_v0, %v241_v58  ;;  %v51_v2 = vmul.f32 %v1754_v59, %v1754_v59  ;;  %v1770_v0 = vsub.f32 %v1715_v5, %v1762_v4 }
  0x15   :  { %468 = vrot.lane.b32.xlu1 %v466_v36, %s1685_s0  ;;  %v38_v42 = vsel %vm16_vm1, %v37_v37, 0.0 }
  0x16   :  { %39 = vadd.xlane.f32.xlu0 %v38_v42  ;;  %v1745_v51 = vmul.f32 %v270_v48, %v270_v48  ;;  %v271_v53 = vsel %vm16_vm1, %v270_v48, 0.0  ;;  %v1074_v1 = vmul.f32 %v270_v48, %v1741_v44  ;;  %v252_v8 = vmul.f32 %v1757_v63, %v1757_v63 }
  0x17   :  { %v1037_v55 = vrot.slane %v271_v53, 4  ;;  %v1775_v12 = vmul.f32 %v1770_v0, %v1770_v0  ;;  %v1029_v25 = vsel %vm27_vm2, %v51_v2, 0.0  ;;  %v1065_v31 = vmul.f32 %v51_v2, %v1754_v59 }
  0x18   :  { %v1114_v57 = vsel %vm16_vm1, %v1745_v51, 0.0  ;;  %v1075_v7 = vsel %vm16_vm1, %v1074_v1, 0.0  ;;  %v1030_v26 = vrot.slane %v1029_v25, 4  ;;  %v1797_v32 = vmul.f32 %v51_v2, %v51_v2 }
  0x19   :  { %v1038_v60 = vadd.f32 %v1037_v55, %v271_v53  ;;  %v1115_v62 = vrot.slane %v1114_v57, 4  ;;  %v1076_v11 = vrot.slane %v1075_v7, 4  ;;  %v1066_v38 = vsel %vm27_vm2, %v1065_v31, 0.0 }
  0x1a   :  { %v1031_v28 = vadd.f32 %v1030_v26, %v1029_v25  ;;  %v1105_v40 = vsel %vm27_vm2, %v1797_v32, 0.0  ;;  %v1067_v43 = vrot.slane %v1066_v38, 4 }
  0x1b   :  { %v1039_v3 = vrot.slane %v1038_v60, 2  ;;  %v1116_v6 = vadd.f32 %v1115_v62, %v1114_v57  ;;  %v1077_v15 = vadd.f32 %v1076_v11, %v1075_v7  ;;  %v1106_v45 = vrot.slane %v1105_v40, 4 }
  0x1c   :  { %v1032_v30 = vrot.slane %v1031_v28, 2  ;;  %v1068_v48 = vadd.f32 %v1067_v43, %v1066_v38 }
  0x1d   :  { %v1040_v9 = vadd.f32 %v1039_v3, %v1038_v60  ;;  %v1117_v10 = vrot.slane %v1116_v6, 2  ;;  %v1078_v18 = vrot.slane %v1077_v15, 2  ;;  %v1107_v49 = vadd.f32 %v1106_v45, %v1105_v40 }
  0x1e   :  { %v1033_v36 = vadd.f32 %v1032_v30, %v1031_v28  ;;  %v1069_v55 = vrot.slane %v1068_v48, 2 }
  0x1f   :  { %v1041_v13 = vrot.slane %v1040_v9, 1  ;;  %v1118_v14 = vadd.f32 %v1117_v10, %v1116_v6  ;;  %v1079_v20 = vadd.f32 %v1078_v18, %v1077_v15  ;;  %v1108_v56 = vrot.slane %v1107_v49, 2 }
  0x20   :  { %v1034_v42 = vrot.slane %v1033_v36, 1  ;;  %v1070_v60 = vadd.f32 %v1069_v55, %v1068_v48 }
  0x21   :  { %v1042_v16 = vadd.f32 %v1041_v13, %v1040_v9  ;;  %v1119_v17 = vrot.slane %v1118_v14, 1  ;;  %v1080_v22 = vrot.slane %v1079_v20, 1  ;;  %v1109_v61 = vadd.f32 %v1108_v56, %v1107_v49 }
  0x22   :  { %v1035_v47 = vadd.f32 %v1034_v42, %v1033_v36  ;;  %v1071_v1 = vrot.slane %v1070_v60, 1 }
  0x23   :  { %v1781_v5 = vmul.f32 0.25, %v1042_v16  ;;  %v1120_v19 = vadd.f32 %v1119_v17, %v1118_v14  ;;  %v1081_v23 = vadd.f32 %v1080_v22, %v1079_v20 }
  0x24   :  { %v1072_v6 = vadd.f32 %v1071_v1, %v1070_v60 }
  0x25   :  { %v1785_v21 = vmul.f32 0.25, %v1120_v19  ;;  %v1789_v24 = vmul.f32 0.25, %v1081_v23  ;;  %v1152_v23 = vmul.f32 %v1745_v51, %v1741_v44 }
  0x26   :  { %v1811_v9 = vmul.f32 0.25, %v1072_v6 }
  0x2c   :  { %53 = vrot.lane.b32.xlu0 %v51_v2, %s1686_s13  ;;  %v1110_v2 = vrot.slane %v1109_v61, 1 }
  0x2e   :  { %v1111_v7 = vadd.f32 %v1110_v2, %v1109_v61 }
  0x30   :  { %254 = vrot.lane.b32.xlu0 %v252_v8, %s1687_s14  ;;  %v1813_v10 = vmul.f32 0.25, %v1111_v7  ;;  %v1143_v7 = vmul.f32 %v1797_v32, %v1754_v59 }
  0x34   :  { %486 = vrot.lane.b32.xlu0 %v1775_v12, %s1687_s14 }
  0x38   :  { %1009 = vrot.lane.b32.xlu0 %v1735_v39, %s1687_s14 }
  0x39   :  { %272 = vadd.xlane.f32.xlu1 %v271_v53  ;;  %v1806_v53 = vmul.f32 0.25, %v1035_v47 }
  0x3c   :  { %1045 = vrot.lane.b32.xlu0 %v1781_v5, %s1687_s14 }
  0x40   :  { %1123 = vrot.lane.b32.xlu0 %v1785_v21, %s1687_s14 }
  0x4a   :  { %1084 = vrot.lane.b32.xlu1 %v1789_v24, %s1687_s14 }
  0x87   :  { %v469_v3 = vpop.permute.xlu1 %468 }
  0x88   :  { %v471_v42 = vsel %vm16_vm1, %v469_v3, 0.0 }
  0x9f   :  { %v40_v27 = vpop.xlane.xlu0 %39 }
  0xa0   :  { %1609 = vrsqrt.f32 %v40_v27  ;;  %vm43_vm4 = vcmp.eq.f32.partialorder %v40_v27, inf  ;;  %v46_v22 = vand.u32 2147483648, %v40_v27  ;;  %vm45_vm5 = vcmp.eq.f32.partialorder %v40_v27, 0.0 }
  0xa3   :  { %v1794_v29 = vpop.permute.xlu0 %53 }
  0xa4   :  { %v56_v51 = vsel %vm16_vm1, %v1794_v29, 0.0 }
  0xa7   :  { %v255_v33 = vpop.permute.xlu0 %254 }
  0xa8   :  { %v257_v37 = vsel %vm16_vm1, %v255_v33, 0.0  ;;  %v1153_v33 = vsel %vm16_vm1, %v1152_v23, 0.0 }
  0xa9   :  { %258 = vadd.xlane.f32.xlu0 %v257_v37  ;;  %v1154_v40 = vrot.slane %v1153_v33, 4 }
  0xab   :  { %v1803_v41 = vpop.permute.xlu0 %486 }
  0xac   :  { %v489_v45 = vsel %vm16_vm1, %v1803_v41, 0.0 }
  0xad   :  { %v1610_v13 = vpop.eup %1609 }
  0xae   :  { %v42_v17 = vmul.f32 %v1610_v13, %v40_v27 }
  0xaf   :  { %v1010_v46 = vpop.permute.xlu0 %1009 }
  0xb0   :  { %v1012_v50 = vsub.f32 %v1748_v54, %v1010_v46  ;;  %v44_v20 = vsel %vm43_vm4, %v40_v27, %v42_v17  ;;  %v1155_v27 = vadd.f32 %v1154_v40, %v1153_v33 }
  0xb1   :  { %v47_v25 = vsel %vm45_vm5, %v46_v22, %v44_v20 }
  0xb2   :  { %v1013_v52 = vmul.f32 %v1012_v50, %v1012_v50  ;;  %v48_v31 = vadd.f32 1e-06, %v47_v25  ;;  %v1156_v43 = vrot.slane %v1155_v27, 2 }
  0xb3   :  { %v1046_v57 = vpop.permute.xlu0 %1045 }
  0xb4   :  { %1015 = vrot.lane.b32.xlu1 %v1013_v52, %s1686_s13  ;;  %v1048_v58 = vsub.f32 %v1806_v53, %v1046_v57  ;;  %v1157_v46 = vadd.f32 %v1156_v43, %v1155_v27 }
  0xb6   :  { %v1049_v62 = vmul.f32 %v1048_v58, %v1048_v58  ;;  %v1158_v50 = vrot.slane %v1157_v46, 1 }
  0xb7   :  { %v1124_v11 = vpop.permute.xlu0 %1123 }
  0xb8   :  { %v1126_v16 = vsub.f32 %v1813_v10, %v1124_v11  ;;  %v1159_v52 = vadd.f32 %v1158_v50, %v1157_v46  ;;  %v1144_v11 = vsel %vm27_vm2, %v1143_v7, 0.0 }
  0xb9   :  { %v1145_v13 = vrot.slane %v1144_v11, 4 }
  0xba   :  { %v1127_v19 = vmul.f32 %v1126_v16, %v1126_v16  ;;  %v1835_v41 = vmul.f32 0.25, %v1159_v52 }
  0xbf   :  { %1051 = vrot.lane.b32.xlu0 %v1049_v62, %s1686_s13 }
  0xc2   :  { %v273_v8 = vpop.xlane.xlu1 %272 }
  0xc3   :  { %1611 = vrsqrt.f32 %v273_v8  ;;  %vm276_vm6 = vcmp.eq.f32.partialorder %v273_v8, inf  ;;  %v279_v28 = vand.u32 2147483648, %v273_v8  ;;  %vm278_vm7 = vcmp.eq.f32.partialorder %v273_v8, 0.0 }
  0xc4   :  { %1613 = vrcp.f32 %v48_v31 }
  0xc6   :  { %v1085_v14 = vpop.permute.xlu1 %1084 }
  0xc7   :  { %v1087_v15 = vsub.f32 %v1811_v9, %v1085_v14  ;;  %v1146_v14 = vadd.f32 %v1145_v13, %v1144_v11 }
  0xc9   :  { %v1088_v18 = vmul.f32 %v1087_v15, %v1087_v15  ;;  %v1147_v15 = vrot.slane %v1146_v14, 2 }
  0xcb   :  { %1090 = vrot.lane.b32.xlu0 %v1088_v18, %s1686_s13  ;;  %v1148_v16 = vadd.f32 %v1147_v15, %v1146_v14 }
  0xcd   :  { %v1149_v18 = vrot.slane %v1148_v16, 1 }
  0xcf   :  { %1129 = vrot.lane.b32.xlu0 %v1127_v19, %s1686_s13  ;;  %v1150_v20 = vadd.f32 %v1149_v18, %v1148_v16 }
  0xd0   :  { %v1612_v26 = vpop.eup %1611 }
  0xd1   :  { %v275_v30 = vmul.f32 %v1612_v26, %v273_v8  ;;  %v1614_v47 = vpop.eup %1613  ;;  %v1856_v23 = vmul.f32 0.25, %v1150_v20 }
  0xd2   :  { %v1830_v29 = vmul.f32 %v1614_v47, %v1729_v35  ;;  %v1202_v35 = vsel %vm233_vm3, %v1775_v12, 0.0 }
  0xd3   :  { %v277_v36 = vsel %vm276_vm6, %v273_v8, %v275_v30  ;;  %v1203_v57 = vrot.slane %v1202_v35, 4 }
  0xd4   :  { %v280_v37 = vsel %vm278_vm7, %v279_v28, %v277_v36 }
  0xd5   :  { %v281_v38 = vadd.f32 1e-06, %v280_v37  ;;  %v1204_v60 = vadd.f32 %v1203_v57, %v1202_v35 }
  0xd7   :  { %1615 = vrcp.f32 %v281_v38  ;;  %v1205_v61 = vrot.slane %v1204_v60, 2 }
  0xd8   :  { %57 = vadd.xlane.f32.xlu1 %v56_v51 }
  0xd9   :  { %v1206_v2 = vadd.f32 %v1205_v61, %v1204_v60 }
  0xdb   :  { %v1207_v3 = vrot.slane %v1206_v2, 1 }
  0xdc   :  { %472 = vadd.xlane.f32.xlu1 %v471_v42 }
  0xdd   :  { %v1208_v6 = vadd.f32 %v1207_v3, %v1206_v2 }
  0xdf   :  { %v1847_v8 = vmul.f32 0.25, %v1208_v6 }
  0xe0   :  { %490 = vadd.xlane.f32.xlu1 %v489_v45 }
  0xe4   :  { %v1616_v48 = vpop.eup %1615 }
  0xe5   :  { %v283_v49 = vmul.f32 %v1616_v48, %v1741_v44 }
  0xe7   :  { %1564 = vmatprep.subr.msk.mxu1 %vm117_vm8, %v283_v49 }
  0xe8   :  { %1565 = vmatpush3.msk.msra.mxu1 %vm117_vm8, %v283_v49 }
  0xe9   :  { %1580 = vmatprep.subr.msk.mxu1 %vm117_vm8, %v1830_v29 }
  0xf1   :  { %1162 = vrot.lane.b32.xlu1 %v1835_v41, %s1687_s14 }
 0x126   :  { %v1016_v55 = vpop.permute.xlu1 %1015 }
 0x127   :  { %v1019_v44 = vsel %vm1018_vm9, %v1016_v55, 0.0 }
 0x128   :  { %1020 = vadd.xlane.f32.xlu1 %v1019_v44 }
 0x132   :  { %v259_v56 = vpop.xlane.xlu0 %258 }
 0x133   :  { %1617 = vrsqrt.f32 %v259_v56  ;;  %vm262_vm10 = vcmp.eq.f32.partialorder %v259_v56, inf  ;;  %v265_v47 = vand.u32 2147483648, %v259_v56  ;;  %vm264_vm11 = vcmp.eq.f32.partialorder %v259_v56, 0.0 }
 0x136   :  { %v1842_v58 = vpop.permute.xlu0 %1051 }
 0x137   :  { %v1054_v61 = vsel %vm1018_vm9, %v1842_v58, 0.0 }
 0x13d   :  { %v1091_v62 = vpop.permute.xlu0 %1090 }
 0x13e   :  { %v1093_v1 = vsel %vm1018_vm9, %v1091_v62, 0.0 }
 0x13f   :  { %1094 = vadd.xlane.f32.xlu1 %v1093_v1 }
 0x140   :  { %v1618_v38 = vpop.eup %1617 }
 0x141   :  { %v1130_v37 = vpop.permute.xlu0 %1129  ;;  %v261_v51 = vmul.f32 %v1618_v38, %v259_v56 }
 0x142   :  { %v1132_v62 = vsel %vm1018_vm9, %v1130_v37, 0.0 }
 0x143   :  { %v263_v45 = vsel %vm262_vm10, %v259_v56, %v261_v51 }
 0x150   :  { %1211 = vrot.lane.b32.xlu1 %v1847_v8, %s1685_s0 }
 0x161   :  { %v1852_v17 = vpop.xlane.xlu1 %57 }
 0x162   :  { %vm61_vm14 = vcmp.eq.f32.partialorder %v1852_v17, inf  ;;  %v64_v3 = vand.u32 2147483648, %v1852_v17  ;;  %vm63_vm15 = vcmp.eq.f32.partialorder %v1852_v17, 0.0 }
 0x165   :  { %v473_v19 = vpop.xlane.xlu1 %472 }
 0x166   :  { %1619 = vrsqrt.f32 %v473_v19  ;;  %vm476_vm12 = vcmp.eq.f32.partialorder %v473_v19, inf  ;;  %v479_v50 = vand.u32 2147483648, %v473_v19  ;;  %vm478_vm13 = vcmp.eq.f32.partialorder %v473_v19, 0.0 }
 0x169   :  { %v1854_v22 = vpop.xlane.xlu1 %490 }
 0x16a   :  { %vm494_vm0 = vcmp.eq.f32.partialorder %v1854_v22, inf  ;;  %v497_v13 = vand.u32 2147483648, %v1854_v22  ;;  %vm496_vm2 = vcmp.eq.f32.partialorder %v1854_v22, 0.0 }
 0x16d   :  { %v1163_v32 = vpop.permute.xlu1 %1162 }
 0x16e   :  { %v1165_v25 = vsub.f32 %v1856_v23, %v1163_v32 }
 0x170   :  { %v1166_v26 = vmul.f32 %v1165_v25, %v1165_v25 }
 0x172   :  { %1168 = vrot.lane.b32.xlu0 %v1166_v26, %s1686_s13 }
 0x173   :  { %v1620_v27 = vpop.eup %1619 }
 0x174   :  { %v475_v46 = vmul.f32 %v1620_v27, %v473_v19 }
 0x176   :  { %1183 = vrot.lane.b32.xlu0 %v1762_v4, %s1685_s0  ;;  %v477_v49 = vsel %vm476_vm12, %v473_v19, %v475_v46 }
 0x177   :  { %v480_v55 = vsel %vm478_vm13, %v479_v50, %v477_v49 }
 0x178   :  { %v481_v44 = vadd.f32 1e-06, %v480_v55 }
 0x1b1   :  { %v1862_v28 = vpop.xlane.xlu1 %1020 }
 0x1b2   :  { %vm1024_vm4 = vcmp.eq.f32.partialorder %v1862_v28, inf  ;;  %vm1026_vm6 = vcmp.eq.f32.partialorder %v1862_v28, 0.0 }
 0x1c8   :  { %v1864_v30 = vpop.xlane.xlu1 %1094 }
 0x1c9   :  { %vm1098_vm5 = vcmp.eq.f32.partialorder %v1864_v30, inf  ;;  %vm1100_vm7 = vcmp.eq.f32.partialorder %v1864_v30, 0.0  ;;  %v1101_v46 = vand.u32 2147483648, %v1864_v30 }
 0x1cc   :  { %v1212_v31 = vpop.permute.xlu1 %1211 }
 0x1cd   :  { %v1214_v33 = vsub.f32 %v1806_v53, %v1212_v31  ;;  %v266_v53 = vsel %vm264_vm11, %v265_v47, %v263_v45 }
 0x1ce   :  { %v267_v52 = vadd.f32 1e-06, %v266_v53 }
 0x1cf   :  { %v1215_v36 = vmul.f32 %v1214_v33, %v1214_v33 }
 0x1d0   :  { %1621 = vrcp.f32 %v267_v52 }
 0x1d1   :  { %1217 = vrot.lane.b32.xlu1 %v1215_v36, %s1686_s13  ;;  %1623 = vrcp.f32 %v481_v44 }
 0x1d2   :  { %1625 = vrsqrt.f32 %v1852_v17 }
 0x1d3   :  { %1627 = vrsqrt.f32 %v1854_v22 }
 0x1e4   :  { %v1169_v40 = vpop.permute.xlu0 %1168 }
 0x1e5   :  { %v1171_v35 = vsel %vm1018_vm9, %v1169_v40, 0.0 }
 0x1e8   :  { %v1184_v42 = vpop.permute.xlu0 %1183 }
 0x1e9   :  { %v1186_v43 = vsub.f32 %v1748_v54, %v1184_v42  ;;  %v1622_v54 = vpop.eup %1621 }
 0x1ea   :  { %v269_v57 = vmul.f32 %v1622_v54, %v1757_v63  ;;  %v1624_v60 = vpop.eup %1623 }
 0x1eb   :  { %v1187_v48 = vmul.f32 %v1186_v43, %v1186_v43  ;;  %v483_v56 = vmul.f32 %v1624_v60, %v1726_v34  ;;  %v1626_v63 = vpop.eup %1625  ;;  %v1027_v43 = vand.u32 2147483648, %v1862_v28 }
 0x1ec   :  { %v60_v1 = vmul.f32 %v1626_v63, %v1852_v17  ;;  %v1628_v2 = vpop.eup %1627  ;;  %v1231_v63 = vmul.f32 %v1775_v12, %v1770_v0 }
 0x1ed   :  { %1189 = vrot.lane.b32.xlu0 %v1187_v48, %s1686_s13  ;;  %v493_v58 = vmul.f32 %v1628_v2, %v1854_v22 }
 0x1ee   :  { %v62_v34 = vsel %vm61_vm14, %v1852_v17, %v60_v1 }
 0x1ef   :  { %v65_v6 = vsel %vm63_vm15, %v64_v3, %v62_v34  ;;  %v495_v7 = vsel %vm494_vm0, %v1854_v22, %v493_v58  ;;  %vm104_vm0 = vcmask 31744   ;;  %v1232_v3 = vsel %vm233_vm3, %v1231_v63, 0.0 }
 0x1f0   :  { %v66_v15 = vadd.f32 1e-06, %v65_v6  ;;  %v498_v16 = vsel %vm496_vm2, %v497_v13, %v495_v7 }
 0x1f1   :  { %v499_v18 = vadd.f32 1e-06, %v498_v16 }
 0x1f2   :  { %1629 = vrcp.f32 %v66_v15 }
 0x1f3   :  { %1631 = vrcp.f32 %v499_v18 }
 0x1f4   :  { %1633 = vrsqrt.f32 %v1862_v28 }
 0x1f5   :  { %1172 = vadd.xlane.f32.xlu1 %v1171_v35  ;;  %1635 = vrsqrt.f32 %v1864_v30 }
 0x1ff   :  { %v1630_v19 = vpop.eup %1629 }
 0x200   :  { %v68_v17 = vmul.f32 %v1630_v19, %v1754_v59  ;;  %v1632_v20 = vpop.eup %1631 }
 0x201   :  { %v501_v32 = vmul.f32 %v1632_v20, %v1770_v0  ;;  %v1634_v36 = vpop.eup %1633 }
 0x202   :  { %v1636_v37 = vpop.eup %1635  ;;  %v1023_v38 = vmul.f32 %v1634_v36, %v1862_v28 }
 0x203   :  { %v1097_v51 = vmul.f32 %v1636_v37, %v1864_v30 }
 0x204   :  { %v1025_v42 = vsel %vm1024_vm4, %v1862_v28, %v1023_v38  ;;  %v1915_v28 = vmul.f32 %v1775_v12, %v1775_v12 }
 0x205   :  { %v1099_v48 = vsel %vm1098_vm5, %v1864_v30, %v1097_v51  ;;  %v1028_v52 = vsel %vm1026_vm6, %v1027_v43, %v1025_v42 }
 0x206   :  { %285 = vrot.lane.b32.xlu1 %v269_v57, %s1687_s14  ;;  %v1102_v54 = vsel %vm1100_vm7, %v1101_v46, %v1099_v48  ;;  %v1262_v1 = vsel %vm233_vm3, %v1915_v28, 0.0  ;;  %v1291_v63 = vmul.f32 %v1915_v28, %v1770_v0  ;;  %v14_v0 = vld [vmem:[%s2112_s1] sm:$0xf] }
 0x207   :  { %v1263_v6 = vrot.slane %v1262_v1, 4 }
 0x209   :  { %v1264_v13 = vadd.f32 %v1263_v6, %v1262_v1  ;;  %v1292_v1 = vsel %vm233_vm3, %v1291_v63, 0.0 }
 0x20a   :  { %503 = vrot.lane.b32.xlu1 %v483_v56, %s1685_s0 }
 0x20b   :  { %v1265_v15 = vrot.slane %v1264_v13, 2 }
 0x20c   :  { %1055 = vadd.xlane.f32.xlu0 %v1054_v61 }
 0x20d   :  { %v1266_v18 = vadd.f32 %v1265_v15, %v1264_v13 }
 0x210   :  { %1133 = vadd.xlane.f32.xlu0 %v1132_v62 }
 0x233   :  { %69 = vxpose.xlu1.b32.start.end [1/1] (short) (narrow) %v1830_v29, 32 }
 0x243   :  { %v1895_v25 = vpop.permute.xlu1 %1217 }
 0x244   :  { %v1220_v12 = vsel %vm1018_vm9, %v1895_v25, 0.0 }
 0x25f   :  { %v1190_v11 = vpop.permute.xlu0 %1189 }
 0x260   :  { %v1192_v14 = vsel %vm1018_vm9, %v1190_v11, 0.0  ;;  %v1233_v11 = vrot.slane %v1232_v3, 4 }
 0x261   :  { %1193 = vadd.xlane.f32.xlu0 %v1192_v14 }
 0x262   :  { %v1234_v14 = vadd.f32 %v1233_v11, %v1232_v3 }
 0x264   :  { %v1235_v16 = vrot.slane %v1234_v14, 2 }
 0x266   :  { %v1236_v19 = vadd.f32 %v1235_v16, %v1234_v14 }
 0x268   :  { %v1237_v20 = vrot.slane %v1236_v19, 1 }
 0x277   :  { %102 = vrot.lane.b32.xlu0 %v68_v17, %s1686_s13  ;;  %v1267_v17 = vrot.slane %v1266_v18, 1 }
 0x27b   :  { %539 = vrot.lane.b32.xlu0 %v501_v32, %s1687_s14  ;;  %v1268_v32 = vadd.f32 %v1267_v17, %v1266_v18 }
 0x27e   :  { %v1173_v26 = vpop.xlane.xlu1 %1172 }
 0x27f   :  { %1637 = vrsqrt.f32 %v1173_v26  ;;  %vm1176_vm12 = vcmp.eq.f32.partialorder %v1173_v26, inf  ;;  %v1179_v61 = vand.u32 2147483648, %v1173_v26  ;;  %vm1178_vm15 = vcmp.eq.f32.partialorder %v1173_v26, 0.0 }
 0x282   :  { %v1898_v31 = vpop.permute.xlu1 %285 }
 0x286   :  { %v504_v22 = vpop.permute.xlu1 %503 }
 0x287   :  { %506 = vxpose.xlu1.b32.start.end [1/1] (short) (narrow) %v504_v22, 32  ;;  %v1927_v22 = vmul.f32 0.25, %v1268_v32 }
 0x28c   :  { %v1638_v40 = vpop.eup %1637 }
 0x28d   :  { %v1175_v53 = vmul.f32 %v1638_v40, %v1173_v26 }
 0x28f   :  { %v1177_v60 = vsel %vm1176_vm12, %v1173_v26, %v1175_v53  ;;  %v1238_v26 = vadd.f32 %v1237_v20, %v1236_v19  ;;  %vm209_vm12 = vcmask 261120  }
 0x290   :  { %v1180_v34 = vsel %vm1178_vm15, %v1179_v61, %v1177_v60 }
 0x295   :  { %v1056_v59 = vpop.xlane.xlu0 %1055 }
 0x296   :  { %1639 = vrsqrt.f32 %v1056_v59  ;;  %vm1059_vm10 = vcmp.eq.f32.partialorder %v1056_v59, inf  ;;  %v1062_v47 = vand.u32 2147483648, %v1056_v59  ;;  %vm1061_vm11 = vcmp.eq.f32.partialorder %v1056_v59, 0.0 }
 0x299   :  { %288 = vxpose.xlu0.b32.start.end [1/1] (short) (narrow) %v1898_v31, 32  ;;  %v1134_v33 = vpop.xlane.xlu0 %1133 }
 0x29a   :  { %1641 = vrsqrt.f32 %v1134_v33  ;;  %vm1137_vm13 = vcmp.eq.f32.partialorder %v1134_v33, inf  ;;  %v1140_v57 = vand.u32 2147483648, %v1134_v33  ;;  %vm1139_vm14 = vcmp.eq.f32.partialorder %v1134_v33, 0.0 }
 0x2a3   :  { %v1640_v27 = vpop.eup %1639 }
 0x2a4   :  { %v1058_v45 = vmul.f32 %v1640_v27, %v1056_v59 }
 0x2a6   :  { %v1060_v49 = vsel %vm1059_vm10, %v1056_v59, %v1058_v45  ;;  %v1929_v59 = vmul.f32 0.25, %v1238_v26 }
 0x2a7   :  { %v1642_v50 = vpop.eup %1641  ;;  %v1063_v55 = vsel %vm1061_vm11, %v1062_v47, %v1060_v49 }
 0x2a8   :  { %v1064_v44 = vadd.f32 %v1063_v55, %v1028_v52  ;;  %v1136_v35 = vmul.f32 %v1642_v50, %v1134_v33 }
 0x2aa   :  { %v1138_v56 = vsel %vm1137_vm13, %v1134_v33, %v1136_v35  ;;  %v1103_v30 = vadd.f32 %v1102_v54, %v1064_v44 }
 0x2ab   :  { %v1141_v62 = vsel %vm1139_vm14, %v1140_v57, %v1138_v56 }
 0x2ac   :  { %v1142_v2 = vadd.f32 %v1141_v62, %v1103_v30 }
 0x2ae   :  { %v1921_v58 = vadd.f32 %v1180_v34, %v1142_v2  ;;  %v1293_v2 = vrot.slane %v1292_v1, 4 }
 0x2af   :  { %v85_v7 = vpop.trf.xlu1 }
 0x2b0   :  { %1558 = vmatprep.mubr.msk.f32.mxu0 %vm104_vm0, %v85_v7  ;;  %v1294_v3 = vadd.f32 %v1293_v2, %v1292_v1 }
 0x2b3   :  { %v86_v25 = vpop.trf.xlu1 }
 0x2b7   :  { %v87_v37 = vpop.trf.xlu1 }
 0x2ba   :  { %1221 = vadd.xlane.f32.xlu1 %v1220_v12 }
 0x2bb   :  { %v88_v40 = vpop.trf.xlu1 }
 0x2cb   :  { %1271 = vrot.lane.b32.xlu1 %v1927_v22, %s1685_s0 }
 0x2ce   :  { %1241 = vrot.lane.b32.xlu0 %v1929_v59, %s1685_s0 }
 0x2ea   :  { %v1935_v33 = vpop.xlane.xlu0 %1193 }
 0x2eb   :  { %1643 = vrsqrt.f32 %v1935_v33  ;;  %vm1197_vm2 = vcmp.eq.f32.partialorder %v1935_v33, inf  ;;  %v1200_v60 = vand.u32 2147483648, %v1935_v33  ;;  %vm1199_vm5 = vcmp.eq.f32.partialorder %v1935_v33, 0.0 }
 0x2ee   :  { %v103_v36 = vpop.permute.xlu0 %102 }
 0x2ef   :  { %1556 = vmatprep.subr.msk.mxu0 %vm117_vm8, %v103_v36 }
 0x2f0   :  { %1557 = vmatpush3.msk.msra.mxu0 %vm117_vm8, %v103_v36 }
 0x2f1   :  { %1559 = vmatmul.mubr.msk.f32.vlgmr.msra.gmra.mxu0 %vm104_vm0, %v86_v25 }
 0x2f2   :  { %v540_v38 = vpop.permute.xlu0 %539  ;;  %1561 = vmatprep.mubr.msk.f32.mxu0 %vm104_vm0, %v87_v37 }
 0x2f3   :  { %1572 = vmatprep.subr.msk.mxu0 %vm117_vm8, %v540_v38 }
 0x2f4   :  { %1573 = vmatpush3.msk.msra.mxu0 %vm117_vm8, %v540_v38 }
 0x2f5   :  { %1588 = vmatprep.subr.msk.mxu0 %vm117_vm8, %v1898_v31  ;;  %1562 = vmatmul.mubr.msk.f32.gmra.mxu0 %vm104_vm0, %v88_v40 }
 0x2f8   :  { %v1644_v44 = vpop.eup %1643 }
 0x2f9   :  { %v1196_v35 = vmul.f32 %v1644_v44, %v1935_v33 }
 0x2fb   :  { %v1198_v57 = vsel %vm1197_vm2, %v1935_v33, %v1196_v35 }
 0x303   :  { %v522_v51 = vpop.trf.xlu1 }
 0x304   :  { %1574 = vmatprep.mubr.msk.f32.mxu0 %vm104_vm0, %v522_v51 }
 0x307   :  { %v523_v27 = vpop.trf.xlu1 }
 0x308   :  { %1575 = vmatmul.mubr.msk.f32.vlgmr.msra.gmra.mxu0 %vm104_vm0, %v523_v27 }
 0x309   :  { %1589 = vmatpush3.msk.msra.mxu0 %vm117_vm8, %v1898_v31 }
 0x30b   :  { %v524_v42 = vpop.trf.xlu1 }
 0x30c   :  { %1577 = vmatprep.mubr.msk.f32.mxu0 %vm104_vm0, %v524_v42 }
 0x30f   :  { %v525_v43 = vpop.trf.xlu1 }
 0x310   :  { %1578 = vmatmul.mubr.msk.f32.gmra.mxu0 %vm104_vm0, %v525_v43 }
 0x311   :  { %1590 = vmatprep.mubr.msk.f32.mxu0 %vm104_vm0, %v522_v51 }
 0x314   :  { %1591 = vmatmul.mubr.msk.f32.vlgmr.msra.gmra.mxu0 %vm104_vm0, %v523_v27 }
 0x315   :  { %v304_v45 = vpop.trf.xlu0  ;;  %1593 = vmatprep.mubr.msk.f32.mxu0 %vm104_vm0, %v524_v42 }
 0x316   :  { %1566 = vmatprep.mubr.msk.f32.mxu1 %vm104_vm0, %v304_v45 }
 0x318   :  { %1594 = vmatmul.mubr.msk.f32.gmra.mxu0 %vm104_vm0, %v525_v43 }
 0x319   :  { %v305_v46 = vpop.trf.xlu0 }
 0x31a   :  { %1567 = vmatmul.mubr.msk.f32.vlgmr.msra.gmra.mxu1 %vm104_vm0, %v305_v46 }
 0x31b   :  { %1581 = vmatpush3.msk.msra.mxu1 %vm117_vm8, %v1830_v29 }
 0x31c   :  { %1596 = vmatprep.subr.msk.mxu1 %vm117_vm8, %v1898_v31 }
 0x31d   :  { %v306_v47 = vpop.trf.xlu0 }
 0x31e   :  { %1569 = vmatprep.mubr.msk.f32.mxu1 %vm104_vm0, %v306_v47 }
 0x321   :  { %v307_v48 = vpop.trf.xlu0 }
 0x322   :  { %1570 = vmatmul.mubr.msk.f32.gmra.mxu1 %vm104_vm0, %v307_v48 }
 0x323   :  { %1582 = vmatprep.mubr.msk.f32.mxu1 %vm104_vm0, %v522_v51 }
 0x326   :  { %1583 = vmatmul.mubr.msk.f32.vlgmr.msra.gmra.mxu1 %vm104_vm0, %v523_v27 }
 0x327   :  { %1597 = vmatpush3.msk.msra.mxu1 %vm117_vm8, %v1898_v31  ;;  %1585 = vmatprep.mubr.msk.f32.mxu1 %vm104_vm0, %v524_v42 }
 0x32a   :  { %1586 = vmatmul.mubr.msk.f32.gmra.mxu1 %vm104_vm0, %v525_v43 }
 0x32b   :  { %1598 = vmatprep.mubr.msk.f32.mxu1 %vm104_vm0, %v85_v7  ;;  %v1295_v7 = vrot.slane %v1294_v3, 2 }
 0x32d   :  { %v1296_v14 = vadd.f32 %v1295_v7, %v1294_v3 }
 0x32e   :  { %1599 = vmatmul.mubr.msk.f32.vlgmr.msra.gmra.mxu1 %vm104_vm0, %v86_v25 }
 0x32f   :  { %1601 = vmatprep.mubr.msk.f32.mxu1 %vm104_vm0, %v87_v37  ;;  %v1297_v15 = vrot.slane %v1296_v14, 1 }
 0x331   :  { %v1298_v12 = vadd.f32 %v1297_v15, %v1296_v14 }
 0x332   :  { %1602 = vmatmul.mubr.msk.f32.gmra.mxu1 %vm104_vm0, %v88_v40 }
 0x333   :  { %v1299_v16 = vmul.f32 0.25, %v1298_v12 }
 0x340   :  { %v1242_v29 = vpop.permute.xlu0 %1241 }
 0x341   :  { %v1244_v53 = vsub.f32 %v1811_v9, %v1242_v29 }
 0x343   :  { %v1245_v49 = vmul.f32 %v1244_v53, %v1244_v53  ;;  %v1222_v50 = vpop.xlane.xlu1 %1221 }
 0x344   :  { %1645 = vrsqrt.f32 %v1222_v50  ;;  %vm1225_vm4 = vcmp.eq.f32.partialorder %v1222_v50, inf  ;;  %v1228_v56 = vand.u32 2147483648, %v1222_v50  ;;  %vm1227_vm6 = vcmp.eq.f32.partialorder %v1222_v50, 0.0 }
 0x345   :  { %1247 = vrot.lane.b32.xlu0 %v1245_v49, %s1686_s13 }
 0x347   :  { %v1272_v31 = vpop.permute.xlu1 %1271 }
 0x348   :  { %v1274_v52 = vsub.f32 %v1813_v10, %v1272_v31  ;;  %v1201_v10 = vsel %vm1199_vm5, %v1200_v60, %v1198_v57 }
 0x34a   :  { %v1275_v55 = vmul.f32 %v1274_v52, %v1274_v52 }
 0x34c   :  { %1277 = vrot.lane.b32.xlu1 %v1275_v55, %s1686_s13 }
 0x351   :  { %v1646_v54 = vpop.eup %1645 }
 0x352   :  { %v1224_v9 = vmul.f32 %v1646_v54, %v1222_v50 }
 0x354   :  { %v1226_v30 = vsel %vm1225_vm4, %v1222_v50, %v1224_v9  ;;  %v15_v50 = vld [vmem:[%s2112_s1 + $0x4] sm:$0xf]  ;;  %s1688_s1 = smov [#allocation2]  }
 0x355   :  { %v1229_v61 = vsel %vm1227_vm6, %v1228_v56, %v1226_v30  ;;  %s1488_s19 = sshll.u32 %s1688_s1, 4  ;;  %s1489_s19 = int_to_ptr.vmem [resolvable:$true] %s1488_s19 }
 0x356   :  { %v1230_v62 = vadd.f32 %v1229_v61, %v1201_v10  ;;  %s1663_s20 = scalar_lea.vmem %s1489_s19, 16  ;;  %s1667_s21 = scalar_lea.vmem %s1489_s19, 32 }
 0x357   :  { %p1664_p0 = scmp.ne.s32.totalorder %s1489_s19, %s1663_s20  ;;  %p1668_p1 = scmp.lt.s32.totalorder %s1489_s19, %s1489_s19 }
 0x358   :  { %p1669_p2 = scmp.lt.s32.totalorder %s1667_s21, %s1663_s20 }
 0x35a   :  { %p1670_p3 = por %p1669_p2, %p1668_p1 }
 0x35c   :  { %p1671_p4 = pnand %p1670_p3, %p1664_p0 }
 0x3b1   :  { %v1560_v9 = vpop.f32.mrf.mxu0 }
 0x3b2   :  { %v206_v30 = vmul.f32 %v1560_v9, %v1560_v9 }
 0x3b3   :  { %v186_v60 = vpop.f32.mrf.mxu0 }
 0x3b4   :  { %v213_v63 = vsel %vm209_vm12, %v206_v30, 0.0 }
 0x3b5   :  { %v1563_v56 = vpop.f32.mrf.mxu0 }
 0x3b7   :  { %v1248_v34 = vpop.permute.xlu0 %1247  ;;  %v196_v61 = vpop.f32.mrf.mxu0 }
 0x3b8   :  { %v1250_v6 = vsel %vm1018_vm9, %v1248_v34, 0.0 }
 0x3b9   :  { %1251 = vadd.xlane.f32.xlu0 %v1250_v6 }
 0x3be   :  { %v1278_v11 = vpop.permute.xlu1 %1277 }
 0x3bf   :  { %v1280_v13 = vsel %vm1018_vm9, %v1278_v11, 0.0 }
 0x3c0   :  { %1281 = vadd.xlane.f32.xlu1 %v1280_v13 }
 0x3c8   :  { %v1576_v2 = vpop.f32.mrf.mxu0 }
 0x3ca   :  { %v621_v7 = vpop.f32.mrf.mxu0 }
 0x3cf   :  { %1301 = vrot.lane.b32.xlu0 %v1299_v16, %s1685_s0 }
 0x3d0   :  { %v1579_v14 = vpop.f32.mrf.mxu0 }
 0x3d1   :  { %1381 = vrot.lane.b32.xlu1 %v1785_v21, %s1686_s13  ;;  %v643_v15 = vmul.f32 %v1579_v14, %v1579_v14 }
 0x3d3   :  { %1322 = vrot.lane.b32.xlu0 %v1735_v39, %s1686_s13 }
 0x3d7   :  { %1341 = vrot.lane.b32.xlu0 %v1781_v5, %s1686_s13 }
 0x3da   :  { %v1568_v10 = vpop.f32.mrf.mxu1 }
 0x3db   :  { %1361 = vrot.lane.b32.xlu0 %v1789_v24, %s1686_s13 }
 0x3dc   :  { %v401_v1 = vpop.f32.mrf.mxu1 }
 0x3dd   :  { %v420_v34 = vmul.f32 %v401_v1, %v401_v1 }
 0x3df   :  { %1401 = vrot.lane.b32.xlu0 %v1835_v41, %s1686_s13  ;;  %v424_v13 = vsel %vm209_vm12, %v420_v34, 0.0 }
 0x3e2   :  { %v1571_v6 = vpop.f32.mrf.mxu1 }
 0x3e3   :  { %1425 = vrot.lane.b32.xlu0 %v14_v0, %s1687_s14  ;;  %v423_v11 = vmul.f32 %v1571_v6, %v1571_v6 }
 0x3e5   :  { %v433_v12 = vsel %vm209_vm12, %v423_v11, 0.0 }
 0x442   :  { %v1252_v28 = vpop.xlane.xlu0 %1251 }
 0x443   :  { %1647 = vrsqrt.f32 %v1252_v28  ;;  %vm1255_vm3 = vcmp.eq.f32.partialorder %v1252_v28, inf  ;;  %v1258_v32 = vand.u32 2147483648, %v1252_v28  ;;  %vm1257_vm7 = vcmp.eq.f32.partialorder %v1252_v28, 0.0 }
 0x446   :  { %v1302_v21 = vpop.permute.xlu0 %1301 }
 0x447   :  { %v1304_v39 = vsub.f32 %v1856_v23, %v1302_v21 }
 0x449   :  { %v1305_v18 = vmul.f32 %v1304_v39, %v1304_v39  ;;  %v1282_v19 = vpop.xlane.xlu1 %1281  ;;  %v205_v39 = vmul.f32 %v186_v60, %v186_v60 }
 0x44a   :  { %1649 = vrsqrt.f32 %v1282_v19  ;;  %v1323_v5 = vpop.permute.xlu0 %1322  ;;  %vm1285_vm10 = vcmp.eq.f32.partialorder %v1282_v19, inf  ;;  %v1288_v36 = vand.u32 2147483648, %v1282_v19  ;;  %vm1287_vm11 = vcmp.eq.f32.partialorder %v1282_v19, 0.0 }
 0x44b   :  { %v1325_v24 = vsub.f32 %v1762_v4, %v1323_v5  ;;  %1307 = vrot.lane.b32.xlu0 %v1305_v18, %s1686_s13 }
 0x44d   :  { %v1326_v41 = vmul.f32 %v1325_v24, %v1325_v24  ;;  %v1382_v45 = vpop.permute.xlu1 %1381 }
 0x44e   :  { %v1342_v51 = vpop.permute.xlu0 %1341  ;;  %v1384_v31 = vsub.f32 %v1927_v22, %v1382_v45 }
 0x44f   :  { %1328 = vrot.lane.b32.xlu1 %v1326_v41, %s1687_s14  ;;  %v1344_v49 = vsub.f32 %v1847_v8, %v1342_v51  ;;  %v208_v41 = vmul.f32 %v1563_v56, %v1563_v56 }
 0x450   :  { %v1648_v17 = vpop.eup %1647  ;;  %v1385_v35 = vmul.f32 %v1384_v31, %v1384_v31 }
 0x451   :  { %v1254_v20 = vmul.f32 %v1648_v17, %v1252_v28  ;;  %v1345_v44 = vmul.f32 %v1344_v49, %v1344_v49  ;;  %v210_v17 = vsel %vm209_vm12, %v205_v39, 0.0 }
 0x452   :  { %v1362_v27 = vpop.permute.xlu0 %1361 }
 0x453   :  { %v1256_v26 = vsel %vm1255_vm3, %v1252_v28, %v1254_v20  ;;  %v1364_v53 = vsub.f32 %v1929_v59, %v1362_v27 }
 0x454   :  { %v1259_v33 = vsel %vm1257_vm7, %v1258_v32, %v1256_v26  ;;  %v207_v26 = vmul.f32 %v196_v61, %v196_v61  ;;  %vm1480_vm7 = vcmask 0  }
 0x455   :  { %v1260_v25 = vadd.f32 %v1259_v33, %v1230_v62  ;;  %v1365_v52 = vmul.f32 %v1364_v53, %v1364_v53  ;;  %v421_v62 = vmul.f32 %v1568_v10, %v1568_v10  ;;  %v219_v33 = vsel %vm209_vm12, %v208_v41, 0.0 }
 0x456   :  { %v1402_v42 = vpop.permute.xlu0 %1401  ;;  %v216_v27 = vsel %vm209_vm12, %v207_v26, 0.0 }
 0x457   :  { %v1650_v23 = vpop.eup %1649  ;;  %v1404_v57 = vsub.f32 %v1299_v16, %v1402_v42  ;;  %v427_v3 = vsel %vm209_vm12, %v421_v62, 0.0  ;;  %v653_v16 = vsel %vm209_vm12, %v643_v15, 0.0 }
 0x458   :  { %v1284_v37 = vmul.f32 %v1650_v23, %v1282_v19 }
 0x459   :  { %v1405_v8 = vmul.f32 %v1404_v57, %v1404_v57 }
 0x45a   :  { %v1286_v38 = vsel %vm1285_vm10, %v1282_v19, %v1284_v37  ;;  %v1426_v43 = vpop.permute.xlu0 %1425 }
 0x45b   :  { %v1289_v4 = vsel %vm1287_vm11, %v1288_v36, %v1286_v38  ;;  %v1446_v55 = vsub.f32 %v15_v50, %v1426_v43  ;;  %v1428_v59 = vsub.f32 %v14_v0, %v1426_v43  ;;  %v631_v50 = vpop.f32.mrf.mxu0 }
 0x45c   :  { %v2008_v40 = vadd.f32 %v1289_v4, %v1260_v25  ;;  %v641_v4 = vmul.f32 %v1576_v2, %v1576_v2  ;;  %v642_v31 = vmul.f32 %v631_v50, %v631_v50 }
 0x45d   :  { %v2020_v54 = vmul.f32 %v1446_v55, %v1446_v55  ;;  %v1429_v22 = vmul.f32 %v1428_v59, %v1428_v59 }
 0x4bd   :  { %v1308_v46 = vpop.permute.xlu0 %1307 }
 0x4be   :  { %v1310_v47 = vsel %vm1018_vm9, %v1308_v46, 0.0 }
 0x4bf   :  { %1311 = vadd.xlane.f32.xlu0 %v1310_v47  ;;  %v640_v47 = vmul.f32 %v621_v7, %v621_v7 }
 0x4c1   :  { %v1329_v48 = vpop.permute.xlu1 %1328  ;;  %v644_v49 = vsel %vm209_vm12, %v640_v47, 0.0 }
 0x4c2   :  { %v1331_v29 = vsel %vm1018_vm9, %v1329_v48, 0.0  ;;  %v647_v48 = vsel %vm209_vm12, %v641_v4, 0.0 }
 0x4c3   :  { %1332 = vadd.xlane.f32.xlu1 %v1331_v29  ;;  %v411_v29 = vpop.f32.mrf.mxu1 }
 0x4c4   :  { %v422_v53 = vmul.f32 %v411_v29, %v411_v29 }
 0x4d4   :  { %1367 = vrot.lane.b32.xlu1 %v1365_v52, %s1687_s14  ;;  %v430_v52 = vsel %vm209_vm12, %v422_v53, 0.0 }
 0x4d5   :  { %1347 = vrot.lane.b32.xlu0 %v1345_v44, %s1687_s14  ;;  %v1592_v44 = vpop.f32.mrf.mxu0 }
 0x4d7   :  { %v850_v9 = vpop.f32.mrf.mxu0 }
 0x4d8   :  { %1461 = vrot.lane.b32.xlu1 %v2020_v54, %s1687_s14  ;;  %v869_v60 = vmul.f32 %v850_v9, %v850_v9 }
 0x4d9   :  { %1387 = vrot.lane.b32.xlu0 %v1385_v35, %s1687_s14  ;;  %v870_v35 = vmul.f32 %v1592_v44, %v1592_v44  ;;  %v1595_v62 = vpop.f32.mrf.mxu0 }
 0x4da   :  { %v873_v61 = vsel %vm209_vm12, %v869_v60, 0.0 }
 0x4db   :  { %v860_v6 = vpop.f32.mrf.mxu0 }
 0x4dc   :  { %v871_v7 = vmul.f32 %v860_v6, %v860_v6 }
 0x4dd   :  { %1407 = vrot.lane.b32.xlu0 %v1405_v8, %s1687_s14 }
 0x4de   :  { %v879_v15 = vsel %vm209_vm12, %v871_v7, 0.0 }
 0x4e1   :  { %1431 = vrot.lane.b32.xlu0 %v1429_v22, %s1686_s13  ;;  %v876_v22 = vsel %vm209_vm12, %v870_v35, 0.0 }
 0x4fc   :  { %214 = vadd.xlane.f32.xlu1 %v213_v63  ;;  %v872_v63 = vmul.f32 %v1595_v62, %v1595_v62 }
 0x500   :  { %428 = vadd.xlane.f32.xlu1 %v427_v3  ;;  %v882_v3 = vsel %vm209_vm12, %v872_v63, 0.0 }
 0x504   :  { %425 = vadd.xlane.f32.xlu1 %v424_v13 }
 0x508   :  { %434 = vadd.xlane.f32.xlu1 %v433_v12 }
 0x50c   :  { %654 = vadd.xlane.f32.xlu1 %v653_v16 }
 0x548   :  { %v1312_v0 = vpop.xlane.xlu0 %1311 }
 0x549   :  { %1651 = vrsqrt.f32 %v1312_v0  ;;  %vm1315_vm13 = vcmp.eq.f32.partialorder %v1312_v0, inf  ;;  %v1318_v23 = vand.u32 2147483648, %v1312_v0  ;;  %vm1317_vm14 = vcmp.eq.f32.partialorder %v1312_v0, 0.0 }
 0x54c   :  { %v2032_v28 = vpop.xlane.xlu1 %1332  ;;  %v1348_v21 = vpop.permute.xlu0 %1347 }
 0x54d   :  { %v1350_v18 = vsel %vm1018_vm9, %v1348_v21, 0.0  ;;  %1653 = vrsqrt.f32 %v2032_v28  ;;  %vm1336_vm15 = vcmp.eq.f32.partialorder %v2032_v28, inf }
 0x54e   :  { %1351 = vadd.xlane.f32.xlu0 %v1350_v18 }
 0x550   :  { %v1368_v19 = vpop.permute.xlu1 %1367  ;;  %v2035_v5 = vpop.permute.xlu0 %1387 }
 0x551   :  { %v1370_v24 = vsel %vm1018_vm9, %v1368_v19, 0.0 }
 0x552   :  { %1371 = vadd.xlane.f32.xlu1 %v1370_v24  ;;  %211 = vadd.xlane.f32.xlu0 %v210_v17 }
 0x554   :  { %v2039_v20 = vpop.permute.xlu0 %1407  ;;  %v1462_v51 = vpop.permute.xlu1 %1461 }
 0x555   :  { %v1464_v45 = vsel %vm16_vm1, %v1462_v51, 0.0  ;;  %v1410_v26 = vsel %vm1018_vm9, %v2039_v20, 0.0 }
 0x556   :  { %v1652_v32 = vpop.eup %1651  ;;  %220 = vadd.xlane.f32.xlu0 %v219_v33  ;;  %v1448_v33 = vsel %vm16_vm1, %v2020_v54, 0.0 }
 0x557   :  { %v1314_v25 = vmul.f32 %v1652_v32, %v1312_v0  ;;  %v1390_v32 = vsel %vm1018_vm9, %v2035_v5, 0.0 }
 0x558   :  { %v1432_v36 = vpop.permute.xlu0 %1431 }
 0x559   :  { %v1316_v37 = vsel %vm1315_vm13, %v1312_v0, %v1314_v25  ;;  %v1434_v38 = vsel %vm16_vm1, %v1432_v36, 0.0  ;;  %vm1338_vm1 = vcmp.eq.f32.partialorder %v2032_v28, 0.0 }
 0x55a   :  { %1435 = vadd.xlane.f32.xlu1 %v1434_v38  ;;  %v1319_v42 = vsel %vm1317_vm14, %v1318_v23, %v1316_v37  ;;  %217 = vadd.xlane.f32.xlu0 %v216_v27  ;;  %v1654_v36 = vpop.eup %1653 }
 0x55b   :  { %v1320_v43 = vadd.f32 %v1319_v42, %v2008_v40  ;;  %v1584_v40 = vpop.f32.mrf.mxu1  ;;  %v1335_v4 = vmul.f32 %v1654_v36, %v2032_v28  ;;  %v1339_v42 = vand.u32 2147483648, %v2032_v28 }
 0x55c   :  { %v756_v55 = vmul.f32 %v1584_v40, %v1584_v40 }
 0x55d   :  { %v2047_v46 = vadd.f32 %v1320_v43, %v1921_v58  ;;  %v650_v58 = vsel %vm209_vm12, %v642_v31, 0.0  ;;  %v736_v8 = vpop.f32.mrf.mxu1  ;;  %v1337_v54 = vsel %vm1336_vm15, %v2032_v28, %v1335_v4 }
 0x55e   :  { %1465 = vadd.xlane.f32.xlu1 %v1464_v45  ;;  %648 = vadd.xlane.f32.xlu0 %v647_v48  ;;  %v762_v57 = vsel %vm209_vm12, %v756_v55, 0.0  ;;  %v755_v59 = vmul.f32 %v736_v8, %v736_v8  ;;  %v1340_v53 = vsel %vm1338_vm1, %v1339_v42, %v1337_v54 }
 0x55f   :  { %v1587_v30 = vpop.f32.mrf.mxu1 }
 0x560   :  { %v759_v56 = vsel %vm209_vm12, %v755_v59, 0.0  ;;  %v758_v10 = vmul.f32 %v1587_v30, %v1587_v30 }
 0x561   :  { %v746_v2 = vpop.f32.mrf.mxu1 }
 0x562   :  { %645 = vadd.xlane.f32.xlu0 %v644_v49  ;;  %v768_v1 = vsel %vm209_vm12, %v758_v10, 0.0  ;;  %v757_v34 = vmul.f32 %v746_v2, %v746_v2 }
 0x563   :  { %v1600_v13 = vpop.f32.mrf.mxu1 }
 0x564   :  { %v765_v11 = vsel %vm209_vm12, %v757_v34, 0.0  ;;  %v982_v14 = vmul.f32 %v1600_v13, %v1600_v13 }
 0x565   :  { %v962_v12 = vpop.f32.mrf.mxu1 }
 0x566   :  { %431 = vadd.xlane.f32.xlu0 %v430_v52  ;;  %v981_v16 = vmul.f32 %v962_v12, %v962_v12  ;;  %v988_v0 = vsel %vm209_vm12, %v982_v14, 0.0 }
 0x567   :  { %v1603_v21 = vpop.f32.mrf.mxu1 }
 0x568   :  { %v984_v39 = vmul.f32 %v1603_v21, %v1603_v21  ;;  %v985_v18 = vsel %vm209_vm12, %v981_v16, 0.0 }
 0x569   :  { %v972_v19 = vpop.f32.mrf.mxu1 }
 0x56a   :  { %651 = vadd.xlane.f32.xlu0 %v650_v58  ;;  %v983_v24 = vmul.f32 %v972_v19, %v972_v19  ;;  %v994_v41 = vsel %vm209_vm12, %v984_v39, 0.0 }
 0x56c   :  { %v991_v17 = vsel %vm209_vm12, %v983_v24, 0.0 }
 0x56e   :  { %763 = vadd.xlane.f32.xlu0 %v762_v57 }
 0x572   :  { %877 = vadd.xlane.f32.xlu0 %v876_v22 }
 0x576   :  { %760 = vadd.xlane.f32.xlu0 %v759_v56 }
 0x57a   :  { %874 = vadd.xlane.f32.xlu0 %v873_v61 }
 0x57e   :  { %769 = vadd.xlane.f32.xlu0 %v768_v1 }
 0x582   :  { %883 = vadd.xlane.f32.xlu0 %v882_v3 }
 0x585   :  { %v215_v38 = vpop.xlane.xlu1 %214 }
 0x586   :  { %766 = vadd.xlane.f32.xlu0 %v765_v11 }
 0x589   :  { %v429_v35 = vpop.xlane.xlu1 %428 }
 0x58a   :  { %880 = vadd.xlane.f32.xlu0 %v879_v15 }
 0x58d   :  { %v426_v28 = vpop.xlane.xlu1 %425 }
 0x58e   :  { %989 = vadd.xlane.f32.xlu0 %v988_v0  ;;  %v436_v60 = vadd.f32 %v429_v35, %v426_v28 }
 0x591   :  { %v435_v22 = vpop.xlane.xlu1 %434 }
 0x592   :  { %986 = vadd.xlane.f32.xlu0 %v985_v18 }
 0x595   :  { %v655_v10 = vpop.xlane.xlu1 %654 }
 0x596   :  { %995 = vadd.xlane.f32.xlu0 %v994_v41 }
 0x59a   :  { %992 = vadd.xlane.f32.xlu0 %v991_v17 }
 0x59e   :  { %1391 = vadd.xlane.f32.xlu0 %v1390_v32 }
 0x5a2   :  { %1411 = vadd.xlane.f32.xlu0 %v1410_v26 }
 0x5a6   :  { %1449 = vadd.xlane.f32.xlu0 %v1448_v33 }
 0x5d7   :  { %v1352_v25 = vpop.xlane.xlu0 %1351 }
 0x5d8   :  { %1655 = vrsqrt.f32 %v1352_v25  ;;  %vm1355_vm9 = vcmp.eq.f32.partialorder %v1352_v25, inf  ;;  %v1358_v47 = vand.u32 2147483648, %v1352_v25  ;;  %vm1357_vm0 = vcmp.eq.f32.partialorder %v1352_v25, 0.0 }
 0x5db   :  { %v212_v23 = vpop.xlane.xlu0 %211  ;;  %v2079_v3 = vpop.xlane.xlu1 %1371 }
 0x5dc   :  { %v222_v5 = vadd.f32 %v215_v38, %v212_v23  ;;  %1657 = vrsqrt.f32 %v2079_v3  ;;  %vm1375_vm2 = vcmp.eq.f32.partialorder %v2079_v3, inf  ;;  %vm1377_vm4 = vcmp.eq.f32.partialorder %v2079_v3, 0.0 }
 0x5df   :  { %v221_v37 = vpop.xlane.xlu0 %220 }
 0x5e3   :  { %v218_v51 = vpop.xlane.xlu0 %217  ;;  %v1436_v15 = vpop.xlane.xlu1 %1435 }
 0x5e4   :  { %v223_v20 = vadd.f32 %v222_v5, %v218_v51  ;;  %v1437_v26 = vsel %vm117_vm8, %v1436_v15, 0.0 }
 0x5e5   :  { %v1656_v27 = vpop.eup %1655 }
 0x5e6   :  { %v1354_v43 = vmul.f32 %v1656_v27, %v1352_v25  ;;  %v224_v45 = vadd.f32 %v223_v20, %v221_v37  ;;  %v1438_v20 = vrot.slane %v1437_v26, 4 }
 0x5e7   :  { %v649_v48 = vpop.xlane.xlu0 %648  ;;  %v1466_v32 = vpop.xlane.xlu1 %1465 }
 0x5e8   :  { %v1356_v29 = vsel %vm1355_vm9, %v1352_v25, %v1354_v43  ;;  %v225_v12 = vrot.slane %v224_v45, 4  ;;  %v1467_v38 = vsel %vm117_vm8, %v1466_v32, 0.0 }
 0x5e9   :  { %v1359_v49 = vsel %vm1357_vm0, %v1358_v47, %v1356_v29 }
 0x5ea   :  { %v2077_v50 = vadd.f32 %v1359_v49, %v1340_v53  ;;  %v226_v19 = vadd.f32 %v225_v12, %v224_v45  ;;  %v1468_v45 = vrot.slane %v1467_v38, 4  ;;  %v1439_v49 = vadd.f32 %v1438_v20, %v1437_v26 }
 0x5eb   :  { %v646_v31 = vpop.xlane.xlu0 %645 }
 0x5ec   :  { %v656_v56 = vadd.f32 %v649_v48, %v646_v31  ;;  %v227_v36 = vrot.slane %v226_v19, 2 }
 0x5ee   :  { %v228_v43 = vadd.f32 %v227_v36, %v226_v19 }
 0x5ef   :  { %v432_v52 = vpop.xlane.xlu0 %431 }
 0x5f0   :  { %v437_v30 = vadd.f32 %v436_v60, %v432_v52 }
 0x5f2   :  { %v438_v1 = vadd.f32 %v437_v30, %v435_v22 }
 0x5f3   :  { %v652_v40 = vpop.xlane.xlu0 %651 }
 0x5f4   :  { %v657_v62 = vadd.f32 %v656_v56, %v652_v40  ;;  %v439_v13 = vrot.slane %v438_v1, 4 }
 0x5f6   :  { %v658_v7 = vadd.f32 %v657_v62, %v655_v10  ;;  %v440_v39 = vadd.f32 %v439_v13, %v438_v1 }
 0x5f7   :  { %v764_v55 = vpop.xlane.xlu0 %763 }
 0x5f8   :  { %v659_v0 = vrot.slane %v658_v7, 4  ;;  %v441_v33 = vrot.slane %v440_v39, 2 }
 0x5fa   :  { %v660_v41 = vadd.f32 %v659_v0, %v658_v7  ;;  %v442_v27 = vadd.f32 %v441_v33, %v440_v39 }
 0x5fb   :  { %v878_v58 = vpop.xlane.xlu0 %877 }
 0x5fc   :  { %v661_v4 = vrot.slane %v660_v41, 2  ;;  %v443_v31 = vrot.slane %v442_v27, 1 }
 0x5fe   :  { %v662_v48 = vadd.f32 %v661_v4, %v660_v41 }
 0x5ff   :  { %v761_v44 = vpop.xlane.xlu0 %760 }
 0x600   :  { %v771_v63 = vadd.f32 %v764_v55, %v761_v44  ;;  %v1658_v55 = vpop.eup %1657  ;;  %v1469_v44 = vadd.f32 %v1468_v45, %v1467_v38 }
 0x601   :  { %v1374_v22 = vmul.f32 %v1658_v55, %v2079_v3 }
 0x602   :  { %v1470_v30 = vrot.slane %v1469_v44, 2 }
 0x603   :  { %v875_v57 = vpop.xlane.xlu0 %874 }
 0x604   :  { %v885_v2 = vadd.f32 %v878_v58, %v875_v57  ;;  %v229_v58 = vrot.slane %v228_v43, 1  ;;  %v663_v57 = vrot.slane %v662_v48, 1  ;;  %v1471_v15 = vadd.f32 %v1470_v30, %v1469_v44 }
 0x606   :  { %v664_v62 = vadd.f32 %v663_v57, %v662_v48  ;;  %v1472_v33 = vrot.slane %v1471_v15, 1 }
 0x607   :  { %v770_v8 = vpop.xlane.xlu0 %769 }
 0x608   :  { %v665_v0 = vmul.f32 0.0009765625, %v664_v62 }
 0x60b   :  { %v884_v59 = vpop.xlane.xlu0 %883 }
 0x60f   :  { %v767_v9 = vpop.xlane.xlu0 %766 }
 0x610   :  { %v772_v34 = vadd.f32 %v771_v63, %v767_v9  ;;  %v444_v9 = vadd.f32 %v443_v31, %v442_v27 }
 0x612   :  { %v773_v14 = vadd.f32 %v772_v34, %v770_v8  ;;  %v445_v7 = vmul.f32 0.0009765625, %v444_v9 }
 0x613   :  { %v881_v61 = vpop.xlane.xlu0 %880 }
 0x614   :  { %v886_v11 = vadd.f32 %v885_v2, %v881_v61  ;;  %v774_v18 = vrot.slane %v773_v14, 4  ;;  %v230_v61 = vadd.f32 %v229_v58, %v228_v43  ;;  %v1473_v43 = vadd.f32 %v1472_v33, %v1471_v15 }
 0x616   :  { %v887_v21 = vadd.f32 %v886_v11, %v884_v59  ;;  %v775_v25 = vadd.f32 %v774_v18, %v773_v14  ;;  %v1440_v59 = vrot.slane %v1439_v49, 2  ;;  %v1378_v14 = vand.u32 2147483648, %v2079_v3 }
 0x617   :  { %v990_v6 = vpop.xlane.xlu0 %989  ;;  %v1474_v58 = vmul.f32 0.0078125, %v1473_v43 }
 0x618   :  { %v888_v17 = vrot.slane %v887_v21, 4  ;;  %v776_v42 = vrot.slane %v775_v25, 2  ;;  %v1441_v2 = vadd.f32 %v1440_v59, %v1439_v49 }
 0x61a   :  { %v889_v5 = vadd.f32 %v888_v17, %v887_v21  ;;  %v777_v52 = vadd.f32 %v776_v42, %v775_v25  ;;  %v1442_v19 = vrot.slane %v1441_v2, 1 }
 0x61b   :  { %v987_v16 = vpop.xlane.xlu0 %986 }
 0x61c   :  { %v997_v23 = vadd.f32 %v990_v6, %v987_v16  ;;  %v890_v29 = vrot.slane %v889_v5, 2  ;;  %v778_v60 = vrot.slane %v777_v52, 1  ;;  %v1376_v6 = vsel %vm1375_vm2, %v2079_v3, %v1374_v22 }
 0x61d   :  { %v232_v16 = vmul.f32 0.0009765625, %v230_v61  ;;  %v1379_v18 = vsel %vm1377_vm4, %v1378_v14, %v1376_v6  ;;  %v1443_v4 = vadd.f32 %v1442_v19, %v1441_v2 }
 0x61e   :  { %v891_v28 = vadd.f32 %v890_v29, %v889_v5  ;;  %v779_v11 = vadd.f32 %v778_v60, %v777_v52 }
 0x61f   :  { %v996_v24 = vpop.xlane.xlu0 %995  ;;  %v446_v41 = vadd.f32 %v445_v7, %v232_v16  ;;  %v1445_v49 = vmul.f32 0.0078125, %v1443_v4 }
 0x620   :  { %v892_v63 = vrot.slane %v891_v28, 1  ;;  %v780_v17 = vmul.f32 0.0009765625, %v779_v11 }
 0x621   :  { %v666_v36 = vadd.f32 %v665_v0, %v446_v41 }
 0x622   :  { %v893_v21 = vadd.f32 %v892_v63, %v891_v28 }
 0x623   :  { %v993_v37 = vpop.xlane.xlu0 %992  ;;  %v781_v20 = vadd.f32 %v780_v17, %v666_v36 }
 0x624   :  { %v998_v51 = vadd.f32 %v997_v23, %v993_v37  ;;  %v894_v3 = vmul.f32 0.0009765625, %v893_v21 }
 0x626   :  { %v999_v54 = vadd.f32 %v998_v51, %v996_v24 }
 0x627   :  { %v2084_v47 = vpop.xlane.xlu0 %1391 }
 0x628   :  { %v1000_v53 = vrot.slane %v999_v54, 4  ;;  %1659 = vrsqrt.f32 %v2084_v47  ;;  %v1398_v25 = vand.u32 2147483648, %v2084_v47  ;;  %vm1397_vm5 = vcmp.eq.f32.partialorder %v2084_v47, 0.0 }
 0x62a   :  { %v1001_v40 = vadd.f32 %v1000_v53, %v999_v54  ;;  %v1380_v54 = vadd.f32 %v1379_v18, %v2077_v50 }
 0x62b   :  { %v2087_v35 = vpop.xlane.xlu0 %1411 }
 0x62c   :  { %v1002_v8 = vrot.slane %v1001_v40, 2  ;;  %1661 = vrsqrt.f32 %v2087_v35  ;;  %vm1415_vm6 = vcmp.eq.f32.partialorder %v2087_v35, inf  ;;  %v1418_v45 = vand.u32 2147483648, %v2087_v35 }
 0x62d   :  { %vm1417_vm3 = vcmp.eq.f32.partialorder %v2087_v35, 0.0 }
 0x62e   :  { %v1003_v56 = vadd.f32 %v1002_v8, %v1001_v40 }
 0x62f   :  { %v1450_v10 = vpop.xlane.xlu0 %1449 }
 0x630   :  { %v1451_v1 = vsel %vm117_vm8, %v1450_v10, 0.0  ;;  %v1004_v13 = vrot.slane %v1003_v56, 1  ;;  %vm1395_vm8 = vcmp.eq.f32.partialorder %v2084_v47, inf }
 0x631   :  { %v1452_v34 = vrot.slane %v1451_v1, 4 }
 0x632   :  { %v1005_v32 = vadd.f32 %v1004_v13, %v1003_v56 }
 0x633   :  { %v1453_v12 = vadd.f32 %v1452_v34, %v1451_v1 }
 0x634   :  { %v1006_v27 = vmul.f32 0.0009765625, %v1005_v32 }
 0x635   :  { %v1660_v39 = vpop.eup %1659  ;;  %v1454_v24 = vrot.slane %v1453_v12, 2 }
 0x636   :  { %v1394_v26 = vmul.f32 %v1660_v39, %v2084_v47 }
 0x637   :  { %v1455_v23 = vadd.f32 %v1454_v24, %v1453_v12 }
 0x638   :  { %v1396_v37 = vsel %vm1395_vm8, %v2084_v47, %v1394_v26  ;;  %v895_v47 = vadd.f32 %v894_v3, %v781_v20 }
 0x639   :  { %v1662_v38 = vpop.eup %1661  ;;  %v1456_v5 = vrot.slane %v1455_v23, 1  ;;  %v1399_v51 = vsel %vm1397_vm5, %v1398_v25, %v1396_v37 }
 0x63a   :  { %v1414_v42 = vmul.f32 %v1662_v38, %v2087_v35  ;;  %v1400_v53 = vadd.f32 %v1399_v51, %v1380_v54  ;;  %v1007_v40 = vadd.f32 %v1006_v27, %v895_v47 }
 0x63b   :  { %v1457_v48 = vadd.f32 %v1456_v5, %v1455_v23 }
 0x63c   :  { %v1416_v29 = vsel %vm1415_vm6, %v2087_v35, %v1414_v42  ;;  %v1477_v8 = vmul.f32 0.3, %v1007_v40 }
 0x63d   :  { %v1458_v31 = vmul.f32 0.0078125, %v1457_v48  ;;  %v1419_v52 = vsel %vm1417_vm3, %v1418_v45, %v1416_v29 }
 0x63e   :  { %v1420_v55 = vadd.f32 %v1419_v52, %v1400_v53 }
 0x63f   :  { %v1459_v44 = vadd.f32 %v1458_v31, %v1445_v49 }
 0x640   :  { %v1421_v50 = vadd.f32 %v1420_v55, %v2047_v46 }
 0x641   :  { %v1475_v57 = vadd.f32 %v1474_v58, %v1459_v44 }
 0x642   :  { %v1423_v28 = vmul.f32 0.33333334, %v1421_v50 }
 0x643   :  { %v1476_v59 = vmul.f32 0.33333334, %v1475_v57 }
 0x644   :  { %v1478_v22 = vadd.f32 %v1477_v8, %v1423_v28 }
 0x646   :  { %v1479_v35 = vadd.f32 %v1478_v22, %v1476_v59 }
 0x648   :  { %1481 = vst.msk [vmem:[#allocation2] sm:$0x1] %vm1480_vm7, %v1479_v35 }
 0x649   :  { %1674 = shalt.err (!%p1671_p4)
}
 0x64a   :  { %1491 = dma.vmem_to_hbm [thread:$0]  %s1489_s19, 16, %s2113_s2, [#allocation3]  }
 0x64b   :  { %1683 = dma.done.wait [#allocation3], 16  }
 0x64c   :  { %1684 = vsyncadd [#allocation3], 4294967280 }
 0x64d   :  { %1495 = vsyncpa [#allocation3], 1 }

// kernel: misa_forward.3
= control target key start
LH: loop header
LB: loop body
LE: loop exit
PB: predicated region body
PF: predicated region fallthrough
CT: control target
= control target key end

     0   :  { %vm60_vm0 = vcmask 1045504   ;;  %v1857_v0 = vmov 0.0   ;;  %vm1858_vm1 = vmmov 0   ;;  %vm56_vm2 = vcmask 113664   ;;  %s1859_s21 = smov 96   ;;  %s1861_s23 = smov 32   ;;  %s2347_s1 = inlined_call_operand.vmem [shape: f32[3,14,32], index: 1, kind: input, shape index: {}]   ;;  %s2348_s0 = inlined_call_operand.vmem [shape: f32[3,4,14], index: 0, kind: input, shape index: {}]   ;;  %s2349_s3 = inlined_call_operand.vmem [shape: f32[3,32,32], index: 3, kind: input, shape index: {}]   ;;  %s2350_s5 = inlined_call_operand.vmem [shape: f32[3,32,32], index: 5, kind: input, shape index: {}]   ;;  %s2351_s2 = inlined_call_operand.vmem [shape: f32[3,1,32], index: 2, kind: input, shape index: {}]   ;;  %s2352_s4 = inlined_call_operand.vmem [shape: f32[3,1,32], index: 4, kind: input, shape index: {}]   ;;  %s2353_s6 = inlined_call_operand.vmem [shape: f32[3,1,32], index: 6, kind: input, shape index: {}]   ;;  %s2354_s9 = inlined_call_operand.vmem [shape: f32[3,32,64], index: 9, kind: input, shape index: {}]   ;;  %s2355_s7 = inlined_call_operand.vmem [shape: f32[3,1,32], index: 7, kind: input, shape index: {}]   ;;  %s2356_s8 = inlined_call_operand.vmem [shape: f32[3,1,32], index: 8, kind: input, shape index: {}]   ;;  %s2357_s11 = inlined_call_operand.vmem [shape: f32[3,32,32], index: 11, kind: input, shape index: {}]   ;;  %s2358_s10 = inlined_call_operand.vmem [shape: f32[3,1,64], index: 10, kind: input, shape index: {}]   ;;  %s2359_s13 = inlined_call_operand.vmem [shape: f32[4,192], index: 13, kind: output, shape index: {0}]   ;;  %s2360_s12 = inlined_call_operand.vmem [shape: f32[3,1,32], index: 12, kind: input, shape index: {}]   ;;  %s2361_s14 = inlined_call_operand.vmem [shape: f32[4,192], index: 14, kind: output, shape index: {1}]  }
   0x1   :  { %1681 = vmatprep.subr.mxu0 %v1857_v0  ;;  %v48_v1 = vld [vmem:[%s2347_s1 + $0x8] sm:$0x3f]  ;;  %v47_v2 = vld [vmem:[%s2347_s1] sm:$0xff]  ;;  %1685 = vmatprep.mubr.msk.f32.mxu0 %vm1858_vm1, %v1857_v0  ;;  %v138_v4 = vld [vmem:[%s2349_s3 + $0x18] sm:$0xff]  ;;  %vm146_vm3 = vcmask 261120   ;;  %vm306_vm4 = vcmask 257024  }
   0x2   :  { %1682 = vmatpush3.msk.msra.mxu0 %vm60_vm0, %v48_v1  ;;  %v46_v3 = vld [vmem:[%s2348_s0] sm:$0xf]  ;;  %1688 = vmatprep.subr.mxu1 %v1857_v0  ;;  %v137_v5 = vld [vmem:[%s2349_s3 + $0x10] sm:$0xff]  ;;  %v136_v6 = vld [vmem:[%s2349_s3 + $0x8] sm:$0xff]  ;;  %vm520_vm5 = vcmask 1044224   ;;  %vm1008_vm6 = vcmask 519424  }
   0x3   :  { %1683 = vmatprep.subr.mxu0 %v1857_v0  ;;  %1689 = vmatpush3.msra.mxu1 %v138_v4  ;;  %v135_v7 = vld [vmem:[%s2349_s3] sm:$0xff]  ;;  %v224_v8 = vld [vmem:[%s2350_s5 + $0x18] sm:$0xff]  ;;  %v223_v14 = vld [vmem:[%s2350_s5 + $0x10] sm:$0xff]  ;;  %vm1498_vm7 = vcmask 781824  }
   0x4   :  { %1684 = vmatpush3.msra.mxu0 %v47_v2  ;;  %1690 = vmatprep.subr.mxu1 %v1857_v0  ;;  %v1518_v9 = vld [vmem:[%s2351_s2] ss:$0 sm:$0xff]  ;;  %v222_v15 = vld [vmem:[%s2350_s5 + $0x8] sm:$0xff]  ;;  %v340_v33 = vld [vmem:[%s2354_s9 + $0x18] sm:$0xff] }
   0x5   :  { %1686 = vmatmul.mubr.msk.f32.vlgmr.msra.gmra.mxu0 %vm56_vm2, %v46_v3  ;;  %1696 = vmatprep.mubr.msk.f32.mxu1 %vm1858_vm1, %v1857_v0  ;;  %v221_v16 = vld [vmem:[%s2350_s5] sm:$0xff]  ;;  %v339_v34 = vld [vmem:[%s2354_s9 + $0x10] sm:$0xff]  ;;  %v338_v35 = vld [vmem:[%s2354_s9 + $0x8] sm:$0xff] }
   0x6   :  { %1699 = vmatprep.subr.mxu0 %v1857_v0  ;;  %1707 = vmatprep.mubr.msk.f32.mxu0 %vm1858_vm1, %v1857_v0  ;;  %v1521_v17 = vld [vmem:[%s2352_s4] ss:$0 sm:$0xff]  ;;  %v1534_v46 = vld [vmem:[%s2347_s1 + $0x18] sm:$0x3f]  ;;  %v1533_v47 = vld [vmem:[%s2347_s1 + $0x10] sm:$0xff] }
   0x7   :  { %1691 = vmatpush3.msra.mxu1 %v137_v5  ;;  %1700 = vmatpush3.msra.mxu0 %v224_v8  ;;  %v1523_v22 = vld [vmem:[%s2353_s6] ss:$0 sm:$0xff]  ;;  %v1532_v48 = vld [vmem:[%s2348_s0 + $0x4] sm:$0xf]  ;;  %v435_v49 = vld [vmem:[%s2357_s11 + $0x18] sm:$0xff] }
   0x8   :  { %1692 = vmatprep.subr.mxu1 %v1857_v0  ;;  %1701 = vmatprep.subr.mxu0 %v1857_v0  ;;  %v337_v36 = vld [vmem:[%s2354_s9] sm:$0xff]  ;;  %v434_v50 = vld [vmem:[%s2357_s11 + $0x10] sm:$0xff]  ;;  %v433_v51 = vld [vmem:[%s2357_s11 + $0x8] sm:$0xff] }
   0x9   :  { %1693 = vmatpush3.msra.mxu1 %v136_v6  ;;  %1702 = vmatpush3.msra.mxu0 %v223_v14  ;;  %v1525_v41 = vld [vmem:[%s2355_s7] ss:$0 sm:$0xff]  ;;  %v1536_v1 = vld [vmem:[%s2351_s2 + $0x1] ss:$0 sm:$0xff]  ;;  %v1542_v3 = vld [vmem:[%s2349_s3 + $0x38] sm:$0xff] }
   0xa   :  { %1694 = vmatprep.subr.mxu1 %v1857_v0  ;;  %1703 = vmatprep.subr.mxu0 %v1857_v0  ;;  %v1526_v43 = vld [vmem:[%s2356_s8] ss:$0 sm:$0xff]  ;;  %v1541_v5 = vld [vmem:[%s2349_s3 + $0x30] sm:$0xff]  ;;  %v1540_v6 = vld [vmem:[%s2349_s3 + $0x28] sm:$0xff] }
   0xb   :  { %1695 = vmatpush3.msra.mxu1 %v135_v7  ;;  %1704 = vmatpush3.msra.mxu0 %v222_v15  ;;  %v1527_v52 = vld [vmem:[%s2358_s10] ss:$0 sm:$0xff] }
   0xc   :  { %1710 = vmatprep.subr.mxu1 %v1857_v0  ;;  %1705 = vmatprep.subr.mxu0 %v1857_v0  ;;  %v432_v59 = vld [vmem:[%s2357_s11] sm:$0xff] }
   0xd   :  { %1706 = vmatpush3.msra.mxu0 %v221_v16  ;;  %v1539_v8 = vld [vmem:[%s2349_s3 + $0x20] sm:$0xff] }
   0xe   :  { %1721 = vmatprep.subr.mxu0 %v1857_v0 }
  0xc5   :  { %v130_v10 = vpop.f32.mrf.mxu0 }
  0xc6   :  { %v131_v11 = vadd.f32 %v1518_v9, %v130_v10  ;;  %v1549_v9 = vld [vmem:[%s2350_s5 + $0x38] sm:$0xff]  ;;  %v1548_v10 = vld [vmem:[%s2350_s5 + $0x30] sm:$0xff] }
  0xc7   :  { %v1687_v12 = vpop.f32.mrf.mxu0 }
  0xc8   :  { %v134_v13 = vmax.f32 %v131_v11, 0.0  ;;  %v1547_v11 = vld [vmem:[%s2350_s5 + $0x28] sm:$0xff]  ;;  %v1546_v12 = vld [vmem:[%s2350_s5 + $0x20] sm:$0xff] }
  0xca   :  { %1697 = vmatmul.mubr.msk.f32.vlgmr.msra.gmra.mxu1 %vm146_vm3, %v134_v13  ;;  %v1530_v13 = vld [vmem:[%s2360_s12] ss:$0 sm:$0xff] }
  0xcb   :  { %1718 = vmatprep.mubr.msk.f32.mxu1 %vm1858_vm1, %v1857_v0  ;;  %1711 = vmatpush3.msra.mxu1 %v340_v33  ;;  %v1560_v33 = vld [vmem:[%s2354_s9 + $0x38] sm:$0xff] }
  0xcc   :  { %1712 = vmatprep.subr.mxu1 %v1857_v0 }
  0xcd   :  { %1713 = vmatpush3.msra.mxu1 %v339_v34  ;;  %v1559_v34 = vld [vmem:[%s2354_s9 + $0x30] sm:$0xff] }
  0xce   :  { %1714 = vmatprep.subr.mxu1 %v1857_v0 }
  0xcf   :  { %1715 = vmatpush3.msra.mxu1 %v338_v35  ;;  %v1558_v35 = vld [vmem:[%s2354_s9 + $0x28] sm:$0xff] }
  0xd0   :  { %1716 = vmatprep.subr.mxu1 %v1857_v0 }
  0xd1   :  { %1717 = vmatpush3.msra.mxu1 %v337_v36  ;;  %v1557_v36 = vld [vmem:[%s2354_s9 + $0x20] sm:$0xff] }
  0xd2   :  { %1732 = vmatprep.subr.mxu1 %v1857_v0 }
 0x18a   :  { %v216_v18 = vpop.f32.mrf.mxu1 }
 0x18b   :  { %v217_v19 = vadd.f32 %v1521_v17, %v216_v18  ;;  %v1544_v17 = vld [vmem:[%s2352_s4 + $0x1] ss:$0 sm:$0xff] }
 0x18c   :  { %v1698_v20 = vpop.f32.mrf.mxu1 }
 0x18d   :  { %v220_v21 = vmax.f32 %v217_v19, 0.0 }
 0x18f   :  { %1708 = vmatmul.mubr.msk.f32.vlgmr.msra.gmra.mxu0 %vm146_vm3, %v220_v21 }
 0x190   :  { %1729 = vmatprep.mubr.msk.f32.mxu0 %vm1858_vm1, %v1857_v0  ;;  %1722 = vmatpush3.msra.mxu0 %v435_v49  ;;  %v1572_v49 = vld [vmem:[%s2348_s0 + $0x8] sm:$0xf] }
 0x191   :  { %1723 = vmatprep.subr.mxu0 %v1857_v0 }
 0x192   :  { %1724 = vmatpush3.msra.mxu0 %v434_v50  ;;  %v1568_v50 = vld [vmem:[%s2357_s11 + $0x38] sm:$0xff] }
 0x193   :  { %1725 = vmatprep.subr.mxu0 %v1857_v0 }
 0x194   :  { %1726 = vmatpush3.msra.mxu0 %v433_v51  ;;  %v1567_v51 = vld [vmem:[%s2357_s11 + $0x30] sm:$0xff] }
 0x195   :  { %1727 = vmatprep.subr.mxu0 %v1857_v0 }
 0x196   :  { %1728 = vmatpush3.msra.mxu0 %v432_v59 }
 0x197   :  { %1739 = vmatprep.subr.mxu0 %v1857_v0 }
 0x24f   :  { %v301_v23 = vpop.f32.mrf.mxu0 }
 0x250   :  { %v302_v24 = vadd.f32 %v1523_v22, %v301_v23  ;;  %v1551_v22 = vld [vmem:[%s2353_s6 + $0x1] ss:$0 sm:$0xff] }
 0x251   :  { %v1709_v25 = vpop.f32.mrf.mxu0 }
 0x252   :  { %v305_v26 = vmax.f32 %v302_v24, 0.0 }
 0x254   :  { %v307_v27 = vsel %vm306_vm4, %v305_v26, 0.0 }
 0x255   :  { %308 = vadd.xlane.f32.xlu0 %v307_v27 }
 0x2de   :  { %v309_v28 = vpop.xlane.xlu0 %308 }
 0x2df   :  { %v311_v29 = vmul.f32 0.03125, %v309_v28 }
 0x2e1   :  { %v312_v30 = vsub.f32 %v305_v26, %v311_v29 }
 0x2e3   :  { %v313_v31 = vmul.f32 %v312_v30, %v312_v30 }
 0x2e5   :  { %v314_v32 = vsel %vm306_vm4, %v313_v31, 0.0 }
 0x2e6   :  { %315 = vadd.xlane.f32.xlu0 %v314_v32 }
 0x36f   :  { %v316_v37 = vpop.xlane.xlu0 %315 }
 0x370   :  { %v317_v38 = vmul.f32 0.03125, %v316_v37 }
 0x372   :  { %v318_v39 = vadd.f32 1e-05, %v317_v38 }
 0x374   :  { %1839 = vrsqrt.f32 %v318_v39 }
 0x381   :  { %v1840_v40 = vpop.eup %1839 }
 0x382   :  { %v320_v42 = vmul.f32 %v1840_v40, %v312_v30 }
 0x384   :  { %v328_v44 = vmul.f32 %v1525_v41, %v320_v42  ;;  %v1554_v41 = vld [vmem:[%s2355_s7 + $0x1] ss:$0 sm:$0xff] }
 0x386   :  { %v2029_v45 = vadd.f32 %v1526_v43, %v328_v44  ;;  %v1556_v43 = vld [vmem:[%s2356_s8 + $0x1] ss:$0 sm:$0xff] }
 0x388   :  { %1719 = vmatmul.mubr.msk.f32.vlgmr.msra.gmra.mxu1 %vm146_vm3, %v2029_v45 }
 0x389   :  { %1733 = vmatpush3.msk.msra.mxu1 %vm60_vm0, %v1534_v46  ;;  %1736 = vmatprep.mubr.msk.f32.mxu1 %vm1858_vm1, %v1857_v0 }
 0x38a   :  { %1734 = vmatprep.subr.mxu1 %v1857_v0 }
 0x38b   :  { %1735 = vmatpush3.msra.mxu1 %v1533_v47  ;;  %v1574_v47 = vld [vmem:[%s2347_s1 + $0x28] sm:$0x3f] }
 0x38c   :  { %1737 = vmatmul.mubr.msk.f32.vlgmr.msra.gmra.mxu1 %vm56_vm2, %v1532_v48  ;;  %1750 = vmatprep.subr.mxu1 %v1857_v0  ;;  %v1573_v48 = vld [vmem:[%s2347_s1 + $0x20] sm:$0xff] }
 0x38d   :  { %1758 = vmatprep.mubr.msk.f32.mxu1 %vm1858_vm1, %v1857_v0  ;;  %1751 = vmatpush3.msra.mxu1 %v1549_v9 }
 0x38e   :  { %1752 = vmatprep.subr.mxu1 %v1857_v0 }
 0x38f   :  { %1753 = vmatpush3.msra.mxu1 %v1548_v10  ;;  %v1579_v10 = vld [vmem:[%s2349_s3 + $0x40] sm:$0xff] }
 0x390   :  { %1754 = vmatprep.subr.mxu1 %v1857_v0 }
 0x391   :  { %1755 = vmatpush3.msra.mxu1 %v1547_v11  ;;  %v1589_v11 = vld [vmem:[%s2350_s5 + $0x58] sm:$0xff] }
 0x392   :  { %1756 = vmatprep.subr.mxu1 %v1857_v0 }
 0x393   :  { %1757 = vmatpush3.msra.mxu1 %v1546_v12  ;;  %v1588_v12 = vld [vmem:[%s2350_s5 + $0x50] sm:$0xff] }
 0x394   :  { %1772 = vmatprep.subr.mxu1 %v1857_v0 }
 0x448   :  { %v417_v53 = vpop.f32.mrf.mxu1 }
 0x449   :  { %v418_v54 = vadd.f32 %v1527_v52, %v417_v53  ;;  %v1566_v52 = vld [vmem:[%s2357_s11 + $0x28] sm:$0xff]  ;;  %v1562_v53 = vld [vmem:[%s2358_s10 + $0x1] ss:$0 sm:$0xff] }
 0x44a   :  { %v1720_v55 = vpop.f32.mrf.mxu1 }
 0x44b   :  { %v1529_v56 = vmul.f32 -1.442695, %v418_v54 }
 0x44c   :  { %v612_v60 = vpop.f32.mrf.mxu1 }
 0x44d   :  { %1841 = vpow2.f32 %v1529_v56  ;;  %v613_v4 = vadd.f32 %v1536_v1, %v612_v60  ;;  %v1565_v60 = vld [vmem:[%s2357_s11 + $0x20] sm:$0xff] }
 0x44e   :  { %v1738_v61 = vpop.f32.mrf.mxu1 }
 0x44f   :  { %v616_v7 = vmax.f32 %v613_v4, 0.0 }
 0x45a   :  { %v1842_v57 = vpop.eup %1841 }
 0x45b   :  { %v424_v58 = vadd.f32 1.0, %v1842_v57 }
 0x45d   :  { %1843 = vrcp.f32 %v424_v58 }
 0x46a   :  { %v2069_v62 = vpop.eup %1843 }
 0x46b   :  { %428 = vrot.lane.b32.xlu1 %v2069_v62, %s1859_s21  ;;  %516 = vst.msk [vmem:[%s2359_s13] sm:$0xf] %vm306_vm4, %v2069_v62 }
 0x4dd   :  { %v429_v63 = vpop.permute.xlu1 %428 }
 0x4de   :  { %v431_v2 = vadd.f32 %v2069_v62, %v429_v63 }
 0x4e0   :  { %1730 = vmatmul.mubr.msk.f32.vlgmr.msra.gmra.mxu0 %vm146_vm3, %v431_v2 }
 0x4e1   :  { %1740 = vmatpush3.msra.mxu0 %v1542_v3  ;;  %1747 = vmatprep.mubr.msk.f32.mxu0 %vm1858_vm1, %v1857_v0  ;;  %v1576_v3 = vld [vmem:[%s2351_s2 + $0x2] ss:$0 sm:$0xff] }
 0x4e2   :  { %1741 = vmatprep.subr.mxu0 %v1857_v0 }
 0x4e3   :  { %1742 = vmatpush3.msra.mxu0 %v1541_v5  ;;  %v1582_v5 = vld [vmem:[%s2349_s3 + $0x58] sm:$0xff] }
 0x4e4   :  { %1743 = vmatprep.subr.mxu0 %v1857_v0 }
 0x4e5   :  { %1744 = vmatpush3.msra.mxu0 %v1540_v6 }
 0x4e6   :  { %1745 = vmatprep.subr.mxu0 %v1857_v0 }
 0x4e7   :  { %1746 = vmatpush3.msra.mxu0 %v1539_v8  ;;  %v1580_v8 = vld [vmem:[%s2349_s3 + $0x48] sm:$0xff] }
 0x4e8   :  { %1748 = vmatmul.mubr.msk.f32.vlgmr.msra.gmra.mxu0 %vm146_vm3, %v616_v7  ;;  %1761 = vmatprep.subr.mxu0 %v1857_v0  ;;  %v1581_v7 = vld [vmem:[%s2349_s3 + $0x50] sm:$0xff] }
 0x4e9   :  { %1769 = vmatprep.mubr.msk.f32.mxu0 %vm1858_vm1, %v1857_v0  ;;  %1762 = vmatpush3.msra.mxu0 %v1560_v33 }
 0x4ea   :  { %1763 = vmatprep.subr.mxu0 %v1857_v0 }
 0x4eb   :  { %1764 = vmatpush3.msra.mxu0 %v1559_v34  ;;  %v1600_v34 = vld [vmem:[%s2354_s9 + $0x58] sm:$0xff] }
 0x4ec   :  { %1765 = vmatprep.subr.mxu0 %v1857_v0 }
 0x4ed   :  { %1766 = vmatpush3.msra.mxu0 %v1558_v35  ;;  %v1598_v35 = vld [vmem:[%s2354_s9 + $0x48] sm:$0xff] }
 0x4ee   :  { %1767 = vmatprep.subr.mxu0 %v1857_v0 }
 0x4ef   :  { %1768 = vmatpush3.msra.mxu0 %v1557_v36  ;;  %v1597_v36 = vld [vmem:[%s2354_s9 + $0x40] sm:$0xff] }
 0x4f0   :  { %1783 = vmatprep.subr.mxu0 %v1857_v0 }
 0x5a0   :  { %v512_v14 = vpop.f32.mrf.mxu0 }
 0x5a1   :  { %v513_v15 = vadd.f32 %v1530_v13, %v512_v14  ;;  %v1587_v13 = vld [vmem:[%s2350_s5 + $0x48] sm:$0xff]  ;;  %v1586_v14 = vld [vmem:[%s2350_s5 + $0x40] sm:$0xff] }
 0x5a2   :  { %v1731_v16 = vpop.f32.mrf.mxu0 }
 0x5a3   :  { %522 = vst.msk [vmem:[%s2361_s14] sm:$0xf] %vm306_vm4, %v513_v15 }
 0x5a8   :  { %v699_v18 = vpop.f32.mrf.mxu0 }
 0x5a9   :  { %v700_v19 = vadd.f32 %v1544_v17, %v699_v18  ;;  %v1584_v17 = vld [vmem:[%s2352_s4 + $0x2] ss:$0 sm:$0xff]  ;;  %s1860_s4 = smov 64  }
 0x5aa   :  { %v1749_v20 = vpop.f32.mrf.mxu0 }
 0x5ab   :  { %v703_v21 = vmax.f32 %v700_v19, 0.0 }
 0x5ad   :  { %1759 = vmatmul.mubr.msk.f32.vlgmr.msra.gmra.mxu1 %vm146_vm3, %v703_v21 }
 0x5ae   :  { %1780 = vmatprep.mubr.msk.f32.mxu1 %vm1858_vm1, %v1857_v0  ;;  %1773 = vmatpush3.msra.mxu1 %v1568_v50  ;;  %v1602_v50 = vld [vmem:[%s2358_s10 + $0x2] ss:$0 sm:$0xff] }
 0x5af   :  { %1774 = vmatprep.subr.mxu1 %v1857_v0 }
 0x5b0   :  { %1775 = vmatpush3.msra.mxu1 %v1567_v51 }
 0x5b1   :  { %1776 = vmatprep.subr.mxu1 %v1857_v0 }
 0x5b2   :  { %1777 = vmatpush3.msra.mxu1 %v1566_v52 }
 0x5b3   :  { %1778 = vmatprep.subr.mxu1 %v1857_v0 }
 0x5b4   :  { %1779 = vmatpush3.msra.mxu1 %v1565_v60 }
 0x5b5   :  { %1790 = vmatprep.subr.mxu1 %v1857_v0 }
 0x66d   :  { %v786_v23 = vpop.f32.mrf.mxu1 }
 0x66e   :  { %v787_v24 = vadd.f32 %v1551_v22, %v786_v23  ;;  %v1591_v22 = vld [vmem:[%s2353_s6 + $0x2] ss:$0 sm:$0xff] }
 0x66f   :  { %v1760_v25 = vpop.f32.mrf.mxu1 }
 0x670   :  { %v790_v26 = vmax.f32 %v787_v24, 0.0 }
 0x672   :  { %v791_v27 = vsel %vm306_vm4, %v790_v26, 0.0 }
 0x673   :  { %792 = vadd.xlane.f32.xlu1 %v791_v27 }
 0x6fc   :  { %v793_v28 = vpop.xlane.xlu1 %792 }
 0x6fd   :  { %v794_v29 = vmul.f32 0.03125, %v793_v28 }
 0x6ff   :  { %v795_v30 = vsub.f32 %v790_v26, %v794_v29 }
 0x701   :  { %v796_v31 = vmul.f32 %v795_v30, %v795_v30 }
 0x703   :  { %v797_v32 = vsel %vm306_vm4, %v796_v31, 0.0 }
 0x704   :  { %798 = vadd.xlane.f32.xlu0 %v797_v32 }
 0x78d   :  { %v799_v37 = vpop.xlane.xlu0 %798 }
 0x78e   :  { %v800_v38 = vmul.f32 0.03125, %v799_v37 }
 0x790   :  { %v801_v39 = vadd.f32 1e-05, %v800_v38 }
 0x792   :  { %1845 = vrsqrt.f32 %v801_v39 }
 0x79f   :  { %v1846_v40 = vpop.eup %1845 }
 0x7a0   :  { %v803_v42 = vmul.f32 %v1846_v40, %v795_v30 }
 0x7a2   :  { %v812_v44 = vmul.f32 %v1554_v41, %v803_v42  ;;  %v1594_v41 = vld [vmem:[%s2355_s7 + $0x2] ss:$0 sm:$0xff] }
 0x7a4   :  { %v821_v46 = vadd.f32 %v1556_v43, %v812_v44  ;;  %v1596_v43 = vld [vmem:[%s2356_s8 + $0x2] ss:$0 sm:$0xff] }
 0x7a6   :  { %1770 = vmatmul.mubr.msk.f32.vlgmr.msra.gmra.mxu0 %vm146_vm3, %v821_v46  ;;  %1016 = vst.msk [vmem:[%s2361_s14 + $0x4] sm:$0xf] %vm306_vm4, %v821_v46 }
 0x7a7   :  { %1784 = vmatpush3.msk.msra.mxu0 %vm60_vm0, %v1574_v47  ;;  %1787 = vmatprep.mubr.msk.f32.mxu0 %vm1858_vm1, %v1857_v0  ;;  %v1608_v47 = vld [vmem:[%s2357_s11 + $0x58] sm:$0xff] }
 0x7a8   :  { %1785 = vmatprep.subr.mxu0 %v1857_v0 }
 0x7a9   :  { %1786 = vmatpush3.msra.mxu0 %v1573_v48  ;;  %v1607_v48 = vld [vmem:[%s2357_s11 + $0x50] sm:$0xff] }
 0x7aa   :  { %1788 = vmatmul.mubr.msk.f32.vlgmr.msra.gmra.mxu0 %vm56_vm2, %v1572_v49  ;;  %1801 = vmatprep.subr.mxu0 %v1857_v0  ;;  %v1606_v49 = vld [vmem:[%s2357_s11 + $0x48] sm:$0xff] }
 0x7ab   :  { %1809 = vmatprep.mubr.msk.f32.mxu0 %vm1858_vm1, %v1857_v0  ;;  %1802 = vmatpush3.msra.mxu0 %v1589_v11 }
 0x7ac   :  { %1803 = vmatprep.subr.mxu0 %v1857_v0 }
 0x7ad   :  { %1804 = vmatpush3.msra.mxu0 %v1588_v12 }
 0x7ae   :  { %1805 = vmatprep.subr.mxu0 %v1857_v0 }
 0x7af   :  { %1806 = vmatpush3.msra.mxu0 %v1587_v13 }
 0x7b0   :  { %1807 = vmatprep.subr.mxu0 %v1857_v0 }
 0x7b1   :  { %1808 = vmatpush3.msra.mxu0 %v1586_v14 }
 0x7b2   :  { %1823 = vmatprep.subr.mxu0 %v1857_v0 }
 0x866   :  { %v904_v54 = vpop.f32.mrf.mxu0 }
 0x867   :  { %v905_v55 = vadd.f32 %v1562_v53, %v904_v54 }
 0x868   :  { %v1771_v56 = vpop.f32.mrf.mxu0 }
 0x869   :  { %v1564_v57 = vmul.f32 -1.442695, %v905_v55 }
 0x86a   :  { %v1102_v61 = vpop.f32.mrf.mxu0 }
 0x86b   :  { %1847 = vpow2.f32 %v1564_v57  ;;  %v1103_v6 = vadd.f32 %v1576_v3, %v1102_v61  ;;  %v1605_v57 = vld [vmem:[%s2357_s11 + $0x40] sm:$0xff] }
 0x86c   :  { %v1789_v63 = vpop.f32.mrf.mxu0  ;;  %v1610_v3 = vld [vmem:[%s2360_s12 + $0x2] ss:$0 sm:$0xff] }
 0x86d   :  { %v1106_v9 = vmax.f32 %v1103_v6, 0.0 }
 0x878   :  { %v1848_v58 = vpop.eup %1847 }
 0x879   :  { %v911_v59 = vadd.f32 1.0, %v1848_v58 }
 0x87b   :  { %1849 = vrcp.f32 %v911_v59 }
 0x888   :  { %v2201_v1 = vpop.eup %1849 }
 0x889   :  { %915 = vrot.lane.b32.xlu0 %v2201_v1, %s1859_s21 }
 0x8fb   :  { %v916_v2 = vpop.permute.xlu0 %915 }
 0x8fc   :  { %v918_v4 = vadd.f32 %v2201_v1, %v916_v2  ;;  %1010 = vst.msk [vmem:[%s2359_s13 + $0x4] sm:$0xf] %vm306_vm4, %v916_v2 }
 0x8fe   :  { %1781 = vmatmul.mubr.msk.f32.vlgmr.msra.gmra.mxu1 %vm146_vm3, %v918_v4 }
 0x8ff   :  { %1791 = vmatpush3.msra.mxu1 %v1582_v5  ;;  %1798 = vmatprep.mubr.msk.f32.mxu1 %vm1858_vm1, %v1857_v0 }
 0x900   :  { %1792 = vmatprep.subr.mxu1 %v1857_v0 }
 0x901   :  { %1793 = vmatpush3.msra.mxu1 %v1581_v7 }
 0x902   :  { %1794 = vmatprep.subr.mxu1 %v1857_v0 }
 0x903   :  { %1795 = vmatpush3.msra.mxu1 %v1580_v8 }
 0x904   :  { %1796 = vmatprep.subr.mxu1 %v1857_v0 }
 0x905   :  { %1797 = vmatpush3.msra.mxu1 %v1579_v10 }
 0x906   :  { %1799 = vmatmul.mubr.msk.f32.vlgmr.msra.gmra.mxu1 %vm146_vm3, %v1106_v9  ;;  %1812 = vmatprep.subr.mxu1 %v1857_v0 }
 0x907   :  { %1820 = vmatprep.mubr.msk.f32.mxu1 %vm1858_vm1, %v1857_v0  ;;  %1813 = vmatpush3.msra.mxu1 %v1600_v34 }
 0x908   :  { %1814 = vmatprep.subr.mxu1 %v1857_v0 }
 0x9be   :  { %v2251_v15 = vpop.f32.mrf.mxu1 }
 0x9c0   :  { %v1782_v16 = vpop.f32.mrf.mxu1 }
 0x9c6   :  { %v1189_v18 = vpop.f32.mrf.mxu1 }
 0x9c7   :  { %v1190_v19 = vadd.f32 %v1584_v17, %v1189_v18 }
 0x9c8   :  { %v1800_v20 = vpop.f32.mrf.mxu1 }
 0x9c9   :  { %v1193_v21 = vmax.f32 %v1190_v19, 0.0 }
 0x9cb   :  { %1810 = vmatmul.mubr.msk.f32.vlgmr.msra.gmra.mxu0 %vm146_vm3, %v1193_v21 }
 0x9cc   :  { %1831 = vmatprep.mubr.msk.f32.mxu0 %vm1858_vm1, %v1857_v0  ;;  %1824 = vmatpush3.msra.mxu0 %v1608_v47 }
 0x9cd   :  { %1825 = vmatprep.subr.mxu0 %v1857_v0 }
 0x9ce   :  { %1826 = vmatpush3.msra.mxu0 %v1607_v48 }
 0x9cf   :  { %1827 = vmatprep.subr.mxu0 %v1857_v0 }
 0x9d0   :  { %1828 = vmatpush3.msra.mxu0 %v1606_v49 }
 0x9d1   :  { %1829 = vmatprep.subr.mxu0 %v1857_v0 }
 0x9d2   :  { %1830 = vmatpush3.msra.mxu0 %v1605_v57 }
 0xa8b   :  { %v1276_v23 = vpop.f32.mrf.mxu0 }
 0xa8c   :  { %v1277_v24 = vadd.f32 %v1591_v22, %v1276_v23 }
 0xa8d   :  { %v1811_v25 = vpop.f32.mrf.mxu0 }
 0xa8e   :  { %v1280_v26 = vmax.f32 %v1277_v24, 0.0 }
 0xa90   :  { %v1281_v27 = vsel %vm306_vm4, %v1280_v26, 0.0 }
 0xa91   :  { %1282 = vadd.xlane.f32.xlu0 %v1281_v27 }
 0xaa7   :  { %523 = vrot.lane.b32.xlu0 %v2029_v45, %s1859_s21  ;;  %v1599_v45 = vld [vmem:[%s2354_s9 + $0x50] sm:$0xff] }
 0xaa8   :  { %1815 = vmatpush3.msra.mxu1 %v1599_v45 }
 0xaa9   :  { %1816 = vmatprep.subr.mxu1 %v1857_v0 }
 0xaaa   :  { %1817 = vmatpush3.msra.mxu1 %v1598_v35 }
 0xaab   :  { %1818 = vmatprep.subr.mxu1 %v1857_v0  ;;  %v1570_v0 = vld [vmem:[%s2360_s12 + $0x1] ss:$0 sm:$0xff] }
 0xaac   :  { %1819 = vmatpush3.msra.mxu1 %v1597_v36  ;;  %v1002_v59 = vadd.f32 %v1570_v0, %v2251_v15 }
 0xb1a   :  { %v1283_v28 = vpop.xlane.xlu0 %1282 }
 0xb1b   :  { %v1284_v29 = vmul.f32 0.03125, %v1283_v28 }
 0xb1d   :  { %v1285_v30 = vsub.f32 %v1280_v26, %v1284_v29 }
 0xb1e   :  { %v524_v31 = vpop.permute.xlu0 %523 }
 0xb1f   :  { %526 = vst.msk [vmem:[%s2361_s14] sm:$0xf] %vm520_vm5, %v524_v31  ;;  %v1286_v32 = vmul.f32 %v1285_v30, %v1285_v30 }
 0xb21   :  { %v1287_v33 = vsel %vm306_vm4, %v1286_v32, 0.0 }
 0xb22   :  { %1288 = vadd.xlane.f32.xlu1 %v1287_v33 }
 0xbab   :  { %v1289_v37 = vpop.xlane.xlu1 %1288 }
 0xbac   :  { %v1290_v38 = vmul.f32 0.03125, %v1289_v37 }
 0xbae   :  { %v1291_v39 = vadd.f32 1e-05, %v1290_v38 }
 0xbb0   :  { %1851 = vrsqrt.f32 %v1291_v39 }
 0xbbd   :  { %v1852_v40 = vpop.eup %1851 }
 0xbbe   :  { %v1293_v42 = vmul.f32 %v1852_v40, %v1285_v30 }
 0xbc0   :  { %v1302_v44 = vmul.f32 %v1594_v41, %v1293_v42 }
 0xbc2   :  { %v1311_v46 = vadd.f32 %v1596_v43, %v1302_v44 }
 0xbc4   :  { %1821 = vmatmul.mubr.msk.f32.vlgmr.msra.gmra.mxu1 %vm146_vm3, %v1311_v46 }
 0xc84   :  { %v1394_v51 = vpop.f32.mrf.mxu1 }
 0xc85   :  { %v1395_v52 = vadd.f32 %v1602_v50, %v1394_v51 }
 0xc86   :  { %v1822_v53 = vpop.f32.mrf.mxu1 }
 0xc87   :  { %v1604_v54 = vmul.f32 -1.442695, %v1395_v52 }
 0xc89   :  { %1853 = vpow2.f32 %v1604_v54 }
 0xc96   :  { %v1854_v55 = vpop.eup %1853 }
 0xc97   :  { %v1401_v56 = vadd.f32 1.0, %v1854_v55 }
 0xc99   :  { %1855 = vrcp.f32 %v1401_v56 }
 0xca6   :  { %v1856_v58 = vpop.eup %1855 }
 0xca7   :  { %1405 = vrot.lane.b32.xlu1 %v1856_v58, %s1859_s21  ;;  %1500 = vst.msk [vmem:[%s2359_s13 + $0x4] sm:$0xf] %vm1008_vm6, %v1856_v58 }
 0xcab   :  { %517 = vrot.lane.b32.xlu1 %v2069_v62, %s1860_s4 }
 0xcaf   :  { %1005 = vrot.lane.b32.xlu1 %v2201_v1, %s1861_s23 }
 0xcb3   :  { %1012 = vrot.lane.b32.xlu1 %v1002_v59, %s1861_s23 }
 0xcb7   :  { %1495 = vrot.lane.b32.xlu1 %v1856_v58, %s1860_s4 }
 0xd19   :  { %v1406_v60 = vpop.permute.xlu1 %1405 }
 0xd1a   :  { %v1408_v61 = vadd.f32 %v1856_v58, %v1406_v60 }
 0xd1c   :  { %1832 = vmatmul.mubr.msk.f32.vlgmr.msra.gmra.mxu0 %vm146_vm3, %v1408_v61 }
 0xd1d   :  { %v518_v63 = vpop.permute.xlu1 %517 }
 0xd1e   :  { %521 = vst.msk [vmem:[%s2359_s13] sm:$0xf] %vm520_vm5, %v518_v63 }
 0xd21   :  { %v1006_v62 = vpop.permute.xlu1 %1005 }
 0xd22   :  { %1009 = vst.msk [vmem:[%s2359_s13] sm:$0xf] %vm1008_vm6, %v1006_v62 }
 0xd25   :  { %v1013_v1 = vpop.permute.xlu1 %1012 }
 0xd26   :  { %1015 = vst.msk [vmem:[%s2361_s14] sm:$0xf] %vm1008_vm6, %v1013_v1 }
 0xd29   :  { %v1496_v2 = vpop.permute.xlu1 %1495 }
 0xd2a   :  { %1499 = vst.msk [vmem:[%s2359_s13] sm:$0xf] %vm1498_vm7, %v1496_v2 }
 0xddc   :  { %v1491_v4 = vpop.f32.mrf.mxu0 }
 0xddd   :  { %v1492_v5 = vadd.f32 %v1610_v3, %v1491_v4 }
 0xdde   :  { %v1833_v6 = vpop.f32.mrf.mxu0 }
 0xddf   :  { %1502 = vrot.lane.b32.xlu1 %v1492_v5, %s1860_s4 }
 0xde3   :  { %1506 = vrot.lane.b32.xlu1 %v1311_v46, %s1861_s23 }
 0xe51   :  { %v1503_v7 = vpop.permute.xlu1 %1502 }
 0xe52   :  { %1505 = vst.msk [vmem:[%s2361_s14] sm:$0xf] %vm1498_vm7, %v1503_v7 }
 0xe55   :  { %v1507_v8 = vpop.permute.xlu1 %1506 }
 0xe56   :  { %1509 = vst.msk [vmem:[%s2361_s14 + $0x4] sm:$0xf] %vm1008_vm6, %v1507_v8 }

// kernel: misa_forward.4
= control target key start
LH: loop header
LB: loop body
LE: loop exit
PB: predicated region body
PF: predicated region fallthrough
CT: control target
= control target key end

     0   :  { %s5562_s0 = inlined_call_operand.vmem [shape: f32[4,6,32], index: 0, kind: input, shape index: {}]   ;;  %s5563_s1 = inlined_call_operand.vmem [shape: f32[32,96], index: 1, kind: input, shape index: {}]   ;;  %s5564_s2 = inlined_call_operand.vmem [shape: f32[1,96], index: 2, kind: input, shape index: {}]   ;;  %s5565_s3 = inlined_call_operand.vmem [shape: f32[32,32], index: 3, kind: input, shape index: {}]   ;;  %s5566_s4 = inlined_call_operand.vmem [shape: f32[1,32], index: 4, kind: input, shape index: {}]   ;;  %s5567_s5 = inlined_call_operand.vmem [shape: f32[1,32], index: 5, kind: input, shape index: {}]   ;;  %s5568_s6 = inlined_call_operand.vmem [shape: f32[1,32], index: 6, kind: input, shape index: {}]   ;;  %s5569_s7 = inlined_call_operand.vmem [shape: bf16[32,2048], index: 7, kind: input, shape index: {}]   ;;  %s5570_s8 = inlined_call_operand.vmem [shape: f32[1,2048], index: 8, kind: input, shape index: {}]   ;;  %s5571_s9 = inlined_call_operand.vmem [shape: bf16[2048,32], index: 9, kind: input, shape index: {}]   ;;  %s5572_s10 = inlined_call_operand.vmem [shape: f32[1,32], index: 10, kind: input, shape index: {}]   ;;  %s5573_s11 = inlined_call_operand.vmem [shape: f32[1,32], index: 11, kind: input, shape index: {}]   ;;  %s5574_s12 = inlined_call_operand.vmem [shape: f32[1,32], index: 12, kind: input, shape index: {}]   ;;  %s5575_s13 = inlined_call_operand.vmem [shape: f32[192,96], index: 13, kind: input, shape index: {}]   ;;  %s5576_s14 = inlined_call_operand.vmem [shape: f32[1,96], index: 14, kind: input, shape index: {}]   ;;  %s5577_s15 = inlined_call_operand.vmem [shape: f32[96,16], index: 15, kind: input, shape index: {}]   ;;  %s5578_s16 = inlined_call_operand.vmem [shape: f32[1,16], index: 16, kind: input, shape index: {}]   ;;  %s5579_s17 = inlined_call_operand.vmem [shape: f32[16,5], index: 17, kind: input, shape index: {}]   ;;  %s5580_s18 = inlined_call_operand.vmem [shape: f32[1,5], index: 18, kind: input, shape index: {}]   ;;  %s5581_s19 = inlined_call_operand.hbm [shape: f32[4,1,16], index: 19, kind: output, shape index: {0}]   ;;  %s5582_s20 = inlined_call_operand.hbm [shape: f32[4,1,4], index: 20, kind: output, shape index: {1}]   ;;  %s5583_s21 = inlined_call_operand.vmem [shape: f32[4,1,1], index: 21, kind: output, shape index: {2}]  }
   0x1   :  { %5597 = sst [smem:[#allocation14_spill]] %s5562_s0 }
   0x2   :  { %5598 = sst [smem:[#allocation15_spill]] %s5563_s1 }
   0x3   :  { %5599 = sst [smem:[#allocation16_spill]] %s5564_s2 }
   0x4   :  { %5600 = sst [smem:[#allocation17_spill]] %s5565_s3 }
   0x5   :  { %5601 = sst [smem:[#allocation18_spill]] %s5566_s4 }
   0x6   :  { %5602 = sst [smem:[#allocation19_spill]] %s5567_s5 }
   0x7   :  { %5603 = sst [smem:[#allocation20_spill]] %s5568_s6 }
   0x8   :  { %5604 = sst [smem:[#allocation21_spill]] %s5569_s7 }
   0x9   :  { %5605 = sst [smem:[#allocation22_spill]] %s5570_s8 }
   0xa   :  { %27 = vsyncpa [#allocation3], 0 }
   0xb   :  { %29 = vsyncpa [#allocation3 + $0x1], 0 }
   0xc   :  { %30 = vsyncpa [#allocation5], 0 }
   0xd   :  { %32 = vsyncpa [#allocation5 + $0x1], 0  ;;  %s4562_s2 = smov 0   ;;  %s4564_s25 = smov 0  }
   0xe   :  { %s4566_s26 = smov 0   ;;  %s4568_s27 = smov 0  }
   0xf LB: > { %5606 = sst [smem:[#allocation8_spill]] %s4425_s2  ;;  %s4583_s3 = sadd.s32 4294967295, %s4437_s27   ;;  %s4437_s27 = sphi %s4568_s27, %s5629_s27   ;;  %s4433_s26 = sphi %s4566_s26, %s5631_s26   ;;  %s4429_s25 = sphi %s4564_s25, %s5633_s25   ;;  %s4425_s2 = sphi %s4562_s2, %s5632_s2  }
  0x10   : > { %5607 = sst [smem:[#allocation9_spill]] %s4433_s26  ;;  %s3669_s28 = sadd.s32 4294967294, %s4437_s27  }
  0x11   : > { %5608 = sst [smem:[#allocation10_spill]] %s4437_s27  ;;  %s4587_s29 = sadd.s32 1, %s4437_s27  }
  0x12   : > { %5609 = sst [smem:[#allocation11_spill]] %s4587_s29  ;;  %s449_s0 = sadd.s32 1, %s4433_s26 }
  0x13   : > { %s446_s4 = ssub.s32 %s4437_s27, %s4587_s29  ;;  %p459_p0 = scmp.ne.s32.totalorder %s4433_s26, %s4429_s25 }
  0x14   : > { %p447_p1 = scmp.eq.s32.totalorder %s446_s4, 0  ;;  %p460_p2 = scmp.eq.s32.totalorder %s4583_s3, 3 }
  0x15   : > { %p465_p3 = scmp.ne.s32.totalorder %s4429_s25, %s4425_s2  ;;  %p466_p4 = scmp.eq.s32.totalorder %s3669_s28, 3 }
  0x16   : > { %s4598_s30 = scalar_select %p447_p1, %s4433_s26, %s449_s0  }
  0x17   : > { %p4600_p5 = por %p460_p2, %p459_p0  ;;  %p4604_p6 = por %p466_p4, %p465_p3 }
  0x18   : > { %5610 = sst [smem:[#allocation12_spill]] %s4598_s30  ;;  %p3672_p7 = scmp.ge.s32.totalorder %s4437_s27, 1 }
  0x19   : > { %s5612_s22 = scalar_select %p4604_p6, 1, 0 }
  0x1a   : > { %p597_p8 = scmp.lt.s32.totalorder %s4437_s27, 5 }
  0x1b   : > { %5613 = sst [smem:[#allocation13_spill]] %s5612_s22 }
  0x1c   : > { %p598_p9 = pnand %p3672_p7, %p597_p8 }
  0x1d   : > { %s5614_s24 = sld [smem:[#allocation15_spill]] (!%p598_p9)  ;;  %p662_p10 = scmp.lt.s32.totalorder (!%p598_p9), %s4583_s3, 3 }
  0x1e   : > { %601 = sbr.rel (%p598_p9) target bundleno = 3320 (0xcf8), region = 96  ;;  %s5615_s4 = sld [smem:[#allocation14_spill]] (!%p598_p9) }
  0x1f   : > { %s4443_s30 = smov (!%p598_p9), 80   ;;  %s5591_s0 = smov (!%p598_p9), 64  }
  0x20   : > { %s5617_s1 = sld [smem:[#allocation17_spill]] (!%p598_p9)  ;;  %s4446_s26 = smov (!%p598_p9), 16  }
  0x21   : > { %s5619_s7 = sld [smem:[#allocation21_spill]] (!%p598_p9)  ;;  %s5481_s27 = sand.u32 (!%p598_p9), 1, %s4429_s25  }
  0x22   : > { %s5621_s6 = sld [smem:[#allocation20_spill]] (!%p598_p9) }
  0x23   : > { %v674_v0 = vld [vmem:[%s5614_s24 + $0x18] sm:$0xff]  ;;  %v4439_v1 = vmov 0.0   ;;  %v673_v2 = vld [vmem:[%s5614_s24 + $0x10] sm:$0xff]  ;;  %vm4440_vm0 = vmmov 0   ;;  %v672_v3 = vld [vmem:[%s5614_s24 + $0x8] sm:$0xff]  ;;  %s4624_s23 = scalar_select %p662_p10, %s4583_s3, 3 }
  0x24   : > { %4076 = vmatprep.subr.mxu0 %v4439_v1  ;;  %4084 = vmatprep.mubr.msk.f32.mxu0 %vm4440_vm0, %v4439_v1  ;;  %v671_v4 = vld [vmem:[%s5614_s24] sm:$0xff]  ;;  %vm682_vm1 = vcmask 261120   ;;  %s5616_s24 = sld [smem:[#allocation16_spill]]  ;;  %vm760_vm2 = vcmask 130048   ;;  %vm836_vm3 = vcmask 46080   ;;  %vm854_vm4 = vcmask 1045504  }
  0x25   : > { %4077 = vmatpush3.msra.mxu0 %v674_v0  ;;  %4092 = vmatprep.subr.mxu1 %v4439_v1  ;;  %s3673_s28 = sshll.u32 %s4624_s23, 3  ;;  %vm850_vm5 = vcmask 48128   ;;  %vm1185_vm6 = vcmask 259072   ;;  %s5622_s8 = sld [smem:[#allocation22_spill]]  ;;  %vm3255_vm7 = vcmask 523264   ;;  %vm3257_vm8 = vcmask 785408  }
  0x26   : > { %4078 = vmatprep.subr.mxu0 %v4439_v1  ;;  %4094 = vmatprep.mubr.msk.f32.mxu1 %vm4440_vm0, %v4439_v1  ;;  %s665_s29 = scalar_lea.vmem %s5615_s4, %s3673_s28  ;;  %s4442_s28 = smov 112   ;;  %v1101_v38 = vld [vmem:[%s5617_s1 + $0x18] sm:$0xff]  ;;  %v1100_v39 = vld [vmem:[%s5617_s1 + $0x10] sm:$0xff]  ;;  %v1099_v40 = vld [vmem:[%s5617_s1 + $0x8] sm:$0xff]  ;;  %vm3521_vm9 = vcmask 122880  }
  0x27   : > { %4079 = vmatpush3.msra.mxu0 %v673_v2  ;;  %v4638_v5 = vld [vmem:[%s665_s29] sm:$0x3f]  ;;  %s5590_s29 = smov 96   ;;  %v1232_v61 = vld [vmem:[%s5619_s7 + $0x88] sm:$0xff]  ;;  %s5620_s4 = sld [smem:[#allocation19_spill]] }
  0x28   : > { %4080 = vmatprep.subr.mxu0 %v4439_v1  ;;  %v1098_v41 = vld [vmem:[%s5617_s1] sm:$0xff]  ;;  %v1240_v63 = vld [vmem:[%s5619_s7 + $0xc8] sm:$0xff] }
  0x29   : > { %4081 = vmatpush3.msra.mxu0 %v672_v3  ;;  %v1231_v59 = vld [vmem:[%s5619_s7 + $0x80] sm:$0xff]  ;;  %v3706_v2 = vcombine.low %v1232_v61, %v1240_v63  ;;  %v3707_v3 = vcombine.high %v1232_v61, %v1240_v63  ;;  %v1221_v61 = vld [vmem:[%s5619_s7 + $0x30] sm:$0xff]  ;;  %v1222_v63 = vld [vmem:[%s5619_s7 + $0x38] sm:$0xff] }
  0x2a   : > { %4082 = vmatprep.subr.mxu0 %v4439_v1  ;;  %v3674_v6 = vld [vmem:[%s5616_s24] ss:$0 sm:$0xff]  ;;  %s4444_s24 = smov 48  }
  0x2b   : > { %4083 = vmatpush3.msra.mxu0 %v671_v4  ;;  %v1239_v60 = vld [vmem:[%s5619_s7 + $0xc0] sm:$0xff] }
  0x2c   : > { %4085 = vmatmul.mubr.msk.f32.vlgmr.msra.gmra.mxu0 %vm682_vm1, %v4638_v5  ;;  %4087 = vmatprep.subr.mxu0 %v4439_v1  ;;  %v3705_v62 = vcombine.high %v1231_v59, %v1239_v60  ;;  %v3704_v0 = vcombine.low %v1231_v59, %v1239_v60  ;;  %v1215_v4 = vld [vmem:[%s5619_s7] sm:$0xff] }
  0x2d   : > { %4089 = vmatprep.mubr.msk.f32.mxu0 %vm4440_vm0, %v4439_v1 }
  0xec   : > { %v752_v7 = vpop.f32.mrf.mxu0 }
  0xed   : > { %v753_v8 = vadd.f32 %v3674_v6, %v752_v7  ;;  %v1216_v6 = vld [vmem:[%s5619_s7 + $0x8] sm:$0xff] }
  0xee   : > { %v4086_v9 = vpop.f32.mrf.mxu0 }
  0xef   : > { %758 = vrot.lane.b32.xlu0 %v753_v8, %s5590_s29  ;;  %v756_v10 = vmul.f32 0.25, %v753_v8  ;;  %s3532_s29 = scalar_lea.sflag [#allocation3], %s5481_s27 }
  0xf1   : > { %927 = vrot.lane.b32.xlu1 %v756_v10, %s4442_s28  ;;  %s4449_s28 = smov [#allocation2]  }
  0xf2   : > { %s4351_s1 = sshll.u32 %s4449_s28, 4  ;;  %s4352_s1 = int_to_ptr.vmem [resolvable:$false] %s4351_s1 }
  0xf3   : > { %929 = vrot.lane.b32.xlu0 %v753_v8, %s4443_s30  ;;  %s5618_s30 = sld [smem:[#allocation18_spill]] }
  0xf9   : > { %v3684_v48 = vld [vmem:[%s5618_s30] ss:$0 sm:$0xff]  ;;  %s650_s30 = scalar_lea.vmem [#allocation2], %s5481_s27 }
  0xfa   : > { %s3551_s22 = sshll.u32 %s650_s30, 4  ;;  %s3552_s22 = int_to_ptr.vmem [resolvable:$true] %s3551_s22 }
  0xfb   : > { %s4347_s2 = scalar_lea.vmem %s3552_s22, 16  ;;  %p4354_p0 = scmp.lt.s32.totalorder %s3552_s22, %s4352_s1 }
  0xfc   : > { %p4348_p11 = scmp.ne.s32.totalorder %s3552_s22, %s4347_s2 }
  0xfe   : > { %p4349_p12 = pnand %p4348_p11, %p4600_p5 }
 0x100   : > { %p4350_p13 = pneg %p4349_p12 }
 0x161   : > { %v759_v11 = vpop.permute.xlu0 %758 }
 0x162   : > { %4088 = vmatpush3.xpose.msk.msra.mxu0 %vm760_vm2, %v759_v11 }
 0x163   : > { %4097 = vmatprep.subr.mxu0 %v4439_v1  ;;  %v928_v13 = vpop.permute.xlu1 %927 }
 0x165   : > { %v930_v12 = vpop.permute.xlu0 %929  ;;  %4090 = vmatmul.mubr.msk.f32.vlgmr.msra.gmra.mxu0 %vm760_vm2, %v756_v10 }
 0x166   : > { %4098 = vmatpush3.xpose.msk.msra.mxu0 %vm760_vm2, %v930_v12  ;;  %4099 = vmatprep.mubr.msk.f32.mxu0 %vm4440_vm0, %v4439_v1  ;;  %v1233_v12 = vld [vmem:[%s5619_s7 + $0x90] sm:$0xff] }
 0x167   : > { %4107 = vmatprep.subr.mxu0 %v4439_v1 }
 0x169   : > { %4100 = vmatmul.mubr.msk.f32.vlgmr.msra.gmra.mxu0 %vm760_vm2, %v928_v13  ;;  %v1241_v13 = vld [vmem:[%s5619_s7 + $0xd0] sm:$0xff] }
 0x16a   : > { %4115 = vmatprep.mubr.msk.f32.mxu0 %vm4440_vm0, %v4439_v1  ;;  %4108 = vmatpush3.msra.mxu0 %v1101_v38  ;;  %v1243_v38 = vld [vmem:[%s5619_s7 + $0xe0] sm:$0xff] }
 0x16b   : > { %4109 = vmatprep.subr.mxu0 %v4439_v1 }
 0x16c   : > { %4110 = vmatpush3.msra.mxu0 %v1100_v39  ;;  %v1236_v39 = vld [vmem:[%s5619_s7 + $0xa8] sm:$0xff] }
 0x16d   : > { %4111 = vmatprep.subr.mxu0 %v4439_v1 }
 0x16e   : > { %4112 = vmatpush3.msra.mxu0 %v1099_v40  ;;  %v1244_v40 = vld [vmem:[%s5619_s7 + $0xe8] sm:$0xff] }
 0x16f   : > { %4113 = vmatprep.subr.mxu0 %v4439_v1 }
 0x170   : > { %4114 = vmatpush3.msra.mxu0 %v1098_v41 }
 0x171   : > { %1547 = vmatprep.subr.bf16.mxu0 %v3707_v3 }
 0x225   : > { %v832_v14 = vpop.f32.mrf.mxu0 }
 0x226   : > { %v837_v15 = vsel %vm836_vm3, %v832_v14, -inf }
 0x227   : > { %838 = vmax.xlane.f32.xlu1 %v837_v15  ;;  %v4091_v16 = vpop.f32.mrf.mxu0  ;;  %v4447_v15 = vmov 0  }
 0x228   : > { %v3709_v16 = vcombine.high %v1233_v12, %v1241_v13 }
 0x229   : > { %v1001_v17 = vpop.f32.mrf.mxu0 }
 0x22a   : > { %v1005_v18 = vsel %vm836_vm3, %v1001_v17, -inf }
 0x22b   : > { %1006 = vmax.xlane.f32.xlu0 %v1005_v18  ;;  %v4101_v19 = vpop.f32.mrf.mxu0  ;;  %v3708_v18 = vcombine.low %v1233_v12, %v1241_v13  ;;  %v4211_v12 = vld [vmem:[%s5571_s9 + $0x70] sm:$0xff]  }
 0x22c   : > { %v4212_v13 = vld [vmem:[%s5571_s9 + $0xf0] sm:$0xff]  }
 0x2b0   : > { %v839_v20 = vpop.xlane.xlu1 %838 }
 0x2b1   : > { %v840_v21 = vsub.f32 %v832_v14, %v839_v20  ;;  %v1234_v14 = vld [vmem:[%s5619_s7 + $0x98] sm:$0xff] }
 0x2b3   : > { %v841_v22 = vmul.f32 1.442695, %v840_v21 }
 0x2b4   : > { %v1007_v23 = vpop.xlane.xlu0 %1006 }
 0x2b5   : > { %4335 = vpow2.f32 %v841_v22  ;;  %v1008_v24 = vsub.f32 %v1001_v17, %v1007_v23  ;;  %v1242_v17 = vld [vmem:[%s5619_s7 + $0xd8] sm:$0xff] }
 0x2b6   : > { %v3710_v19 = vcombine.low %v1234_v14, %v1242_v17  ;;  %v3711_v20 = vcombine.high %v1234_v14, %v1242_v17  ;;  %v4213_v14 = vld [vmem:[%s5571_s9 + $0x30] sm:$0xff]   ;;  %v4216_v17 = vld [vmem:[%s5571_s9 + $0xe8] sm:$0xff]  }
 0x2b7   : > { %v1009_v25 = vmul.f32 1.442695, %v1008_v24 }
 0x2b9   : > { %4337 = vpow2.f32 %v1009_v25  ;;  %v3686_v25 = vld [vmem:[%s5620_s4] ss:$0 sm:$0xff]  ;;  %s5623_s4 = smov 64  }
 0x2c2   : > { %v4336_v26 = vpop.eup %4335 }
 0x2c3   : > { %v843_v27 = vsel %vm836_vm3, %v4336_v26, 0.0 }
 0x2c4   : > { %844 = vadd.xlane.f32.xlu0 %v843_v27  ;;  %v3687_v27 = vld [vmem:[%s5621_s6] ss:$0 sm:$0xff]  ;;  %s4353_s6 = scalar_lea.vmem %s4352_s1, 32 }
 0x2c5   : > { %p4355_p1 = scmp.lt.s32.totalorder %s4353_s6, %s4347_s2 }
 0x2c6   : > { %v4338_v28 = vpop.eup %4337 }
 0x2c7   : > { %v1011_v29 = vsel %vm836_vm3, %v4338_v28, 0.0  ;;  %p4356_p2 = por %p4355_p1, %p4354_p0 }
 0x2c8   : > { %1012 = vadd.xlane.f32.xlu1 %v1011_v29  ;;  %v1217_v29 = vld [vmem:[%s5619_s7 + $0x10] sm:$0xff] }
 0x2c9   : > { %p4357_p3 = pnand %p4356_p2, %p4350_p13 }
 0x2d9   : > { %1016 = vrot.lane.b32.xlu1 %v753_v8, %s4444_s24  ;;  %s5624_s24 = smov 96  }
 0x2da   : > { %848 = vrot.lane.b32.xlu0 %v753_v8, %s5591_s0  ;;  %v1224_v8 = vld [vmem:[%s5619_s7 + $0x48] sm:$0xff]  ;;  %s5596_s0 = sshll.u32 %s4583_s3, 4 }
 0x2db   : > { %v3690_v10 = vcombine.low %v1216_v6, %v1224_v8  ;;  %v3691_v11 = vcombine.high %v1216_v6, %v1224_v8  ;;  %v4207_v8 = vld [vmem:[%s5571_s9 + $0x78] sm:$0xff]  }
 0x34d   : > { %v845_v30 = vpop.xlane.xlu0 %844 }
 0x34e   : > { %4339 = vrcp.f32 %v845_v30  ;;  %v1225_v30 = vld [vmem:[%s5619_s7 + $0x50] sm:$0xff] }
 0x34f   : > { %v3692_v41 = vcombine.low %v1217_v29, %v1225_v30 }
 0x351   : > { %v1013_v31 = vpop.xlane.xlu1 %1012  ;;  %v849_v32 = vpop.permute.xlu0 %848 }
 0x352   : > { %4341 = vrcp.f32 %v1013_v31  ;;  %4093 = vmatpush3.msk.msra.mxu1 %vm854_vm4, %v849_v32  ;;  %v1218_v31 = vld [vmem:[%s5619_s7 + $0x18] sm:$0xff] }
 0x353   : > { %4102 = vmatprep.subr.mxu1 %v4439_v1  ;;  %v1226_v32 = vld [vmem:[%s5619_s7 + $0x58] sm:$0xff] }
 0x355   : > { %v1017_v35 = vpop.permute.xlu1 %1016 }
 0x35b   : > { %v4340_v33 = vpop.eup %4339 }
 0x35c   : > { %v847_v34 = vmul.f32 %v4340_v33, %v4336_v26 }
 0x35e   : > { %4095 = vmatmul.mubr.msk.f32.vlgmr.msra.gmra.mxu1 %vm850_vm5, %v847_v34 }
 0x35f   : > { %v4342_v36 = vpop.eup %4341  ;;  %4103 = vmatpush3.msk.msra.mxu1 %vm854_vm4, %v1017_v35  ;;  %4104 = vmatprep.mubr.msk.f32.mxu1 %vm4440_vm0, %v4439_v1  ;;  %v3693_v35 = vcombine.high %v1217_v29, %v1225_v30  ;;  %v4228_v29 = vld [vmem:[%s5571_s9 + $0xd0] sm:$0xff]  }
 0x360   : > { %v1015_v37 = vmul.f32 %v4342_v36, %v4338_v28  ;;  %1506 = vmatprep.subr.bf16.mxu1 %v3705_v62  ;;  %v3695_v36 = vcombine.high %v1218_v31, %v1226_v32  ;;  %v1229_v62 = vld [vmem:[%s5619_s7 + $0x70] sm:$0xff] }
 0x361   : > { %v3700_v6 = vcombine.low %v1221_v61, %v1229_v62  ;;  %v4229_v30 = vld [vmem:[%s5571_s9 + $0x10] sm:$0xff]  }
 0x362   : > { %4105 = vmatmul.mubr.msk.f32.vlgmr.msra.gmra.mxu1 %vm850_vm5, %v1015_v37  ;;  %v1235_v37 = vld [vmem:[%s5619_s7 + $0xa0] sm:$0xff] }
 0x363   : > { %1507 = vmatpush1.bf16.msra.mxu1 %v3704_v0  ;;  %1526 = vmatprep.mubr.bf16.mxu1 %v4447_v15  ;;  %v1230_v0 = vld [vmem:[%s5619_s7 + $0x78] sm:$0xff] }
 0x41e   : > { %v923_v42 = vpop.f32.mrf.mxu1 }
 0x420   : > { %v4096_v43 = vpop.f32.mrf.mxu1 }
 0x421   : > { %v3713_v43 = vcombine.high %v1235_v37, %v1243_v38 }
 0x422   : > { %v1089_v44 = vpop.f32.mrf.mxu1 }
 0x423   : > { %1094 = vrot.lane.b32.xlu1 %v1089_v44, %s4446_s26  ;;  %v3715_v44 = vcombine.high %v1236_v39, %v1244_v40  ;;  %s4448_s26 = smov 32  }
 0x424   : > { %v4106_v45 = vpop.f32.mrf.mxu1 }
 0x425   : > { %v1219_v45 = vld [vmem:[%s5619_s7 + $0x20] sm:$0xff] }
 0x495   : > { %v1095_v46 = vpop.permute.xlu1 %1094 }
 0x496   : > { %v1097_v47 = vsel %vm760_vm2, %v923_v42, %v1095_v46  ;;  %v3694_v42 = vcombine.low %v1218_v31, %v1226_v32  ;;  %v1227_v46 = vld [vmem:[%s5619_s7 + $0x60] sm:$0xff]  ;;  %v4230_v31 = vld [vmem:[%s5571_s9 + $0x90] sm:$0xff]   ;;  %v4231_v32 = vld [vmem:[%s5571_s9 + $0x48] sm:$0xff]  }
 0x497   : > { %4116 = vmatmul.mubr.msk.f32.vlgmr.msra.gmra.mxu0 %vm682_vm1, %v1097_v47  ;;  %v1220_v47 = vld [vmem:[%s5619_s7 + $0x28] sm:$0xff] }
 0x498   : > { %1548 = vmatpush1.bf16.msra.mxu0 %v3706_v2  ;;  %1567 = vmatprep.mubr.bf16.mxu0 %v4447_v15 }
 0x499   : > { %1549 = vmatprep.subr.bf16.mxu0 %v3691_v11  ;;  %v4210_v11 = vld [vmem:[%s5571_s9 + $0xb8] sm:$0xff]  }
 0x49c   : > { %1550 = vmatpush1.bf16.msra.mxu0 %v3690_v10  ;;  %v4209_v10 = vld [vmem:[%s5571_s9 + $0x38] sm:$0xff]  }
 0x49d   : > { %1629 = vmatprep.subr.bf16.mxu0 %v3711_v20  ;;  %v4219_v20 = vld [vmem:[%s5571_s9 + $0x60] sm:$0xff]  }
 0x557   : > { %v1178_v49 = vpop.f32.mrf.mxu0 }
 0x558   : > { %v1179_v50 = vadd.f32 %v3684_v48, %v1178_v49  ;;  %v1228_v48 = vld [vmem:[%s5619_s7 + $0x68] sm:$0xff]  ;;  %v3712_v49 = vcombine.low %v1235_v37, %v1243_v38  ;;  %v4235_v37 = vld [vmem:[%s5571_s9 + $0x40] sm:$0xff]  }
 0x559   : > { %v4117_v51 = vpop.f32.mrf.mxu0  ;;  %v4236_v38 = vld [vmem:[%s5571_s9 + $0xc0] sm:$0xff]  }
 0x55a   : > { %v1182_v52 = vadd.f32 %v1179_v50, %v4638_v5  ;;  %v1223_v5 = vld [vmem:[%s5619_s7 + $0x40] sm:$0xff]  ;;  %v3714_v50 = vcombine.low %v1236_v39, %v1244_v40  ;;  %v3697_v51 = vcombine.high %v1219_v45, %v1227_v46 }
 0x55b   : > { %v3689_v7 = vcombine.high %v1215_v4, %v1223_v5  ;;  %v3688_v9 = vcombine.low %v1215_v4, %v1223_v5  ;;  %v3701_v4 = vcombine.high %v1221_v61, %v1229_v62  ;;  %v3703_v5 = vcombine.high %v1222_v63, %v1230_v0  ;;  %v4237_v39 = vld [vmem:[%s5571_s9] sm:$0xff]  }
 0x55c   : > { %v1186_v53 = vsel %vm1185_vm6, %v1182_v52, 0.0  ;;  %v4238_v40 = vld [vmem:[%s5571_s9 + $0x80] sm:$0xff]  }
 0x55d   : > { %1187 = vadd.xlane.f32.xlu0 %v1186_v53  ;;  %1508 = vmatprep.subr.bf16.mxu1 %v3689_v7  ;;  %v1237_v53 = vld [vmem:[%s5619_s7 + $0xb0] sm:$0xff]  ;;  %v3702_v7 = vcombine.low %v1222_v63, %v1230_v0 }
 0x55e   : > { %1509 = vmatpush1.bf16.msra.mxu1 %v3688_v9  ;;  %v4208_v9 = vld [vmem:[%s5571_s9 + $0xf8] sm:$0xff]  }
 0x55f   : > { %1588 = vmatprep.subr.bf16.mxu1 %v3709_v16  ;;  %v4215_v16 = vld [vmem:[%s5571_s9 + $0x68] sm:$0xff]  }
 0x5e6   : > { %v1188_v54 = vpop.xlane.xlu0 %1187 }
 0x5e7   : > { %v1190_v55 = vmul.f32 0.03125, %v1188_v54  ;;  %v1245_v54 = vld [vmem:[%s5619_s7 + $0xf0] sm:$0xff] }
 0x5e8   : > { %v3717_v59 = vcombine.high %v1237_v53, %v1245_v54  ;;  %v3716_v2 = vcombine.low %v1237_v53, %v1245_v54 }
 0x5e9   : > { %v1191_v56 = vsub.f32 %v1182_v52, %v1190_v55  ;;  %v3699_v52 = vcombine.high %v1220_v47, %v1228_v48  ;;  %v1238_v55 = vld [vmem:[%s5619_s7 + $0xb8] sm:$0xff] }
 0x5eb   : > { %v1192_v57 = vmul.f32 %v1191_v56, %v1191_v56 }
 0x5ed   : > { %v1193_v58 = vsel %vm1185_vm6, %v1192_v57, 0.0  ;;  %v3696_v57 = vcombine.low %v1219_v45, %v1227_v46  ;;  %v4931_v46 = vld [vmem:[%s5622_s8 + $0x8] sm:$0xff] }
 0x5ee   : > { %1194 = vadd.xlane.f32.xlu1 %v1193_v58  ;;  %v3698_v58 = vcombine.low %v1220_v47, %v1228_v48 }
 0x677   : > { %v1195_v21 = vpop.xlane.xlu1 %1194 }
 0x678   : > { %v1196_v22 = vmul.f32 0.03125, %v1195_v21  ;;  %v4220_v21 = vld [vmem:[%s5571_s9 + $0xe0] sm:$0xff]  }
 0x67a   : > { %v1197_v23 = vadd.f32 1e-05, %v1196_v22  ;;  %v4221_v22 = vld [vmem:[%s5571_s9 + $0x20] sm:$0xff]  }
 0x67c   : > { %4343 = vrsqrt.f32 %v1197_v23  ;;  %v4222_v23 = vld [vmem:[%s5571_s9 + $0xa0] sm:$0xff]  }
 0x689   : > { %v4344_v24 = vpop.eup %4343 }
 0x68a   : > { %v1199_v26 = vmul.f32 %v4344_v24, %v1191_v56  ;;  %v1246_v56 = vld [vmem:[%s5619_s7 + $0xf8] sm:$0xff] }
 0x68b   : > { %v3719_v60 = vcombine.high %v1238_v55, %v1246_v56  ;;  %v3718_v3 = vcombine.low %v1238_v55, %v1246_v56  ;;  %v4223_v24 = vld [vmem:[%s5571_s9 + $0x58] sm:$0xff]  }
 0x68c   : > { %v1206_v28 = vmul.f32 %v3686_v25, %v1199_v26  ;;  %v4224_v25 = vld [vmem:[%s5571_s9 + $0xd8] sm:$0xff]  }
 0x68d   : > { %v4225_v26 = vld [vmem:[%s5571_s9 + $0x18] sm:$0xff]  }
 0x68e   : > { %v4747_v33 = vadd.f32 %v3687_v27, %v1206_v28  ;;  %v4226_v27 = vld [vmem:[%s5571_s9 + $0x98] sm:$0xff]   ;;  %v4227_v28 = vld [vmem:[%s5571_s9 + $0x50] sm:$0xff]  }
 0x690   : > { %v4751_v34 = vpack.c.bf16 %v4747_v33, %v4747_v33 }
 0x692   : > { %3720 = vmatmul.mubr.msk.bf16.vlgmr.msra.gmra.mxu1 %vm682_vm1, %v4751_v34  ;;  %3721 = vmatmul.mubr.msk.bf16.vlgmr.msra.gmra.mxu0 %vm682_vm1, %v4751_v34 }
 0x693   : > { %1589 = vmatpush1.bf16.msra.mxu1 %v3708_v18  ;;  %1630 = vmatpush1.bf16.msra.mxu0 %v3710_v19  ;;  %v4217_v18 = vld [vmem:[%s5571_s9 + $0x28] sm:$0xff]  }
 0x694   : > { %1590 = vmatprep.subr.bf16.mxu1 %v3693_v35  ;;  %1631 = vmatprep.subr.bf16.mxu0 %v3695_v36  ;;  %v4218_v19 = vld [vmem:[%s5571_s9 + $0xa8] sm:$0xff]  }
 0x695   : > { %1608 = vmatprep.mubr.bf16.mxu1 %v4447_v15  ;;  %1649 = vmatprep.mubr.bf16.mxu0 %v4447_v15  ;;  %v4233_v35 = vld [vmem:[%s5571_s9 + $0x8] sm:$0xff]  }
 0x696   : > { %v4234_v36 = vld [vmem:[%s5571_s9 + $0x88] sm:$0xff]  }
 0x697   : > { %1591 = vmatpush1.bf16.msra.mxu1 %v3692_v41  ;;  %1632 = vmatpush1.bf16.msra.mxu0 %v3694_v42  ;;  %v4239_v41 = vld [vmem:[%s5571_s9 + $0x178] sm:$0xff]  }
 0x698   : > { %1670 = vmatprep.subr.bf16.mxu1 %v3713_v43  ;;  %1711 = vmatprep.subr.bf16.mxu0 %v3715_v44  ;;  %v4240_v42 = vld [vmem:[%s5571_s9 + $0x1f8] sm:$0xff]   ;;  %v1251_v43 = vlaneseq }
 0x69a   : > { %3722 = vmatmul.mubr.msk.bf16.vlgmr.msra.gmra.mxu1 %vm682_vm1, %v4751_v34  ;;  %3723 = vmatmul.mubr.msk.bf16.vlgmr.msra.gmra.mxu0 %vm682_vm1, %v4751_v34  ;;  %v4925_v44 = vshrl.u32 %v1251_v43, 7 }
 0x69b   : > { %1671 = vmatpush1.bf16.msra.mxu1 %v3712_v49  ;;  %1712 = vmatpush1.bf16.msra.mxu0 %v3714_v50  ;;  %v4943_v50 = vld [vmem:[%s5622_s8] sm:$0xff] }
 0x69c   : > { %1672 = vmatprep.subr.bf16.mxu1 %v3697_v51  ;;  %1713 = vmatprep.subr.bf16.mxu0 %v3699_v52  ;;  %v1277_v45 = vsub.s32 6, %v4925_v44  ;;  %v1253_v48 = vsub.s32 0, %v4925_v44  ;;  %v1261_v49 = vsub.s32 2, %v4925_v44  ;;  %v1257_v51 = vsub.s32 1, %v4925_v44 }
 0x69d   : > { %1690 = vmatprep.mubr.bf16.mxu1 %v4447_v15  ;;  %1731 = vmatprep.mubr.bf16.mxu0 %v4447_v15  ;;  %v1265_v52 = vsub.s32 3, %v4925_v44 }
 0x69e   : > { %v4936_v47 = vrot.slane %v4931_v46, %v1277_v45  ;;  %v1254_v53 = vrot.slane %v4943_v50, %v1253_v48  ;;  %v1262_v54 = vrot.slane %v4943_v50, %v1261_v49  ;;  %v1258_v55 = vrot.slane %v4943_v50, %v1257_v51 }
 0x69f   : > { %1673 = vmatpush1.bf16.msra.mxu1 %v3696_v57  ;;  %1714 = vmatpush1.bf16.msra.mxu0 %v3698_v58  ;;  %v1266_v56 = vrot.slane %v4943_v50, %v1265_v52 }
 0x6a0   : > { %1752 = vmatprep.subr.bf16.mxu1 %v3717_v59  ;;  %1793 = vmatprep.subr.bf16.mxu0 %v3719_v60 }
 0x6a2   : > { %3724 = vmatmul.mubr.msk.bf16.vlgmr.msra.gmra.mxu1 %vm682_vm1, %v4751_v34  ;;  %3725 = vmatmul.mubr.msk.bf16.vlgmr.msra.gmra.mxu0 %vm682_vm1, %v4751_v34 }
 0x6a3   : > { %1753 = vmatpush1.bf16.msra.mxu1 %v3716_v2  ;;  %1794 = vmatpush1.bf16.msra.mxu0 %v3718_v3  ;;  %v1273_v2 = vsub.s32 5, %v4925_v44  ;;  %v1281_v3 = vsub.s32 7, %v4925_v44 }
 0x6a4   : > { %1754 = vmatprep.subr.bf16.mxu1 %v3701_v4  ;;  %1795 = vmatprep.subr.bf16.mxu0 %v3703_v5 }
 0x6a5   : > { %1772 = vmatprep.mubr.bf16.mxu1 %v4447_v15  ;;  %1813 = vmatprep.mubr.bf16.mxu0 %v4447_v15  ;;  %v4214_v15 = vld [vmem:[%s5571_s9 + $0xb0] sm:$0xff]  }
 0x6a7   : > { %1755 = vmatpush1.bf16.msra.mxu1 %v3700_v6  ;;  %1796 = vmatpush1.bf16.msra.mxu0 %v3702_v7 }
 0x6a8   : > { %3884 = vmatprep.subr.bf16.mxu1 %v4207_v8  ;;  %3906 = vmatprep.subr.bf16.mxu0 %v4208_v9 }
 0x6aa   : > { %3726 = vmatmul.mubr.msk.bf16.vlgmr.msra.gmra.mxu1 %vm682_vm1, %v4751_v34  ;;  %3727 = vmatmul.mubr.msk.bf16.vlgmr.msra.gmra.mxu0 %vm682_vm1, %v4751_v34  ;;  %v4232_v34 = vld [vmem:[%s5571_s9 + $0xc8] sm:$0xff]  }
 0x6ab   : > { %3885 = vmatpush3.bf16.msra.mxu1 %v4209_v10  ;;  %3907 = vmatpush3.bf16.msra.mxu0 %v4210_v11 }
 0x6ac   : > { %3886 = vmatprep.subr.bf16.mxu1 %v4211_v12  ;;  %3908 = vmatprep.subr.bf16.mxu0 %v4212_v13 }
 0x6af   : > { %3887 = vmatpush3.bf16.msra.mxu1 %v4213_v14  ;;  %3909 = vmatpush3.bf16.msra.mxu0 %v4214_v15  ;;  %v1274_v14 = vrot.slane %v4943_v50, %v1273_v2  ;;  %v1282_v15 = vrot.slane %v4943_v50, %v1281_v3 }
 0x6b0   : > { %3888 = vmatprep.subr.bf16.mxu1 %v4215_v16  ;;  %3910 = vmatprep.subr.bf16.mxu0 %v4216_v17  ;;  %v4241_v16 = vld [vmem:[%s5571_s9 + $0x138] sm:$0xff]  }
 0x6b1   : > { %v4242_v17 = vld [vmem:[%s5571_s9 + $0x1b8] sm:$0xff]  }
 0x6b3   : > { %3889 = vmatpush3.bf16.msra.mxu1 %v4217_v18  ;;  %3911 = vmatpush3.bf16.msra.mxu0 %v4218_v19 }
 0x6b4   : > { %3890 = vmatprep.subr.bf16.mxu1 %v4219_v20  ;;  %3912 = vmatprep.subr.bf16.mxu0 %v4220_v21 }
 0x6b7   : > { %3891 = vmatpush3.bf16.msra.mxu1 %v4221_v22  ;;  %3913 = vmatpush3.bf16.msra.mxu0 %v4222_v23  ;;  %v4243_v22 = vld [vmem:[%s5571_s9 + $0x170] sm:$0xff]  }
 0x6b8   : > { %3892 = vmatprep.subr.bf16.mxu1 %v4223_v24  ;;  %3914 = vmatprep.subr.bf16.mxu0 %v4224_v25  ;;  %v4244_v23 = vld [vmem:[%s5571_s9 + $0x1f0] sm:$0xff]  }
 0x6bb   : > { %3893 = vmatpush3.bf16.msra.mxu1 %v4225_v26  ;;  %3915 = vmatpush3.bf16.msra.mxu0 %v4226_v27 }
 0x6bc   : > { %3894 = vmatprep.subr.bf16.mxu1 %v4227_v28  ;;  %3916 = vmatprep.subr.bf16.mxu0 %v4228_v29  ;;  %v4245_v28 = vld [vmem:[%s5571_s9 + $0x130] sm:$0xff]  }
 0x6bd   : > { %v4246_v29 = vld [vmem:[%s5571_s9 + $0x1b0] sm:$0xff]  }
 0x6bf   : > { %3895 = vmatpush3.bf16.msra.mxu1 %v4229_v30  ;;  %3917 = vmatpush3.bf16.msra.mxu0 %v4230_v31 }
 0x6c0   : > { %3896 = vmatprep.subr.bf16.mxu1 %v4231_v32  ;;  %3918 = vmatprep.subr.bf16.mxu0 %v4232_v34  ;;  %v4247_v32 = vld [vmem:[%s5571_s9 + $0x168] sm:$0xff]  }
 0x6c1   : > { %v4248_v34 = vld [vmem:[%s5571_s9 + $0x1e8] sm:$0xff]  }
 0x6c3   : > { %3897 = vmatpush3.bf16.msra.mxu1 %v4233_v35  ;;  %3919 = vmatpush3.bf16.msra.mxu0 %v4234_v36 }
 0x6c4   : > { %3898 = vmatprep.subr.bf16.mxu1 %v4235_v37  ;;  %3920 = vmatprep.subr.bf16.mxu0 %v4236_v38 }
 0x6c7   : > { %3899 = vmatpush3.bf16.msra.mxu1 %v4237_v39  ;;  %3921 = vmatpush3.bf16.msra.mxu0 %v4238_v40 }
 0x6c8   : > { %3928 = vmatprep.subr.bf16.mxu1 %v4239_v41  ;;  %3950 = vmatprep.subr.bf16.mxu0 %v4240_v42  ;;  %v4249_v41 = vld [vmem:[%s5571_s9 + $0x128] sm:$0xff]  }
 0x6c9   : > { %v4250_v42 = vld [vmem:[%s5571_s9 + $0x1a8] sm:$0xff]  }
 0x752   : > { %v1528_v57 = vpop.f32.mrf.mxu1  ;;  %v1569_v58 = vpop.f32.mrf.mxu0 }
 0x753   : > { %v1529_v59 = vadd.f32 %v1528_v57, %v1254_v53  ;;  %v1570_v60 = vadd.f32 %v1569_v58, %v1262_v54  ;;  %v4251_v54 = vld [vmem:[%s5571_s9 + $0x160] sm:$0xff]   ;;  %v1269_v58 = vsub.s32 4, %v4925_v44 }
 0x754   : > { %v1530_v61 = vpop.f32.mrf.mxu1  ;;  %v1571_v62 = vpop.f32.mrf.mxu0 }
 0x755   : > { %v1531_v63 = vadd.f32 %v1530_v61, %v1258_v55  ;;  %v1572_v0 = vadd.f32 %v1571_v62, %v1266_v56  ;;  %v1822_v4 = vmax.f32 %v1529_v59, 0.0  ;;  %v1824_v5 = vmax.f32 %v1570_v60, 0.0  ;;  %v4252_v55 = vld [vmem:[%s5571_s9 + $0x1e0] sm:$0xff]  }
 0x756   : > { %v1532_v6 = vpop.f32.mrf.mxu1  ;;  %v1573_v7 = vpop.f32.mrf.mxu0  ;;  %v4253_v59 = vld [vmem:[%s5571_s9 + $0x120] sm:$0xff]  }
 0x757   : > { %v1823_v8 = vmax.f32 %v1531_v63, 0.0  ;;  %v1825_v9 = vmax.f32 %v1572_v0, 0.0  ;;  %v1838_v18 = vpack.c.bf16 %v1822_v4, %v1822_v4  ;;  %v1840_v19 = vpack.c.bf16 %v1824_v5, %v1824_v5  ;;  %v4254_v60 = vld [vmem:[%s5571_s9 + $0x1a0] sm:$0xff]   ;;  %v4255_v63 = vld [vmem:[%s5571_s9 + $0x158] sm:$0xff]  }
 0x758   : > { %v1533_v10 = vpop.f32.mrf.mxu1  ;;  %v1574_v11 = vpop.f32.mrf.mxu0  ;;  %v4256_v0 = vld [vmem:[%s5571_s9 + $0x1d8] sm:$0xff]   ;;  %v1302_v4 = vrot.slane %v4931_v46, %v1269_v58 }
 0x759   : > { %v1839_v12 = vpack.c.bf16 %v1823_v8, %v1823_v8  ;;  %v1841_v13 = vpack.c.bf16 %v1825_v9, %v1825_v9  ;;  %v4257_v7 = vld [vmem:[%s5571_s9 + $0x118] sm:$0xff]   ;;  %v4259_v11 = vld [vmem:[%s5571_s9 + $0x150] sm:$0xff]  }
 0x75a   : > { %v4973_v20 = vpop.f32.mrf.mxu1  ;;  %v4975_v21 = vpop.f32.mrf.mxu0  ;;  %v4258_v8 = vld [vmem:[%s5571_s9 + $0x198] sm:$0xff]  }
 0x75b   : > { %2917 = vmatprep.mubr.bf16.mxu1 %v1839_v12  ;;  %2957 = vmatprep.mubr.bf16.mxu0 %v1841_v13  ;;  %v4260_v12 = vld [vmem:[%s5571_s9 + $0x1d0] sm:$0xff]  }
 0x75c   : > { %v1612_v24 = vpop.f32.mrf.mxu1  ;;  %v1653_v25 = vpop.f32.mrf.mxu0  ;;  %2918 = vmatmul.mubr.bf16.vlgmr.msra.gmra.mxu1 %v1838_v18  ;;  %2958 = vmatmul.mubr.bf16.vlgmr.msra.gmra.mxu0 %v1840_v19  ;;  %v4262_v18 = vld [vmem:[%s5571_s9 + $0x190] sm:$0xff]   ;;  %v1270_v19 = vrot.slane %v4943_v50, %v1269_v58 }
 0x75d   : > { %v1613_v26 = vadd.f32 %v1612_v24, %v1274_v14  ;;  %v1654_v27 = vadd.f32 %v1653_v25, %v1282_v15  ;;  %3929 = vmatpush3.bf16.msra.mxu1 %v4241_v16  ;;  %3951 = vmatpush3.bf16.msra.mxu0 %v4242_v17  ;;  %v4261_v17 = vld [vmem:[%s5571_s9 + $0x110] sm:$0xff]   ;;  %v4263_v24 = vld [vmem:[%s5571_s9 + $0x148] sm:$0xff]  }
 0x75e   : > { %v1614_v30 = vpop.f32.mrf.mxu1  ;;  %v1655_v31 = vpop.f32.mrf.mxu0  ;;  %3930 = vmatprep.subr.bf16.mxu1 %v4243_v22  ;;  %3952 = vmatprep.subr.bf16.mxu0 %v4244_v23  ;;  %v4264_v25 = vld [vmem:[%s5571_s9 + $0x1c8] sm:$0xff]   ;;  %v4276_v58 = vld [vmem:[%s5571_s9 + $0x2f0] sm:$0xff]  }
 0x75f   : > { %v1827_v35 = vmax.f32 %v1613_v26, 0.0  ;;  %v1829_v36 = vmax.f32 %v1654_v27, 0.0  ;;  %v1290_v26 = vrot.slane %v4931_v46, %v1257_v51  ;;  %v1611_v30 = vadd.f32 %v4973_v20, %v1270_v19  ;;  %v4268_v31 = vld [vmem:[%s5571_s9 + $0x1c0] sm:$0xff]   ;;  %v4293_v19 = vld [vmem:[%s5571_s9 + $0x210] sm:$0xff]  }
 0x760   : > { %v1615_v37 = vpop.f32.mrf.mxu1  ;;  %v1656_v38 = vpop.f32.mrf.mxu0  ;;  %v4269_v20 = vld [vmem:[%s5571_s9 + $0x100] sm:$0xff]  }
 0x761   : > { %v1843_v39 = vpack.c.bf16 %v1827_v35, %v1827_v35  ;;  %v1845_v40 = vpack.c.bf16 %v1829_v36, %v1829_v36  ;;  %3931 = vmatpush3.bf16.msra.mxu1 %v4245_v28  ;;  %3953 = vmatpush3.bf16.msra.mxu0 %v4246_v29  ;;  %v4265_v28 = vld [vmem:[%s5571_s9 + $0x108] sm:$0xff]   ;;  %v1826_v35 = vmax.f32 %v1611_v30, 0.0  ;;  %v4271_v37 = vld [vmem:[%s5571_s9 + $0x278] sm:$0xff]  }
 0x762   : > { %v5001_v43 = vpop.f32.mrf.mxu1  ;;  %v5003_v53 = vpop.f32.mrf.mxu0  ;;  %3932 = vmatprep.subr.bf16.mxu1 %v4247_v32  ;;  %3954 = vmatprep.subr.bf16.mxu0 %v4248_v34  ;;  %v4266_v29 = vld [vmem:[%s5571_s9 + $0x188] sm:$0xff]   ;;  %v4272_v38 = vld [vmem:[%s5571_s9 + $0x2f8] sm:$0xff]  }
 0x763   : > { %2997 = vmatprep.mubr.bf16.mxu1 %v1843_v39  ;;  %3037 = vmatprep.mubr.bf16.mxu0 %v1845_v40 }
 0x764   : > { %v1694_v56 = vpop.f32.mrf.mxu1  ;;  %v1735_v57 = vpop.f32.mrf.mxu0 }
 0x765   : > { %3933 = vmatpush3.bf16.msra.mxu1 %v4249_v41  ;;  %3955 = vmatpush3.bf16.msra.mxu0 %v4250_v42  ;;  %v1695_v32 = vadd.f32 %v1694_v56, %v1290_v26  ;;  %v4273_v41 = vld [vmem:[%s5571_s9 + $0x238] sm:$0xff]   ;;  %v1842_v42 = vpack.c.bf16 %v1826_v35, %v1826_v35  ;;  %v1314_v26 = vrot.slane %v4931_v46, %v1281_v3  ;;  %v4308_v35 = vld [vmem:[%s5571_s9 + $0x3f0] sm:$0xff]  }
 0x766   : > { %v1696_v61 = vpop.f32.mrf.mxu1  ;;  %v1737_v62 = vpop.f32.mrf.mxu0  ;;  %3934 = vmatprep.subr.bf16.mxu1 %v4251_v54  ;;  %3956 = vmatprep.subr.bf16.mxu0 %v4252_v55  ;;  %v4274_v55 = vld [vmem:[%s5571_s9 + $0x2b8] sm:$0xff]  }
 0x767   : > { %v1831_v39 = vmax.f32 %v1695_v32, 0.0  ;;  %v4278_v61 = vld [vmem:[%s5571_s9 + $0x2b0] sm:$0xff]   ;;  %v4279_v62 = vld [vmem:[%s5571_s9 + $0x268] sm:$0xff]   ;;  %v4306_v32 = vld [vmem:[%s5571_s9 + $0x3b8] sm:$0xff]  }
 0x768   : > { %v1697_v5 = vpop.f32.mrf.mxu1  ;;  %v1738_v6 = vpop.f32.mrf.mxu0 }
 0x769   : > { %3935 = vmatpush3.bf16.msra.mxu1 %v4253_v59  ;;  %3957 = vmatpush3.bf16.msra.mxu0 %v4254_v60  ;;  %v1847_v56 = vpack.c.bf16 %v1831_v39, %v1831_v39  ;;  %v4277_v60 = vld [vmem:[%s5571_s9 + $0x230] sm:$0xff]   ;;  %v4283_v5 = vld [vmem:[%s5571_s9 + $0x260] sm:$0xff]   ;;  %v4311_v39 = vld [vmem:[%s5571_s9 + $0x368] sm:$0xff]  }
 0x76a   : > { %v1774_v9 = vpop.f32.mrf.mxu1  ;;  %v1815_v10 = vpop.f32.mrf.mxu0  ;;  %3936 = vmatprep.subr.bf16.mxu1 %v4255_v63  ;;  %3958 = vmatprep.subr.bf16.mxu0 %v4256_v0  ;;  %v4280_v63 = vld [vmem:[%s5571_s9 + $0x2e8] sm:$0xff]   ;;  %v4284_v6 = vld [vmem:[%s5571_s9 + $0x2e0] sm:$0xff]  }
 0x76b   : > { %v5037_v13 = vadd.f32 %v1774_v9, %v1302_v4  ;;  %v5040_v14 = vadd.f32 %v1815_v10, %v4936_v47  ;;  %v1278_v47 = vrot.slane %v4943_v50, %v1277_v45  ;;  %v1298_v45 = vrot.slane %v4931_v46, %v1265_v52  ;;  %v4267_v52 = vld [vmem:[%s5571_s9 + $0x140] sm:$0xff]   ;;  %v4281_v0 = vld [vmem:[%s5571_s9 + $0x228] sm:$0xff]   ;;  %v4287_v9 = vld [vmem:[%s5571_s9 + $0x258] sm:$0xff]  }
 0x76c   : > { %v5042_v15 = vpop.f32.mrf.mxu1  ;;  %v5044_v16 = vpop.f32.mrf.mxu0  ;;  %v4282_v4 = vld [vmem:[%s5571_s9 + $0x2a8] sm:$0xff]   ;;  %v4288_v10 = vld [vmem:[%s5571_s9 + $0x2d8] sm:$0xff]  }
 0x76d   : > { %3937 = vmatpush3.bf16.msra.mxu1 %v4257_v7  ;;  %3959 = vmatpush3.bf16.msra.mxu0 %v4258_v8  ;;  %v1652_v51 = vadd.f32 %v4975_v21, %v1278_v47  ;;  %v1736_v34 = vadd.f32 %v1735_v57, %v1298_v45  ;;  %v4270_v21 = vld [vmem:[%s5571_s9 + $0x180] sm:$0xff]   ;;  %v4275_v57 = vld [vmem:[%s5571_s9 + $0x270] sm:$0xff]   ;;  %v1286_v47 = vrot.slane %v4931_v46, %v1253_v48  ;;  %v4297_v45 = vld [vmem:[%s5571_s9 + $0x208] sm:$0xff]  }
 0x76e   : > { %v1778_v22 = vpop.f32.mrf.mxu1  ;;  %v1819_v23 = vpop.f32.mrf.mxu0  ;;  %3938 = vmatprep.subr.bf16.mxu1 %v4259_v11  ;;  %3960 = vmatprep.subr.bf16.mxu0 %v4260_v12  ;;  %v4285_v7 = vld [vmem:[%s5571_s9 + $0x220] sm:$0xff]   ;;  %v4289_v11 = vld [vmem:[%s5571_s9 + $0x218] sm:$0xff]   ;;  %v1306_v48 = vrot.slane %v4931_v46, %v1273_v2 }
 0x76f   : > { %v1828_v36 = vmax.f32 %v1652_v51, 0.0  ;;  %v1833_v40 = vmax.f32 %v1736_v34, 0.0  ;;  %v4286_v8 = vld [vmem:[%s5571_s9 + $0x2a0] sm:$0xff]   ;;  %v4290_v12 = vld [vmem:[%s5571_s9 + $0x298] sm:$0xff]   ;;  %v4294_v22 = vld [vmem:[%s5571_s9 + $0x290] sm:$0xff]  }
 0x770   : > { %v1779_v50 = vpop.f32.mrf.mxu1  ;;  %v1820_v27 = vpop.f32.mrf.mxu0  ;;  %v4295_v23 = vld [vmem:[%s5571_s9 + $0x248] sm:$0xff]   ;;  %v4299_v2 = vld [vmem:[%s5571_s9 + $0x240] sm:$0xff]   ;;  %v1777_v3 = vadd.f32 %v5042_v15, %v1306_v48  ;;  %v4304_v15 = vld [vmem:[%s5571_s9 + $0x3f8] sm:$0xff]  }
 0x771   : > { %3939 = vmatpush3.bf16.msra.mxu1 %v4261_v17  ;;  %3961 = vmatpush3.bf16.msra.mxu0 %v4262_v18  ;;  %v1844_v54 = vpack.c.bf16 %v1828_v36, %v1828_v36  ;;  %v1849_v59 = vpack.c.bf16 %v1833_v40, %v1833_v40  ;;  %v4291_v17 = vld [vmem:[%s5571_s9 + $0x250] sm:$0xff]   ;;  %v4298_v50 = vld [vmem:[%s5571_s9 + $0x288] sm:$0xff]   ;;  %v4301_v27 = vld [vmem:[%s5571_s9 + $0x200] sm:$0xff]  }
 0x772   : > { %3940 = vmatprep.subr.bf16.mxu1 %v4263_v24  ;;  %3962 = vmatprep.subr.bf16.mxu0 %v4264_v25  ;;  %v4292_v18 = vld [vmem:[%s5571_s9 + $0x2d0] sm:$0xff]   ;;  %v1294_v24 = vrot.slane %v4931_v46, %v1261_v49  ;;  %v4296_v25 = vld [vmem:[%s5571_s9 + $0x2c8] sm:$0xff]   ;;  %v1693_v49 = vadd.f32 %v5001_v43, %v1286_v47  ;;  %v4300_v46 = vld [vmem:[%s5571_s9 + $0x2c0] sm:$0xff]   ;;  %v1818_v43 = vadd.f32 %v5044_v16, %v1314_v26  ;;  %v1835_v16 = vmax.f32 %v1777_v3, 0.0 }
 0x773   : > { %v4312_v40 = vld [vmem:[%s5571_s9 + $0x3e8] sm:$0xff]  }
 0x774   : > { %v1734_v44 = vadd.f32 %v5003_v53, %v1294_v24  ;;  %v4302_v53 = vld [vmem:[%s5571_s9 + $0x280] sm:$0xff]   ;;  %v1837_v51 = vmax.f32 %v1818_v43, 0.0 }
 0x775   : > { %3941 = vmatpush3.bf16.msra.mxu1 %v4265_v28  ;;  %3963 = vmatpush3.bf16.msra.mxu0 %v4266_v29  ;;  %v1830_v28 = vmax.f32 %v1693_v49, 0.0  ;;  %v4303_v29 = vld [vmem:[%s5571_s9 + $0x378] sm:$0xff]  }
 0x776   : > { %3942 = vmatprep.subr.bf16.mxu1 %v4267_v52  ;;  %3964 = vmatprep.subr.bf16.mxu0 %v4268_v31  ;;  %v1832_v30 = vmax.f32 %v1734_v44, 0.0  ;;  %v4305_v52 = vld [vmem:[%s5571_s9 + $0x338] sm:$0xff]   ;;  %v1853_v36 = vpack.c.bf16 %v1837_v51, %v1837_v51 }
 0x777   : > { %v1846_v31 = vpack.c.bf16 %v1830_v28, %v1830_v28 }
 0x778   : > { %v1848_v34 = vpack.c.bf16 %v1832_v30, %v1832_v30 }
 0x779   : > { %3943 = vmatpush3.bf16.msra.mxu1 %v4269_v20  ;;  %3965 = vmatpush3.bf16.msra.mxu0 %v4270_v21  ;;  %v4307_v20 = vld [vmem:[%s5571_s9 + $0x370] sm:$0xff]   ;;  %v1851_v21 = vpack.c.bf16 %v1835_v16, %v1835_v16 }
 0x77a   : > { %3972 = vmatprep.subr.bf16.mxu1 %v4271_v37  ;;  %3994 = vmatprep.subr.bf16.mxu0 %v4272_v38  ;;  %v4309_v37 = vld [vmem:[%s5571_s9 + $0x330] sm:$0xff]  }
 0x77b   : > { %v4310_v38 = vld [vmem:[%s5571_s9 + $0x3b0] sm:$0xff]  }
 0x77c   : > { %2998 = vmatmul.mubr.bf16.vlgmr.msra.gmra.mxu1 %v1842_v42  ;;  %3038 = vmatmul.mubr.bf16.vlgmr.msra.gmra.mxu0 %v1844_v54  ;;  %v4314_v42 = vld [vmem:[%s5571_s9 + $0x3a8] sm:$0xff]   ;;  %v4315_v54 = vld [vmem:[%s5571_s9 + $0x360] sm:$0xff]  }
 0x77d   : > { %3973 = vmatpush3.bf16.msra.mxu1 %v4273_v41  ;;  %3077 = vmatprep.mubr.bf16.mxu1 %v1847_v56  ;;  %v4313_v41 = vld [vmem:[%s5571_s9 + $0x328] sm:$0xff]   ;;  %v4317_v56 = vld [vmem:[%s5571_s9 + $0x320] sm:$0xff]  }
 0x77e   : > { %3995 = vmatpush3.bf16.msra.mxu0 %v4274_v55  ;;  %3117 = vmatprep.mubr.bf16.mxu0 %v1849_v59  ;;  %v4316_v55 = vld [vmem:[%s5571_s9 + $0x3e0] sm:$0xff]   ;;  %v4320_v59 = vld [vmem:[%s5571_s9 + $0x3d8] sm:$0xff]  }
 0x77f   : > { %3974 = vmatprep.subr.bf16.mxu1 %v4275_v57  ;;  %3996 = vmatprep.subr.bf16.mxu0 %v4276_v58  ;;  %v4318_v57 = vld [vmem:[%s5571_s9 + $0x3a0] sm:$0xff]   ;;  %v4319_v58 = vld [vmem:[%s5571_s9 + $0x358] sm:$0xff]  }
 0x781   : > { %3975 = vmatpush3.bf16.msra.mxu1 %v4277_v60  ;;  %v4321_v60 = vld [vmem:[%s5571_s9 + $0x318] sm:$0xff]  }
 0x782   : > { %3997 = vmatpush3.bf16.msra.mxu0 %v4278_v61  ;;  %3976 = vmatprep.subr.bf16.mxu1 %v4279_v62  ;;  %v4322_v61 = vld [vmem:[%s5571_s9 + $0x398] sm:$0xff]   ;;  %v4323_v62 = vld [vmem:[%s5571_s9 + $0x350] sm:$0xff]  }
 0x783   : > { %3998 = vmatprep.subr.bf16.mxu0 %v4280_v63  ;;  %v4324_v63 = vld [vmem:[%s5571_s9 + $0x3d0] sm:$0xff]  }
 0x785   : > { %3977 = vmatpush3.bf16.msra.mxu1 %v4281_v0  ;;  %v4325_v0 = vld [vmem:[%s5571_s9 + $0x310] sm:$0xff]  }
 0x786   : > { %3999 = vmatpush3.bf16.msra.mxu0 %v4282_v4  ;;  %3978 = vmatprep.subr.bf16.mxu1 %v4283_v5  ;;  %v4326_v4 = vld [vmem:[%s5571_s9 + $0x390] sm:$0xff]   ;;  %v4327_v5 = vld [vmem:[%s5571_s9 + $0x348] sm:$0xff]  }
 0x787   : > { %4000 = vmatprep.subr.bf16.mxu0 %v4284_v6  ;;  %v4328_v6 = vld [vmem:[%s5571_s9 + $0x3c8] sm:$0xff]  }
 0x789   : > { %3979 = vmatpush3.bf16.msra.mxu1 %v4285_v7  ;;  %v4329_v7 = vld [vmem:[%s5571_s9 + $0x308] sm:$0xff]  }
 0x78a   : > { %4001 = vmatpush3.bf16.msra.mxu0 %v4286_v8  ;;  %3980 = vmatprep.subr.bf16.mxu1 %v4287_v9  ;;  %v4330_v8 = vld [vmem:[%s5571_s9 + $0x388] sm:$0xff]   ;;  %v4331_v9 = vld [vmem:[%s5571_s9 + $0x340] sm:$0xff]  }
 0x78b   : > { %4002 = vmatprep.subr.bf16.mxu0 %v4288_v10  ;;  %v4332_v10 = vld [vmem:[%s5571_s9 + $0x3c0] sm:$0xff]  }
 0x78d   : > { %3981 = vmatpush3.bf16.msra.mxu1 %v4289_v11  ;;  %v4333_v11 = vld [vmem:[%s5571_s9 + $0x300] sm:$0xff]  }
 0x78e   : > { %4003 = vmatpush3.bf16.msra.mxu0 %v4290_v12  ;;  %3982 = vmatprep.subr.bf16.mxu1 %v4291_v17  ;;  %v1834_v12 = vmax.f32 %v5037_v13, 0.0  ;;  %v4334_v17 = vld [vmem:[%s5571_s9 + $0x380] sm:$0xff]  }
 0x78f   : > { %4004 = vmatprep.subr.bf16.mxu0 %v4292_v18  ;;  %v1836_v18 = vmax.f32 %v5040_v14, 0.0  ;;  %v3728_v14 = vld [vmem:[%s5572_s10] ss:$0 sm:$0xff] }
 0x791   : > { %3983 = vmatpush3.bf16.msra.mxu1 %v4293_v19  ;;  %v1850_v19 = vpack.c.bf16 %v1834_v12, %v1834_v12  ;;  %v1852_v47 = vpack.c.bf16 %v1836_v18, %v1836_v18  ;;  %v3273_v12 = vld [vmem:[%s5575_s13 + $0x68] sm:$0xff]  ;;  %v3271_v18 = vld [vmem:[%s5575_s13 + $0x58] sm:$0xff] }
 0x792   : > { %4005 = vmatpush3.bf16.msra.mxu0 %v4294_v22  ;;  %3984 = vmatprep.subr.bf16.mxu1 %v4295_v23 }
 0x793   : > { %4006 = vmatprep.subr.bf16.mxu0 %v4296_v25 }
 0x795   : > { %3985 = vmatpush3.bf16.msra.mxu1 %v4297_v45 }
 0x796   : > { %4007 = vmatpush3.bf16.msra.mxu0 %v4298_v50  ;;  %3986 = vmatprep.subr.bf16.mxu1 %v4299_v2 }
 0x797   : > { %4008 = vmatprep.subr.bf16.mxu0 %v4300_v46 }
 0x799   : > { %3987 = vmatpush3.bf16.msra.mxu1 %v4301_v27 }
 0x79a   : > { %4009 = vmatpush3.bf16.msra.mxu0 %v4302_v53  ;;  %4016 = vmatprep.subr.bf16.mxu1 %v4303_v29 }
 0x79b   : > { %4038 = vmatprep.subr.bf16.mxu0 %v4304_v15 }
 0x79c   : > { %3078 = vmatmul.mubr.bf16.vlgmr.msra.gmra.mxu1 %v1846_v31 }
 0x79d   : > { %3118 = vmatmul.mubr.bf16.vlgmr.msra.gmra.mxu0 %v1848_v34  ;;  %4017 = vmatpush3.bf16.msra.mxu1 %v4305_v52 }
 0x79e   : > { %3157 = vmatprep.mubr.bf16.mxu1 %v1851_v21  ;;  %4039 = vmatpush3.bf16.msra.mxu0 %v4306_v32 }
 0x79f   : > { %3197 = vmatprep.mubr.bf16.mxu0 %v1853_v36  ;;  %4018 = vmatprep.subr.bf16.mxu1 %v4307_v20 }
 0x7a0   : > { %4040 = vmatprep.subr.bf16.mxu0 %v4308_v35 }
 0x7a1   : > { %4019 = vmatpush3.bf16.msra.mxu1 %v4309_v37 }
 0x7a2   : > { %4041 = vmatpush3.bf16.msra.mxu0 %v4310_v38  ;;  %4020 = vmatprep.subr.bf16.mxu1 %v4311_v39 }
 0x7a3   : > { %4042 = vmatprep.subr.bf16.mxu0 %v4312_v40 }
 0x7a5   : > { %4021 = vmatpush3.bf16.msra.mxu1 %v4313_v41 }
 0x7a6   : > { %4043 = vmatpush3.bf16.msra.mxu0 %v4314_v42  ;;  %4022 = vmatprep.subr.bf16.mxu1 %v4315_v54 }
 0x7a7   : > { %4044 = vmatprep.subr.bf16.mxu0 %v4316_v55 }
 0x7a9   : > { %4023 = vmatpush3.bf16.msra.mxu1 %v4317_v56 }
 0x7aa   : > { %4045 = vmatpush3.bf16.msra.mxu0 %v4318_v57  ;;  %4024 = vmatprep.subr.bf16.mxu1 %v4319_v58 }
 0x7ab   : > { %4046 = vmatprep.subr.bf16.mxu0 %v4320_v59 }
 0x7ad   : > { %4025 = vmatpush3.bf16.msra.mxu1 %v4321_v60 }
 0x7ae   : > { %4047 = vmatpush3.bf16.msra.mxu0 %v4322_v61  ;;  %4026 = vmatprep.subr.bf16.mxu1 %v4323_v62 }
 0x7af   : > { %4048 = vmatprep.subr.bf16.mxu0 %v4324_v63 }
 0x7b1   : > { %4027 = vmatpush3.bf16.msra.mxu1 %v4325_v0 }
 0x7b2   : > { %4049 = vmatpush3.bf16.msra.mxu0 %v4326_v4  ;;  %4028 = vmatprep.subr.bf16.mxu1 %v4327_v5 }
 0x7b3   : > { %4050 = vmatprep.subr.bf16.mxu0 %v4328_v6 }
 0x7b5   : > { %4029 = vmatpush3.bf16.msra.mxu1 %v4329_v7 }
 0x7b6   : > { %4051 = vmatpush3.bf16.msra.mxu0 %v4330_v8  ;;  %4030 = vmatprep.subr.bf16.mxu1 %v4331_v9 }
 0x7b7   : > { %4052 = vmatprep.subr.bf16.mxu0 %v4332_v10 }
 0x7b9   : > { %4031 = vmatpush3.bf16.msra.mxu1 %v4333_v11  ;;  %v3275_v11 = vld [vmem:[%s5575_s13 + $0x78] sm:$0xff] }
 0x7ba   : > { %4053 = vmatpush3.bf16.msra.mxu0 %v4334_v17  ;;  %3288 = vmatprep.subr.mxu1 %v4439_v1  ;;  %v3272_v17 = vld [vmem:[%s5575_s13 + $0x60] sm:$0xff] }
 0x7bb   : > { %4118 = vmatprep.subr.mxu0 %v4439_v1 }
 0x7bc   : > { %3158 = vmatmul.mubr.bf16.vlgmr.msra.gmra.mxu1 %v1850_v19  ;;  %v3270_v19 = vld [vmem:[%s5575_s13 + $0x50] sm:$0xff] }
 0x7bd   : > { %3198 = vmatmul.mubr.bf16.vlgmr.msra.gmra.mxu0 %v1852_v47  ;;  %3289 = vmatpush1.msra.mxu1 %v3275_v11  ;;  %v3269_v47 = vld [vmem:[%s5575_s13 + $0x48] sm:$0xff] }
 0x7be   : > { %4142 = vmatprep.mubr.msk.f32.mxu0 %vm4440_vm0, %v4439_v1  ;;  %3290 = vmatprep.subr.mxu1 %v4439_v1  ;;  %v3446_v11 = vld [vmem:[%s5579_s17 + $0x8] sm:$0xff] }
 0x81c   : > { %v3900_v13 = vpop.f32.mrf.mxu1  ;;  %v3922_v22 = vpop.f32.mrf.mxu0 }
 0x81e   : > { %v3901_v23 = vpop.f32.mrf.mxu1  ;;  %v3923_v24 = vpop.f32.mrf.mxu0 }
 0x81f   : > { %v3902_v25 = vadd.f32 %v3901_v23, %v3900_v13  ;;  %v3924_v48 = vadd.f32 %v3923_v24, %v3922_v22  ;;  %v3268_v13 = vld [vmem:[%s5575_s13 + $0x40] sm:$0xff]  ;;  %v3267_v22 = vld [vmem:[%s5575_s13 + $0x38] sm:$0xff]  ;;  %v3265_v23 = vld [vmem:[%s5575_s13 + $0x28] sm:$0xff] }
 0x820   : > { %v3903_v26 = vpop.f32.mrf.mxu1  ;;  %v3925_v45 = vpop.f32.mrf.mxu0  ;;  %v3264_v24 = vld [vmem:[%s5575_s13 + $0x20] sm:$0xff] }
 0x821   : > { %v2920_v49 = vadd.f32 %v3902_v25, %v3728_v14  ;;  %v3266_v14 = vld [vmem:[%s5575_s13 + $0x30] sm:$0xff]  ;;  %v3263_v25 = vld [vmem:[%s5575_s13 + $0x18] sm:$0xff]  ;;  %v3261_v26 = vld [vmem:[%s5575_s13 + $0x8] sm:$0xff] }
 0x822   : > { %v3904_v50 = vpop.f32.mrf.mxu1  ;;  %v3926_v2 = vpop.f32.mrf.mxu0  ;;  %v3260_v45 = vld [vmem:[%s5575_s13] sm:$0xff] }
 0x823   : > { %v2960_v44 = vadd.f32 %v3924_v48, %v2920_v49  ;;  %v3262_v48 = vld [vmem:[%s5575_s13 + $0x10] sm:$0xff]  ;;  %v3283_v49 = vld [vmem:[%s5575_s13 + $0xb8] sm:$0xff]  ;;  %v3281_v2 = vld [vmem:[%s5575_s13 + $0xa8] sm:$0xff] }
 0x824   : > { %v3282_v50 = vld [vmem:[%s5575_s13 + $0xb0] sm:$0xff] }
 0x83c   : > { %v3944_v46 = vpop.f32.mrf.mxu1  ;;  %v3966_v3 = vpop.f32.mrf.mxu0 }
 0x83e   : > { %v3945_v43 = vpop.f32.mrf.mxu1  ;;  %v3967_v27 = vpop.f32.mrf.mxu0 }
 0x83f   : > { %v3946_v21 = vadd.f32 %v3945_v43, %v3944_v46  ;;  %v3968_v36 = vadd.f32 %v3967_v27, %v3966_v3  ;;  %v3280_v43 = vld [vmem:[%s5575_s13 + $0xa0] sm:$0xff]  ;;  %v3279_v27 = vld [vmem:[%s5575_s13 + $0x98] sm:$0xff] }
 0x840   : > { %v3947_v28 = vpop.f32.mrf.mxu1  ;;  %v3969_v53 = vpop.f32.mrf.mxu0 }
 0x841   : > { %v3000_v35 = vadd.f32 %v3946_v21, %v2960_v44  ;;  %v3857_v53 = vld [vmem:[%s5573_s11] ss:$0 sm:$0xff] }
 0x842   : > { %v3948_v29 = vpop.f32.mrf.mxu1  ;;  %v3970_v30 = vpop.f32.mrf.mxu0 }
 0x843   : > { %v3040_v38 = vadd.f32 %v3968_v36, %v3000_v35  ;;  %v3278_v29 = vld [vmem:[%s5575_s13 + $0x90] sm:$0xff]  ;;  %v3368_v35 = vld [vmem:[%s5577_s15 + $0x48] sm:$0xff]  ;;  %v3367_v36 = vld [vmem:[%s5577_s15 + $0x40] sm:$0xff] }
 0x85c   : > { %v3988_v15 = vpop.f32.mrf.mxu1 }
 0x85d   : > { %v4010_v16 = vpop.f32.mrf.mxu0 }
 0x85e   : > { %v3989_v51 = vpop.f32.mrf.mxu1 }
 0x85f   : > { %v4011_v52 = vpop.f32.mrf.mxu0  ;;  %v3990_v37 = vadd.f32 %v3989_v51, %v3988_v15  ;;  %v3277_v15 = vld [vmem:[%s5575_s13 + $0x88] sm:$0xff] }
 0x860   : > { %v3991_v31 = vpop.f32.mrf.mxu1  ;;  %v4012_v41 = vadd.f32 %v4011_v52, %v4010_v16  ;;  %v3858_v16 = vld [vmem:[%s5574_s12] ss:$0 sm:$0xff] }
 0x861   : > { %v4013_v32 = vpop.f32.mrf.mxu0  ;;  %v3080_v39 = vadd.f32 %v3990_v37, %v3040_v38  ;;  %v3276_v52 = vld [vmem:[%s5575_s13 + $0x80] sm:$0xff]  ;;  %v3366_v38 = vld [vmem:[%s5577_s15 + $0x38] sm:$0xff] }
 0x862   : > { %v3992_v34 = vpop.f32.mrf.mxu1  ;;  %v3370_v32 = vld [vmem:[%s5577_s15 + $0x58] sm:$0xff] }
 0x863   : > { %v4014_v20 = vpop.f32.mrf.mxu0  ;;  %v3120_v55 = vadd.f32 %v4012_v41, %v3080_v39  ;;  %v3369_v34 = vld [vmem:[%s5577_s15 + $0x50] sm:$0xff]  ;;  %4119 = vmatpush3.msra.mxu0 %v3370_v32  ;;  %v3364_v41 = vld [vmem:[%s5577_s15 + $0x28] sm:$0xff] }
 0x864   : > { %4120 = vmatprep.subr.mxu0 %v4439_v1  ;;  %v3365_v39 = vld [vmem:[%s5577_s15 + $0x30] sm:$0xff] }
 0x865   : > { %4121 = vmatpush3.msra.mxu0 %v3369_v34 }
 0x866   : > { %4122 = vmatprep.subr.mxu0 %v4439_v1 }
 0x867   : > { %4123 = vmatpush3.msra.mxu0 %v3368_v35 }
 0x868   : > { %4124 = vmatprep.subr.mxu0 %v4439_v1 }
 0x869   : > { %4125 = vmatpush3.msra.mxu0 %v3367_v36 }
 0x86a   : > { %4126 = vmatprep.subr.mxu0 %v4439_v1 }
 0x86b   : > { %4127 = vmatpush3.msra.mxu0 %v3366_v38 }
 0x86c   : > { %4128 = vmatprep.subr.mxu0 %v4439_v1 }
 0x86d   : > { %4129 = vmatpush3.msra.mxu0 %v3365_v39 }
 0x86e   : > { %4130 = vmatprep.subr.mxu0 %v4439_v1 }
 0x86f   : > { %4131 = vmatpush3.msra.mxu0 %v3364_v41 }
 0x870   : > { %4132 = vmatprep.subr.mxu0 %v4439_v1 }
 0x87c   : > { %v4032_v40 = vpop.f32.mrf.mxu1 }
 0x87d   : > { %v4054_v42 = vpop.f32.mrf.mxu0 }
 0x87e   : > { %v4033_v54 = vpop.f32.mrf.mxu1 }
 0x87f   : > { %v4034_v56 = vadd.f32 %v4033_v54, %v4032_v40  ;;  %v4055_v57 = vpop.f32.mrf.mxu0  ;;  %v3362_v54 = vld [vmem:[%s5577_s15 + $0x18] sm:$0xff] }
 0x880   : > { %v4035_v58 = vpop.f32.mrf.mxu1  ;;  %v4056_v60 = vadd.f32 %v4055_v57, %v4054_v42  ;;  %v3363_v42 = vld [vmem:[%s5577_s15 + $0x20] sm:$0xff] }
 0x881   : > { %v3160_v59 = vadd.f32 %v4034_v56, %v3120_v55  ;;  %v4057_v61 = vpop.f32.mrf.mxu0  ;;  %4133 = vmatpush3.msra.mxu0 %v3363_v42 }
 0x882   : > { %v4036_v62 = vpop.f32.mrf.mxu1  ;;  %4134 = vmatprep.subr.mxu0 %v4439_v1 }
 0x883   : > { %v3200_v63 = vadd.f32 %v4056_v60, %v3160_v59  ;;  %v4058_v0 = vpop.f32.mrf.mxu0  ;;  %4135 = vmatpush3.msra.mxu0 %v3362_v54 }
 0x884   : > { %4136 = vmatprep.subr.mxu0 %v4439_v1  ;;  %v3361_v0 = vld [vmem:[%s5577_s15 + $0x10] sm:$0xff] }
 0x885   : > { %v3205_v4 = vadd.f32 %v3200_v63, %v4747_v33  ;;  %v3274_v33 = vld [vmem:[%s5575_s13 + $0x70] sm:$0xff]  ;;  %4137 = vmatpush3.msra.mxu0 %v3361_v0 }
 0x886   : > { %3291 = vmatpush1.msra.mxu1 %v3274_v33  ;;  %4138 = vmatprep.subr.mxu0 %v4439_v1  ;;  %v3445_v33 = vld [vmem:[%s5579_s17] sm:$0xff] }
 0x887   : > { %v3208_v5 = vsel %vm1185_vm6, %v3205_v4, 0.0  ;;  %3292 = vmatprep.subr.mxu1 %v4439_v1 }
 0x888   : > { %3209 = vadd.xlane.f32.xlu0 %v3208_v5  ;;  %3293 = vmatpush1.msra.mxu1 %v3273_v12  ;;  %v3359_v5 = vld [vmem:[%s5577_s15] sm:$0xff] }
 0x889   : > { %3294 = vmatprep.subr.mxu1 %v4439_v1  ;;  %v3371_v12 = vld [vmem:[%s5578_s16] sm:$0x1] }
 0x88a   : > { %3295 = vmatpush1.msra.mxu1 %v3272_v17 }
 0x88b   : > { %3296 = vmatprep.subr.mxu1 %v4439_v1 }
 0x88c   : > { %3297 = vmatpush1.msra.mxu1 %v3271_v18 }
 0x88d   : > { %3298 = vmatprep.subr.mxu1 %v4439_v1 }
 0x88e   : > { %3299 = vmatpush1.msra.mxu1 %v3270_v19 }
 0x88f   : > { %3300 = vmatprep.subr.mxu1 %v4439_v1 }
 0x890   : > { %3301 = vmatpush1.msra.mxu1 %v3269_v47 }
 0x891   : > { %3302 = vmatprep.subr.mxu1 %v4439_v1 }
 0x892   : > { %3303 = vmatpush1.msra.mxu1 %v3268_v13 }
 0x893   : > { %3304 = vmatprep.subr.mxu1 %v4439_v1 }
 0x894   : > { %3305 = vmatpush1.msra.mxu1 %v3267_v22 }
 0x895   : > { %3306 = vmatprep.subr.mxu1 %v4439_v1 }
 0x896   : > { %3307 = vmatpush1.msra.mxu1 %v3266_v14 }
 0x897   : > { %3308 = vmatprep.subr.mxu1 %v4439_v1 }
 0x898   : > { %3309 = vmatpush1.msra.mxu1 %v3265_v23 }
 0x899   : > { %3310 = vmatprep.subr.mxu1 %v4439_v1 }
 0x89a   : > { %3311 = vmatpush1.msra.mxu1 %v3264_v24 }
 0x89b   : > { %3312 = vmatprep.subr.mxu1 %v4439_v1 }
 0x89c   : > { %3313 = vmatpush1.msra.mxu1 %v3263_v25 }
 0x89d   : > { %3314 = vmatprep.subr.mxu1 %v4439_v1 }
 0x89e   : > { %3315 = vmatpush1.msra.mxu1 %v3262_v48 }
 0x89f   : > { %3316 = vmatprep.subr.mxu1 %v4439_v1 }
 0x8a0   : > { %3317 = vmatpush1.msra.mxu1 %v3261_v26 }
 0x8a1   : > { %3318 = vmatprep.subr.mxu1 %v4439_v1 }
 0x8a2   : > { %3319 = vmatpush1.msra.mxu1 %v3260_v45 }
 0x8a3   : > { %3336 = vmatprep.subr.mxu1 %v4439_v1 }
 0x8a4   : > { %3337 = vmatpush2.msra.mxu1 %v3283_v49 }
 0x8a5   : > { %3338 = vmatprep.subr.mxu1 %v4439_v1 }
 0x8a6   : > { %3339 = vmatpush2.msra.mxu1 %v3282_v50 }
 0x8a7   : > { %3340 = vmatprep.subr.mxu1 %v4439_v1 }
 0x8a8   : > { %3341 = vmatpush2.msra.mxu1 %v3281_v2 }
 0x8a9   : > { %3342 = vmatprep.subr.mxu1 %v4439_v1 }
 0x8aa   : > { %3343 = vmatpush2.msra.mxu1 %v3280_v43 }
 0x8ab   : > { %3344 = vmatprep.subr.mxu1 %v4439_v1 }
 0x8ac   : > { %3345 = vmatpush2.msra.mxu1 %v3279_v27 }
 0x8ad   : > { %3346 = vmatprep.subr.mxu1 %v4439_v1 }
 0x8ae   : > { %3347 = vmatpush2.msra.mxu1 %v3278_v29 }
 0x8af   : > { %3348 = vmatprep.subr.mxu1 %v4439_v1 }
 0x8b0   : > { %3349 = vmatpush2.msra.mxu1 %v3277_v15 }
 0x8b1   : > { %3350 = vmatprep.subr.mxu1 %v4439_v1 }
 0x8b2   : > { %3351 = vmatpush2.msra.mxu1 %v3276_v52 }
 0x911   : > { %v3210_v6 = vpop.xlane.xlu0 %3209 }
 0x912   : > { %v3211_v7 = vmul.f32 0.03125, %v3210_v6  ;;  %v3284_v6 = vld [vmem:[%s5576_s14] sm:$0x1] }
 0x914   : > { %v5307_v8 = vsub.f32 %v3205_v4, %v3211_v7  ;;  %v3360_v4 = vld [vmem:[%s5577_s15 + $0x8] sm:$0xff] }
 0x915   : > { %4139 = vmatpush3.msra.mxu0 %v3360_v4 }
 0x916   : > { %v3213_v9 = vmul.f32 %v5307_v8, %v5307_v8  ;;  %4140 = vmatprep.subr.mxu0 %v4439_v1 }
 0x917   : > { %4141 = vmatpush3.msra.mxu0 %v3359_v5 }
 0x918   : > { %v3214_v10 = vsel %vm1185_vm6, %v3213_v9, 0.0  ;;  %4145 = vmatprep.subr.mxu0 %v4439_v1 }
 0x919   : > { %3215 = vadd.xlane.f32.xlu0 %v3214_v10 }
 0x9a2   : > { %v3216_v44 = vpop.xlane.xlu0 %3215 }
 0x9a3   : > { %v3217_v46 = vmul.f32 0.03125, %v3216_v44 }
 0x9a5   : > { %v3218_v3 = vadd.f32 1e-05, %v3217_v46 }
 0x9a7   : > { %4345 = vrsqrt.f32 %v3218_v3 }
 0x9b4   : > { %v4346_v28 = vpop.eup %4345 }
 0x9b5   : > { %v3220_v30 = vmul.f32 %v4346_v28, %v5307_v8 }
 0x9b7   : > { %v3227_v51 = vmul.f32 %v3857_v53, %v3220_v30 }
 0x9b9   : > { %v3234_v31 = vadd.f32 %v3858_v16, %v3227_v51 }
 0x9bb   : > { %v3240_v20 = vrot.slane %v3234_v31, 2  ;;  %v3236_v21 = vrot.slane %v3234_v31, 1  ;;  %v3250_v37 = vrot.slane %v3234_v31, 5  ;;  %v3244_v40 = vrot.slane %v3234_v31, 3 }
 0x9bc   : > { %v3248_v56 = vrot.slane %v3234_v31, 4 }
 0x9bd   : > { %3241 = vrot.lane.b32.xlu0 %v3240_v20, %s5623_s4  ;;  %3237 = vrot.lane.b32.xlu1 %v3236_v21, %s4448_s26 }
 0x9c1   : > { %3251 = vrot.lane.b32.xlu1 %v3250_v37, %s4448_s26  ;;  %s3549_s26 = scalar_lea.hbm %s5581_s19, %s5596_s0 }
 0x9c5   : > { %3245 = vrot.lane.b32.xlu1 %v3244_v40, %s5624_s24 }
 0xa2f   : > { %v3238_v55 = vpop.permute.xlu1 %3237  ;;  %v3242_v58 = vpop.permute.xlu0 %3241 }
 0xa30   : > { %v3254_v59 = vsel %vm682_vm1, %v3234_v31, %v3238_v55 }
 0xa31   : > { %v3256_v61 = vsel %vm3255_vm7, %v3254_v59, %v3242_v58 }
 0xa33   : > { %v3252_v57 = vpop.permute.xlu1 %3251 }
 0xa34   : > { %v3259_v60 = vsel %vm682_vm1, %v3248_v56, %v3252_v57 }
 0xa35   : > { %3859 = vmatprep.mubr.msk.f32.mxu1 %vm3255_vm7, %v3259_v60 }
 0xa37   : > { %v3246_v62 = vpop.permute.xlu1 %3245 }
 0xa38   : > { %v3258_v63 = vsel %vm3257_vm8, %v3256_v61, %v3246_v62 }
 0xa39   : > { %3353 = vmatmul.mubr.f32.vlgmr.msra.gmra.mxu1 %v3258_v63 }
 0xaf9   : > { %v3354_v7 = vpop.f32.mrf.mxu1 }
 0xafa   : > { %v3355_v8 = vadd.f32 %v3354_v7, %v3284_v6 }
 0xafb   : > { %v3356_v9 = vpop.f32.mrf.mxu1 }
 0xafc   : > { %v3358_v10 = vmax.f32 %v3355_v8, 0.0 }
 0xafe   : > { %4143 = vmatmul.mubr.msk.f32.vlgmr.msra.gmra.mxu0 %vm3257_vm8, %v3358_v10 }
 0xaff   : > { %4149 = vmatprep.mubr.msk.f32.mxu0 %vm4440_vm0, %v4439_v1  ;;  %4146 = vmatpush3.msra.mxu0 %v3446_v11 }
 0xb00   : > { %4147 = vmatprep.subr.mxu0 %v4439_v1 }
 0xb01   : > { %4148 = vmatpush3.msra.mxu0 %v3445_v33 }
 0xbbe   : > { %v3441_v17 = vpop.f32.mrf.mxu0 }
 0xbbf   : > { %v3442_v18 = vadd.f32 %v3441_v17, %v3371_v12 }
 0xbc0   : > { %v4144_v19 = vpop.f32.mrf.mxu0 }
 0xbc1   : > { %4150 = vmatmul.mubr.msk.f32.vlgmr.msra.gmra.mxu0 %vm760_vm2, %v3442_v18  ;;  %3522 = vst.msk [vmem:[%s650_s30] sm:$0x1] %vm3521_vm9, %v3442_v18 }
 0xbc2   : > { %4360 = shalt.err (!%p4357_p3)
}
 0xbc3   : > { %s4361_s7 = scalar_lea.hbm %s3549_s26, 16  ;;  %s4365_s4 = scalar_lea.hbm %s5581_s19, 64 }
 0xbc4   : > { %p4362_p4 = scmp.ne.s32.totalorder %s3549_s26, %s4361_s7  ;;  %p4366_p9 = scmp.lt.s32.totalorder %s3549_s26, %s5581_s19 }
 0xbc5   : > { %p4367_p10 = scmp.lt.s32.totalorder %s4365_s4, %s4361_s7 }
 0xbc6   : > { %p4363_p7 = pnand %p4362_p4, %p4600_p5 }
 0xbc7   : > { %p4368_p11 = por %p4367_p10, %p4366_p9 }
 0xbc8   : > { %p4364_p8 = pneg %p4363_p7 }
 0xbca   : > { %p4369_p12 = pnand %p4368_p11, %p4364_p8 }
 0xbcc   : > { %4372 = shalt.err (!%p4369_p12)
}
 0xbcd   : > { %4152 = dma.vmem_to_hbm [thread:$0]  (%p4600_p5), %s3552_s22, 16, %s3549_s26, %s3532_s29   ;;  %v3447_v1 = vld [vmem:[%s5580_s18] sm:$0x1]  ;;  %vm3523_vm10 = vcmask 24576  }
 0xbce   : > { %s656_s28 = scalar_lea.vmem [#allocation4], %s5481_s27  ;;  %s5625_s7 = sshll.u32 %s4583_s3, 4 }
 0xbcf   : > { %s3564_s1 = sshll.u32 %s656_s28, 4  ;;  %s5516_s30 = scalar_lea.hbm %s5582_s20, %s5625_s7  ;;  %s5518_s1 = int_to_ptr.vmem [resolvable:$true] %s3564_s1 }
 0xbd0   : > { %s4450_s26 = smov 124   ;;  %s3536_s22 = scalar_lea.sflag [#allocation5], %s5481_s27 }
 0xbd1   : > { %s4373_s29 = scalar_lea.vmem %s5518_s1, 16  ;;  %s4451_s3 = smov [#allocation4]  }
 0xbd2   : > { %p4374_p13 = scmp.ne.s32.totalorder %s5518_s1, %s4373_s29  ;;  %s4377_s24 = sshll.u32 %s4451_s3, 4  ;;  %s4378_s24 = int_to_ptr.vmem [resolvable:$false] %s4377_s24 }
 0xbd3   : > { %s4379_s4 = scalar_lea.vmem %s4378_s24, 32  ;;  %p4380_p2 = scmp.lt.s32.totalorder %s5518_s1, %s4378_s24 }
 0xbd4   : > { %p4375_p0 = pnand %p4374_p13, %p4600_p5  ;;  %p4381_p3 = scmp.lt.s32.totalorder %s4379_s4, %s4373_s29 }
 0xbd6   : > { %p4376_p1 = pneg %p4375_p0  ;;  %p4382_p4 = por %p4381_p3, %p4380_p2 }
 0xbd8   : > { %p4383_p7 = pnand %p4382_p4, %p4376_p1 }
 0xc81   : > { %v3517_v47 = vpop.f32.mrf.mxu0 }
 0xc82   : > { %v3518_v13 = vadd.f32 %v3517_v47, %v3447_v1 }
 0xc83   : > { %v4151_v22 = vpop.f32.mrf.mxu0 }
 0xc84   : > { %3526 = vrot.lane.b32.xlu0 %v3518_v13, %s4450_s26  ;;  %3524 = vst.msk [vmem:[%s656_s28] sm:$0x1] %vm3523_vm10, %v3518_v13 }
 0xc85   : > { %4386 = shalt.err (!%p4383_p7)
}
 0xc86   : > { %s4387_s6 = scalar_lea.hbm %s5516_s30, 16  ;;  %s4391_s28 = scalar_lea.hbm %s5582_s20, 64 }
 0xc87   : > { %p4388_p8 = scmp.ne.s32.totalorder %s5516_s30, %s4387_s6  ;;  %p4392_p11 = scmp.lt.s32.totalorder %s5516_s30, %s5582_s20 }
 0xc88   : > { %p4393_p12 = scmp.lt.s32.totalorder %s4391_s28, %s4387_s6 }
 0xc89   : > { %p4389_p9 = pnand %p4388_p8, %p4600_p5 }
 0xc8a   : > { %p4394_p13 = por %p4393_p12, %p4392_p11 }
 0xc8b   : > { %p4390_p10 = pneg %p4389_p9 }
 0xc8d   : > { %p4395_p0 = pnand %p4394_p13, %p4390_p10 }
 0xc8f   : > { %4398 = shalt.err (!%p4395_p0)
}
 0xc90   : > { %4153 = dma.vmem_to_hbm [thread:$0]  (%p4600_p5), %s5518_s1, 16, %s5516_s30, %s3536_s22   ;;  %vm3529_vm11 = vcmask 0  }
 0xc91   : > { %s668_s29 = scalar_lea.vmem %s5583_s21, %s4624_s23 }
 0xcf6   : > { %v3527_v14 = vpop.permute.xlu0 %3526 }
 0xcf7   : > { %3530 = vst.msk [vmem:[%s668_s29] sm:$0x1] %vm3529_vm11, %v3527_v14 }
 0xcf8 PF: > { %s5626_s3 = sld [smem:[#allocation10_spill]] }
 0xcf9   : > { %s5627_s24 = sld [smem:[#allocation8_spill]] }
 0xcfe   : > { %p4163_p1 = scmp.ge.s32.totalorder %s5626_s3, 2 }
 0xcff   : > { %s3579_s6 = sand.u32 1, %s5627_s24  }
 0xd00   : > { %p4157_p2 = pnand %p4163_p1, %p4604_p6  ;;  %s3580_s5 = scalar_lea.sflag [#allocation3], %s3579_s6 }
 0xd02   : > { %p4158_p3 = pneg %p4157_p2 }
 0xd04   : > { %4416 = dma.done.wait (%p4158_p3), %s3580_s5, 16  }
 0xd05   : > { %4418 = vsyncadd (%p4158_p3), %s3580_s5, 4294967280  ;;  %s3588_s1 = scalar_lea.sflag [#allocation5], %s3579_s6 }
 0xd06   : > { %4420 = dma.done.wait (%p4158_p3), %s3588_s1, 16  }
 0xd07   : > { %4422 = vsyncadd (%p4158_p3), %s3588_s1, 4294967280  ;;  %s5629_s27 = sld [smem:[#allocation11_spill]]  ;;  %s5632_s2 = smov %s4429_s25 }
 0xd08   : > { %s5630_s23 = sld [smem:[#allocation9_spill]] }
 0xd09   : > { %s5631_s26 = sld [smem:[#allocation12_spill]] }
 0xd0d   : > { %p35_p5 = scmp.ge.s32.totalorder %s5629_s27, 6  }
 0xd0e   : > { %s5633_s25 = smov %s5630_s23 }
 0xd0f   :  { %37 = sbr.rel (!%p35_p5) target bundleno = 15 (0xf), region = 160 }
 0xd14   :  { %3598 = vsyncpa [#allocation3], 1 }
 0xd15   :  { %3600 = vsyncpa [#allocation3 + $0x1], 1 }
 0xd16   :  { %3601 = vsyncpa [#allocation5], 1 }
 0xd17   :  { %3603 = vsyncpa [#allocation5 + $0x1], 1 }

</bundles_post_ra>
